<compile_context>
chip_gen: v6e
topology: v6e:2x2x1
jax: 0.10.0
libtpu: 0.0.40
codegen_flags: <defaults>
</compile_context>

<pallas_src>
import math

import jax
import jax.numpy as jnp
from jax.experimental import pallas as pl
from jax.experimental.pallas import tpu as pltpu


def _round_up(x, m):
    return ((x + m - 1) // m) * m


def _make_kernel(T, Bp, D, H, Op, num_layers, n_buf):
    G = 4 * H                       # per-direction gate width (compact)
    n_lstm = 4 * num_layers         # per layer: wih, whh_f, whh_r, bias

    def kernel(*refs):
        x_ref = refs[0]                       # [T, Bp, D]   f32
        mask_ref = refs[1]                    # [T, Bp, 1]   f32, 1.0 where t < length
        lstm_p = refs[2:2 + n_lstm]
        fc_w_ref = refs[2 + n_lstm]           # [2*H, Op]    bf16
        fc_b_ref = refs[3 + n_lstm]           # [1, Op]      f32
        out_ref = refs[4 + n_lstm]            # [T, Bp, Op]  f32
        scratch = refs[5 + n_lstm:]
        layer_out = scratch[:n_buf]           # ping-pong: [T, Bp, 2*H] f32
        xp_ref = scratch[n_buf]               # [T, Bp, 2*G] f32 (fwd proj | rev proj)

        def lstm_cell(g, c):
            # gate layout per direction: [i | f | g | o], each H wide.
            i_g = jax.nn.sigmoid(g[:, 0 * H:1 * H])
            f_g = jax.nn.sigmoid(g[:, 1 * H:2 * H])
            g_g = jnp.tanh(g[:, 2 * H:3 * H])
            o_g = jax.nn.sigmoid(g[:, 3 * H:4 * H])
            c_new = f_g * c + i_g * g_g
            h_new = o_g * jnp.tanh(c_new)
            return h_new, c_new

        for layer in range(num_layers):
            wih_ref = lstm_p[4 * layer + 0]   # [din, 2*G] bf16 (fwd gate cols | rev)
            whh_f_ref = lstm_p[4 * layer + 1]  # [H, G]    bf16
            whh_r_ref = lstm_p[4 * layer + 2]  # [H, G]    bf16
            b_ref = lstm_p[4 * layer + 3]      # [1, 2*G]  f32 (b_ih + b_hh, both dirs)

            if layer == 0:
                inp, din = x_ref[...], D
            else:
                inp, din = layer_out[(layer - 1) % n_buf][...], 2 * H

            # Hoisted input projection: ONE bf16 matmul (f32 accumulation)
            # covering all timesteps and BOTH directions, bias folded in once.
            proj = jnp.dot(inp.reshape(T * Bp, din).astype(jnp.bfloat16),
                           wih_ref[...],
                           preferred_element_type=jnp.float32) + b_ref[...]
            xp_ref[...] = proj.reshape(T, Bp, 2 * G)

            whh_f = whh_f_ref[...]
            whh_r = whh_r_ref[...]
            out_buf = layer_out[layer % n_buf]

            h_f = jnp.zeros((Bp, H), jnp.float32)
            c_f = jnp.zeros((Bp, H), jnp.float32)
            h_r = jnp.zeros((Bp, H), jnp.float32)
            c_r = jnp.zeros((Bp, H), jnp.float32)

            # Fused fwd+rev recurrence, fully unrolled (T small & static); two
            # compact per-direction recurrent dots per step (no structural
            # zeros, no state concatenate).
            # TODO(synk): for T >~ 32 switch to lax.fori_loop(..., unroll=4..8)
            # with T-chunked projection / layer_out streaming (v7x: 64 MiB VMEM).
            for i in range(T):
                t_f, t_r = i, T - 1 - i
                hh_f = jnp.dot(h_f.astype(jnp.bfloat16), whh_f,
                               preferred_element_type=jnp.float32)   # [Bp, G]
                hh_r = jnp.dot(h_r.astype(jnp.bfloat16), whh_r,
                               preferred_element_type=jnp.float32)   # [Bp, G]
                gf = xp_ref[t_f][:, :G] + hh_f
                gr = xp_ref[t_r][:, G:] + hh_r
                # hoisted lane-broadcast of the [Bp,1] validity mask
                m_f = jnp.broadcast_to(mask_ref[t_f], (Bp, H))
                m_r = jnp.broadcast_to(mask_ref[t_r], (Bp, H))

                hf_new, cf_new = lstm_cell(gf, c_f)
                hr_new, cr_new = lstm_cell(gr, c_r)

                # packed-sequence semantics: zero output at padded positions,
                # state advances only on valid steps (reverse direction thus
                # starts at t = length-1 with zero state).
                out_buf[t_f, :, 0:H] = hf_new * m_f
                out_buf[t_r, :, H:2 * H] = hr_new * m_r
                h_f = h_f + m_f * (hf_new - h_f)
                c_f = c_f + m_f * (cf_new - c_f)
                h_r = h_r + m_r * (hr_new - h_r)
                c_r = c_r + m_r * (cr_new - c_r)

        # TODO(synk): nn.Dropout is identity at inference time; no stochastic mask.
        # Final Linear as one lane-dense bf16 matmul (output lanes padded to Op).
        h_all = layer_out[(num_layers - 1) % n_buf][...].reshape(T * Bp, 2 * H)
        out2d = jnp.dot(h_all.astype(jnp.bfloat16), fc_w_ref[...],
                        preferred_element_type=jnp.float32) + fc_b_ref[...]
        out_ref[...] = out2d.reshape(T, Bp, Op)

    return kernel


def init_params(key, input_size, hidden_size, output_size, num_layers):
    """Deterministic synthetic parameters (same shapes as nn.LSTM / nn.Linear).

    Per (layer, direction): Wih [d_in, 4H], Whh [H, 4H], bias [1, 4H] (ih+hh),
    then fc_w [hidden_size, output_size], fc_b [1, output_size]. All weights are
    pre-transposed to [in_features, out_features]; gate order is [i|f|g|o]."""
    H = hidden_size // 2          # bidirectional -> per-direction hidden size
    k_lstm = 1.0 / math.sqrt(H)
    params = []
    for layer in range(num_layers):
        d_in = input_size if layer == 0 else hidden_size
        for _ in range(2):        # forward / reverse directions
            key, k1, k2, k3, k4 = jax.random.split(key, 5)
            wih = jax.random.uniform(k1, (d_in, 4 * H), jnp.float32, -k_lstm, k_lstm)
            whh = jax.random.uniform(k2, (H, 4 * H), jnp.float32, -k_lstm, k_lstm)
            b_ih = jax.random.uniform(k3, (1, 4 * H), jnp.float32, -k_lstm, k_lstm)
            b_hh = jax.random.uniform(k4, (1, 4 * H), jnp.float32, -k_lstm, k_lstm)
            params += [wih, whh, b_ih + b_hh]
    key, k5, k6 = jax.random.split(key, 3)
    k_fc = 1.0 / math.sqrt(hidden_size)
    fc_w = jax.random.uniform(k5, (hidden_size, output_size), jnp.float32, -k_fc, k_fc)
    fc_b = jax.random.uniform(k6, (1, output_size), jnp.float32, -k_fc, k_fc)
    params += [fc_w, fc_b]
    return params


def _arrange_params(params, hidden_size, output_size, num_layers, Op):
    """Fuse per-direction nn.LSTM weights into the compact kernel layout.

    Per layer: wih [din, 8H] bf16 (fwd gate cols | rev gate cols),
    whh_f / whh_r [H, 4H] bf16 (split block-diagonal -> no structural zeros),
    bias [1, 8H] f32. Final Linear: fc_w [2H, Op] bf16 (zero-padded output
    lanes -> padded lanes stay exactly fc_b pad = 0), fc_b [1, Op] f32."""
    H = hidden_size // 2
    arranged = []
    idx = 0
    for _ in range(num_layers):
        wih_f, whh_f, b_f = params[idx], params[idx + 1], params[idx + 2]
        wih_r, whh_r, b_r = params[idx + 3], params[idx + 4], params[idx + 5]
        idx += 6
        wih = jnp.concatenate([wih_f, wih_r], axis=1).astype(jnp.bfloat16)
        bias = jnp.concatenate([b_f, b_r], axis=1).astype(jnp.float32)
        arranged += [wih, whh_f.astype(jnp.bfloat16),
                     whh_r.astype(jnp.bfloat16), bias]
    fc_w, fc_b = params[idx], params[idx + 1]          # [2H, O], [1, O]
    fc_w_p = (jnp.zeros((2 * H, Op), jnp.float32)
              .at[:, :output_size].set(fc_w).astype(jnp.bfloat16))
    fc_b_p = jnp.zeros((1, Op), jnp.float32).at[:, :output_size].set(fc_b)
    arranged += [fc_w_p, fc_b_p]
    return arranged


def seq2seq_forward(src, feature_lengths, params, *, hidden_size, output_size,
                    num_layers):
    """src: [B, T, input_size] (batch_first, like the PyTorch module).

    pad_packed_sequence pads to max(lengths); the demo uses
    max(feature_lengths) == T so the output length matches exactly. Outputs at
    padded positions equal the fc bias (Linear of zeros), matching PyTorch."""
    B, T, D_in = src.shape
    H = hidden_size // 2
    O = output_size

    Bp = _round_up(max(B, 1), 8)        # sublane-aligned batch
    Op = _round_up(max(O, 1), 128)      # lane-dense output store

    # Time-major, batch padded with zeros; feature dims kept compact.
    x_tm = jnp.transpose(src, (1, 0, 2)).astype(jnp.float32)          # [T, B, D]
    x_p = jnp.zeros((T, Bp, D_in), jnp.float32).at[:, :B, :].set(x_tm)

    # Compact [T, Bp, 1] validity mask (no Hp pre-broadcast); the per-step
    # [Bp, H] broadcast happens in-kernel on a VPU slot with slack.
    lengths = feature_lengths.astype(jnp.int32)
    valid = jnp.arange(T, dtype=jnp.int32)[:, None] < lengths[None, :]   # [T, B]
    mask = jnp.zeros((T, Bp, 1), jnp.float32).at[:, :B, 0].set(
        valid.astype(jnp.float32))

    arranged = _arrange_params(params, hidden_size, O, num_layers, Op)
    inputs = [x_p, mask] + arranged

    n_buf = min(num_layers, 2)          # ping-pong layer-output buffers
    scratch_shapes = (
        [pltpu.VMEM((T, Bp, 2 * H), jnp.float32)] * n_buf
        + [pltpu.VMEM((T, Bp, 8 * H), jnp.float32)])

    # Advisory VMEM limit (capped below 64 MiB for v7x headroom) and cost hint.
    in_bytes = int(sum(int(a.size) * a.dtype.itemsize for a in inputs))
    out_bytes = int(T * Bp * Op * 4)
    scratch_bytes = int((n_buf * T * Bp * 2 * H + T * Bp * 8 * H) * 4)
    vmem_limit = int(min(max(2 * (in_bytes + out_bytes + scratch_bytes),
                             16 * 1024 * 1024), 48 * 1024 * 1024))
    flops = 0
    for layer in range(num_layers):
        din = D_in if layer == 0 else 2 * H
        flops += 2 * T * Bp * din * (8 * H)          # hoisted input projection
        flops += 2 * T * 2 * Bp * H * (4 * H)        # per-direction recurrent dots
    flops += 2 * T * Bp * (2 * H) * Op               # final Linear
    transcendentals = int(num_layers * T * Bp * 2 * 5 * H)

    # TODO(synk): for large batch on v7x add a leading batch-chunk grid axis
    # marked "parallel" so both TensorCores are used; degenerate at Bp=8.
    kernel = _make_kernel(T, Bp, D_in, H, Op, num_layers, n_buf)
    out_p = pl.pallas_call(
        kernel,
        out_shape=jax.ShapeDtypeStruct((T, Bp, Op), jnp.float32),
        in_specs=[pl.BlockSpec(memory_space=pltpu.MemorySpace.VMEM)] * len(inputs),
        out_specs=pl.BlockSpec(memory_space=pltpu.MemorySpace.VMEM),
        scratch_shapes=scratch_shapes,
        compiler_params=pltpu.CompilerParams(vmem_limit_bytes=vmem_limit),
        cost_estimate=pl.CostEstimate(flops=int(flops),
                                      transcendentals=transcendentals,
                                      bytes_accessed=in_bytes + out_bytes),
    )(*inputs)

    # Strip padding, back to batch-first [B, T, O].
    return jnp.transpose(out_p[:, :B, :O], (1, 0, 2))


if __name__ == "__main__":
    B, T = 2, 8
    input_size, hidden_size, output_size, num_layers = 16, 32, 8, 2

    key = jax.random.PRNGKey(0)
    k_param, k_x = jax.random.split(key)
    params = init_params(k_param, input_size, hidden_size, output_size, num_layers)

    src = jax.random.normal(k_x, (B, T, input_size), jnp.float32)
    # max(lengths) == T so pad_packed_sequence output length equals T.
    feature_lengths = jnp.array([T, T - 3], dtype=jnp.int32)

    out = seq2seq_forward(src, feature_lengths, params,
                          hidden_size=hidden_size, output_size=output_size,
                          num_layers=num_layers)
    out = jax.block_until_ready(out)
    assert out.shape == (B, T, output_size)
    assert bool(jnp.all(jnp.isfinite(out)))
    print("KERNEL_OK")
</pallas_src>

<mosaic_0001>
module attributes {stable_mosaic.version = 11 : i64} {
  func.func @kernel(%arg0: memref<8x8x16xf32, #tpu.memory_space<vmem>>, %arg1: memref<8x8x1xf32, #tpu.memory_space<vmem>>, %arg2: memref<16x128xbf16, #tpu.memory_space<vmem>>, %arg3: memref<16x64xbf16, #tpu.memory_space<vmem>>, %arg4: memref<16x64xbf16, #tpu.memory_space<vmem>>, %arg5: memref<1x128xf32, #tpu.memory_space<vmem>>, %arg6: memref<32x128xbf16, #tpu.memory_space<vmem>>, %arg7: memref<16x64xbf16, #tpu.memory_space<vmem>>, %arg8: memref<16x64xbf16, #tpu.memory_space<vmem>>, %arg9: memref<1x128xf32, #tpu.memory_space<vmem>>, %arg10: memref<32x128xbf16, #tpu.memory_space<vmem>>, %arg11: memref<1x128xf32, #tpu.memory_space<vmem>>, %arg12: memref<8x8x128xf32, #tpu.memory_space<vmem>>, %arg13: memref<8x8x32xf32, #tpu.memory_space<vmem>>, %arg14: memref<8x8x32xf32, #tpu.memory_space<vmem>>, %arg15: memref<8x8x128xf32, #tpu.memory_space<vmem>>) attributes {dimension_semantics = [], scalar_prefetch = 0 : i64, scratch_operands = 3 : i64, tpu.core_type = #tpu.core_type<tc>} {
    %c0 = arith.constant 0 : index
    %c0_0 = arith.constant 0 : index
    %c0_1 = arith.constant 0 : index
    %0 = vector.load %arg0[%c0, %c0_0, %c0_1] : memref<8x8x16xf32, #tpu.memory_space<vmem>>, vector<8x8x16xf32>
    %1 = vector.shape_cast %0 : vector<8x8x16xf32> to vector<64x16xf32>
    %2 = arith.truncf %1 : vector<64x16xf32> to vector<64x16xbf16>
    %c0_2 = arith.constant 0 : index
    %c0_3 = arith.constant 0 : index
    %3 = vector.load %arg2[%c0_2, %c0_3] : memref<16x128xbf16, #tpu.memory_space<vmem>>, vector<16x128xbf16>
    %cst = arith.constant dense<0.000000e+00> : vector<64x128xf32>
    %4 = tpu.matmul %2, %3, %cst {dimension_numbers = #tpu.dot_dimension_numbers<[1], [0], [0], [1], [0, 0, 1, 1], [], []>} : vector<64x16xbf16>, vector<16x128xbf16>, vector<64x128xf32> -> vector<64x128xf32>
    %c0_4 = arith.constant 0 : index
    %c0_5 = arith.constant 0 : index
    %5 = vector.load %arg5[%c0_4, %c0_5] : memref<1x128xf32, #tpu.memory_space<vmem>>, vector<1x128xf32>
    %6 = vector.broadcast %5 : vector<1x128xf32> to vector<64x128xf32>
    %7 = arith.addf %4, %6 : vector<64x128xf32>
    %8 = vector.shape_cast %7 : vector<64x128xf32> to vector<8x8x128xf32>
    %c0_6 = arith.constant 0 : index
    %c0_7 = arith.constant 0 : index
    %c0_8 = arith.constant 0 : index
    %9 = vector.load %arg15[%c0_6, %c0_7, %c0_8] : memref<8x8x128xf32, #tpu.memory_space<vmem>>, vector<8x8x128xf32>
    tpu.vector_store %arg15[%c0_6, %c0_7, %c0_8], %8 {strides = array<i32>} : memref<8x8x128xf32, #tpu.memory_space<vmem>>, vector<8x8x128xf32>,
    %c0_9 = arith.constant 0 : index
    %c0_10 = arith.constant 0 : index
    %10 = vector.load %arg3[%c0_9, %c0_10] : memref<16x64xbf16, #tpu.memory_space<vmem>>, vector<16x64xbf16>
    %c0_11 = arith.constant 0 : index
    %c0_12 = arith.constant 0 : index
    %11 = vector.load %arg4[%c0_11, %c0_12] : memref<16x64xbf16, #tpu.memory_space<vmem>>, vector<16x64xbf16>
    %cst_13 = arith.constant 0.000000e+00 : f32
    %12 = vector.broadcast %cst_13 : f32 to vector<8x16xf32>
    %cst_14 = arith.constant 0.000000e+00 : f32
    %13 = vector.broadcast %cst_14 : f32 to vector<8x16xf32>
    %cst_15 = arith.constant 0.000000e+00 : f32
    %14 = vector.broadcast %cst_15 : f32 to vector<8x16xf32>
    %cst_16 = arith.constant 0.000000e+00 : f32
    %15 = vector.broadcast %cst_16 : f32 to vector<8x16xf32>
    %16 = arith.truncf %12 : vector<8x16xf32> to vector<8x16xbf16>
    %cst_17 = arith.constant dense<0.000000e+00> : vector<8x64xf32>
    %17 = tpu.matmul %16, %10, %cst_17 {dimension_numbers = #tpu.dot_dimension_numbers<[1], [0], [0], [1], [0, 0, 1, 1], [], []>} : vector<8x16xbf16>, vector<16x64xbf16>, vector<8x64xf32> -> vector<8x64xf32>
    %18 = arith.truncf %14 : vector<8x16xf32> to vector<8x16xbf16>
    %cst_18 = arith.constant dense<0.000000e+00> : vector<8x64xf32>
    %19 = tpu.matmul %18, %11, %cst_18 {dimension_numbers = #tpu.dot_dimension_numbers<[1], [0], [0], [1], [0, 0, 1, 1], [], []>} : vector<8x16xbf16>, vector<16x64xbf16>, vector<8x64xf32> -> vector<8x64xf32>
    %c0_19 = arith.constant 0 : index
    %c0_20 = arith.constant 0 : index
    %c0_21 = arith.constant 0 : index
    %20 = vector.load %arg15[%c0_19, %c0_20, %c0_21] : memref<8x8x128xf32, #tpu.memory_space<vmem>>, vector<1x8x128xf32>
    %21 = vector.shape_cast %20 : vector<1x8x128xf32> to vector<8x128xf32>
    %22 = vector.extract_strided_slice %21 {offsets = [0, 0], sizes = [8, 64], strides = [1, 1]} : vector<8x128xf32> to vector<8x64xf32>
    %23 = arith.addf %22, %17 : vector<8x64xf32>
    %c7 = arith.constant 7 : index
    %c0_22 = arith.constant 0 : index
    %c0_23 = arith.constant 0 : index
    %24 = vector.load %arg15[%c7, %c0_22, %c0_23] : memref<8x8x128xf32, #tpu.memory_space<vmem>>, vector<1x8x128xf32>
    %25 = vector.shape_cast %24 : vector<1x8x128xf32> to vector<8x128xf32>
    %26 = vector.extract_strided_slice %25 {offsets = [0, 64], sizes = [8, 64], strides = [1, 1]} : vector<8x128xf32> to vector<8x64xf32>
    %27 = arith.addf %26, %19 : vector<8x64xf32>
    %c0_24 = arith.constant 0 : index
    %c0_25 = arith.constant 0 : index
    %c0_26 = arith.constant 0 : index
    %28 = vector.load %arg1[%c0_24, %c0_25, %c0_26] : memref<8x8x1xf32, #tpu.memory_space<vmem>>, vector<1x8x1xf32>
    %29 = vector.shape_cast %28 : vector<1x8x1xf32> to vector<8x1xf32>
    %30 = vector.shape_cast %29 : vector<8x1xf32> to vector<8x1xf32>
    %31 = vector.broadcast %30 : vector<8x1xf32> to vector<8x16xf32>
    %c7_27 = arith.constant 7 : index
    %c0_28 = arith.constant 0 : index
    %c0_29 = arith.constant 0 : index
    %32 = vector.load %arg1[%c7_27, %c0_28, %c0_29] : memref<8x8x1xf32, #tpu.memory_space<vmem>>, vector<1x8x1xf32>
    %33 = vector.shape_cast %32 : vector<1x8x1xf32> to vector<8x1xf32>
    %34 = vector.shape_cast %33 : vector<8x1xf32> to vector<8x1xf32>
    %35 = vector.broadcast %34 : vector<8x1xf32> to vector<8x16xf32>
    %36 = vector.extract_strided_slice %23 {offsets = [0, 0], sizes = [8, 16], strides = [1, 1]} : vector<8x64xf32> to vector<8x16xf32>
    %37 = arith.negf %36 : vector<8x16xf32>
    %38 = math.exp %37 : vector<8x16xf32>
    %cst_30 = arith.constant 1.000000e+00 : f32
    %39 = vector.broadcast %cst_30 : f32 to vector<8x16xf32>
    %40 = arith.addf %39, %38 : vector<8x16xf32>
    %41 = arith.divf %39, %40 : vector<8x16xf32>
    %42 = vector.extract_strided_slice %23 {offsets = [0, 16], sizes = [8, 16], strides = [1, 1]} : vector<8x64xf32> to vector<8x16xf32>
    %43 = arith.negf %42 : vector<8x16xf32>
    %44 = math.exp %43 : vector<8x16xf32>
    %cst_31 = arith.constant 1.000000e+00 : f32
    %45 = vector.broadcast %cst_31 : f32 to vector<8x16xf32>
    %46 = arith.addf %45, %44 : vector<8x16xf32>
    %47 = arith.divf %45, %46 : vector<8x16xf32>
    %48 = vector.extract_strided_slice %23 {offsets = [0, 32], sizes = [8, 16], strides = [1, 1]} : vector<8x64xf32> to vector<8x16xf32>
    %49 = math.tanh %48 : vector<8x16xf32>
    %50 = vector.extract_strided_slice %23 {offsets = [0, 48], sizes = [8, 16], strides = [1, 1]} : vector<8x64xf32> to vector<8x16xf32>
    %51 = arith.negf %50 : vector<8x16xf32>
    %52 = math.exp %51 : vector<8x16xf32>
    %cst_32 = arith.constant 1.000000e+00 : f32
    %53 = vector.broadcast %cst_32 : f32 to vector<8x16xf32>
    %54 = arith.addf %53, %52 : vector<8x16xf32>
    %55 = arith.divf %53, %54 : vector<8x16xf32>
    %56 = arith.mulf %47, %13 : vector<8x16xf32>
    %57 = arith.mulf %41, %49 : vector<8x16xf32>
    %58 = arith.addf %56, %57 : vector<8x16xf32>
    %59 = math.tanh %58 : vector<8x16xf32>
    %60 = arith.mulf %55, %59 : vector<8x16xf32>
    %61 = vector.extract_strided_slice %27 {offsets = [0, 0], sizes = [8, 16], strides = [1, 1]} : vector<8x64xf32> to vector<8x16xf32>
    %62 = arith.negf %61 : vector<8x16xf32>
    %63 = math.exp %62 : vector<8x16xf32>
    %cst_33 = arith.constant 1.000000e+00 : f32
    %64 = vector.broadcast %cst_33 : f32 to vector<8x16xf32>
    %65 = arith.addf %64, %63 : vector<8x16xf32>
    %66 = arith.divf %64, %65 : vector<8x16xf32>
    %67 = vector.extract_strided_slice %27 {offsets = [0, 16], sizes = [8, 16], strides = [1, 1]} : vector<8x64xf32> to vector<8x16xf32>
    %68 = arith.negf %67 : vector<8x16xf32>
    %69 = math.exp %68 : vector<8x16xf32>
    %cst_34 = arith.constant 1.000000e+00 : f32
    %70 = vector.broadcast %cst_34 : f32 to vector<8x16xf32>
    %71 = arith.addf %70, %69 : vector<8x16xf32>
    %72 = arith.divf %70, %71 : vector<8x16xf32>
    %73 = vector.extract_strided_slice %27 {offsets = [0, 32], sizes = [8, 16], strides = [1, 1]} : vector<8x64xf32> to vector<8x16xf32>
    %74 = math.tanh %73 : vector<8x16xf32>
    %75 = vector.extract_strided_slice %27 {offsets = [0, 48], sizes = [8, 16], strides = [1, 1]} : vector<8x64xf32> to vector<8x16xf32>
    %76 = arith.negf %75 : vector<8x16xf32>
    %77 = math.exp %76 : vector<8x16xf32>
    %cst_35 = arith.constant 1.000000e+00 : f32
    %78 = vector.broadcast %cst_35 : f32 to vector<8x16xf32>
    %79 = arith.addf %78, %77 : vector<8x16xf32>
    %80 = arith.divf %78, %79 : vector<8x16xf32>
    %81 = arith.mulf %72, %15 : vector<8x16xf32>
    %82 = arith.mulf %66, %74 : vector<8x16xf32>
    %83 = arith.addf %81, %82 : vector<8x16xf32>
    %84 = math.tanh %83 : vector<8x16xf32>
    %85 = arith.mulf %80, %84 : vector<8x16xf32>
    %86 = arith.mulf %60, %31 : vector<8x16xf32>
    %c0_36 = arith.constant 0 : index
    %c0_37 = arith.constant 0 : index
    %c0_38 = arith.constant 0 : index
    %87 = vector.load %arg13[%c0_36, %c0_37, %c0_38] : memref<8x8x32xf32, #tpu.memory_space<vmem>>, vector<1x8x16xf32>
    %88 = vector.shape_cast %87 : vector<1x8x16xf32> to vector<8x16xf32>
    %89 = vector.shape_cast %86 : vector<8x16xf32> to vector<1x8x16xf32>
    tpu.vector_store %arg13[%c0_36, %c0_37, %c0_38], %89 {strides = array<i32>} : memref<8x8x32xf32, #tpu.memory_space<vmem>>, vector<1x8x16xf32>,
    %90 = arith.mulf %85, %35 : vector<8x16xf32>
    %c7_39 = arith.constant 7 : index
    %c0_40 = arith.constant 0 : index
    %c16 = arith.constant 16 : index
    %91 = vector.load %arg13[%c7_39, %c0_40, %c16] : memref<8x8x32xf32, #tpu.memory_space<vmem>>, vector<1x8x16xf32>
    %92 = vector.shape_cast %91 : vector<1x8x16xf32> to vector<8x16xf32>
    %93 = vector.shape_cast %90 : vector<8x16xf32> to vector<1x8x16xf32>
    tpu.vector_store %arg13[%c7_39, %c0_40, %c16], %93 {strides = array<i32>} : memref<8x8x32xf32, #tpu.memory_space<vmem>>, vector<1x8x16xf32>,
    %94 = arith.subf %60, %12 : vector<8x16xf32>
    %95 = arith.mulf %31, %94 : vector<8x16xf32>
    %96 = arith.addf %12, %95 : vector<8x16xf32>
    %97 = arith.subf %58, %13 : vector<8x16xf32>
    %98 = arith.mulf %31, %97 : vector<8x16xf32>
    %99 = arith.addf %13, %98 : vector<8x16xf32>
    %100 = arith.subf %85, %14 : vector<8x16xf32>
    %101 = arith.mulf %35, %100 : vector<8x16xf32>
    %102 = arith.addf %14, %101 : vector<8x16xf32>
    %103 = arith.subf %83, %15 : vector<8x16xf32>
    %104 = arith.mulf %35, %103 : vector<8x16xf32>
    %105 = arith.addf %15, %104 : vector<8x16xf32>
    %106 = arith.truncf %96 : vector<8x16xf32> to vector<8x16xbf16>
    %cst_41 = arith.constant dense<0.000000e+00> : vector<8x64xf32>
    %107 = tpu.matmul %106, %10, %cst_41 {dimension_numbers = #tpu.dot_dimension_numbers<[1], [0], [0], [1], [0, 0, 1, 1], [], []>} : vector<8x16xbf16>, vector<16x64xbf16>, vector<8x64xf32> -> vector<8x64xf32>
    %108 = arith.truncf %102 : vector<8x16xf32> to vector<8x16xbf16>
    %cst_42 = arith.constant dense<0.000000e+00> : vector<8x64xf32>
    %109 = tpu.matmul %108, %11, %cst_42 {dimension_numbers = #tpu.dot_dimension_numbers<[1], [0], [0], [1], [0, 0, 1, 1], [], []>} : vector<8x16xbf16>, vector<16x64xbf16>, vector<8x64xf32> -> vector<8x64xf32>
    %c1 = arith.constant 1 : index
    %c0_43 = arith.constant 0 : index
    %c0_44 = arith.constant 0 : index
    %110 = vector.load %arg15[%c1, %c0_43, %c0_44] : memref<8x8x128xf32, #tpu.memory_space<vmem>>, vector<1x8x128xf32>
    %111 = vector.shape_cast %110 : vector<1x8x128xf32> to vector<8x128xf32>
    %112 = vector.extract_strided_slice %111 {offsets = [0, 0], sizes = [8, 64], strides = [1, 1]} : vector<8x128xf32> to vector<8x64xf32>
    %113 = arith.addf %112, %107 : vector<8x64xf32>
    %c6 = arith.constant 6 : index
    %c0_45 = arith.constant 0 : index
    %c0_46 = arith.constant 0 : index
    %114 = vector.load %arg15[%c6, %c0_45, %c0_46] : memref<8x8x128xf32, #tpu.memory_space<vmem>>, vector<1x8x128xf32>
    %115 = vector.shape_cast %114 : vector<1x8x128xf32> to vector<8x128xf32>
    %116 = vector.extract_strided_slice %115 {offsets = [0, 64], sizes = [8, 64], strides = [1, 1]} : vector<8x128xf32> to vector<8x64xf32>
    %117 = arith.addf %116, %109 : vector<8x64xf32>
    %c1_47 = arith.constant 1 : index
    %c0_48 = arith.constant 0 : index
    %c0_49 = arith.constant 0 : index
    %118 = vector.load %arg1[%c1_47, %c0_48, %c0_49] : memref<8x8x1xf32, #tpu.memory_space<vmem>>, vector<1x8x1xf32>
    %119 = vector.shape_cast %118 : vector<1x8x1xf32> to vector<8x1xf32>
    %120 = vector.shape_cast %119 : vector<8x1xf32> to vector<8x1xf32>
    %121 = vector.broadcast %120 : vector<8x1xf32> to vector<8x16xf32>
    %c6_50 = arith.constant 6 : index
    %c0_51 = arith.constant 0 : index
    %c0_52 = arith.constant 0 : index
    %122 = vector.load %arg1[%c6_50, %c0_51, %c0_52] : memref<8x8x1xf32, #tpu.memory_space<vmem>>, vector<1x8x1xf32>
    %123 = vector.shape_cast %122 : vector<1x8x1xf32> to vector<8x1xf32>
    %124 = vector.shape_cast %123 : vector<8x1xf32> to vector<8x1xf32>
    %125 = vector.broadcast %124 : vector<8x1xf32> to vector<8x16xf32>
    %126 = vector.extract_strided_slice %113 {offsets = [0, 0], sizes = [8, 16], strides = [1, 1]} : vector<8x64xf32> to vector<8x16xf32>
    %127 = arith.negf %126 : vector<8x16xf32>
    %128 = math.exp %127 : vector<8x16xf32>
    %cst_53 = arith.constant 1.000000e+00 : f32
    %129 = vector.broadcast %cst_53 : f32 to vector<8x16xf32>
    %130 = arith.addf %129, %128 : vector<8x16xf32>
    %131 = arith.divf %129, %130 : vector<8x16xf32>
    %132 = vector.extract_strided_slice %113 {offsets = [0, 16], sizes = [8, 16], strides = [1, 1]} : vector<8x64xf32> to vector<8x16xf32>
    %133 = arith.negf %132 : vector<8x16xf32>
    %134 = math.exp %133 : vector<8x16xf32>
    %cst_54 = arith.constant 1.000000e+00 : f32
    %135 = vector.broadcast %cst_54 : f32 to vector<8x16xf32>
    %136 = arith.addf %135, %134 : vector<8x16xf32>
    %137 = arith.divf %135, %136 : vector<8x16xf32>
    %138 = vector.extract_strided_slice %113 {offsets = [0, 32], sizes = [8, 16], strides = [1, 1]} : vector<8x64xf32> to vector<8x16xf32>
    %139 = math.tanh %138 : vector<8x16xf32>
    %140 = vector.extract_strided_slice %113 {offsets = [0, 48], sizes = [8, 16], strides = [1, 1]} : vector<8x64xf32> to vector<8x16xf32>
    %141 = arith.negf %140 : vector<8x16xf32>
    %142 = math.exp %141 : vector<8x16xf32>
    %cst_55 = arith.constant 1.000000e+00 : f32
    %143 = vector.broadcast %cst_55 : f32 to vector<8x16xf32>
    %144 = arith.addf %143, %142 : vector<8x16xf32>
    %145 = arith.divf %143, %144 : vector<8x16xf32>
    %146 = arith.mulf %137, %99 : vector<8x16xf32>
    %147 = arith.mulf %131, %139 : vector<8x16xf32>
    %148 = arith.addf %146, %147 : vector<8x16xf32>
    %149 = math.tanh %148 : vector<8x16xf32>
    %150 = arith.mulf %145, %149 : vector<8x16xf32>
    %151 = vector.extract_strided_slice %117 {offsets = [0, 0], sizes = [8, 16], strides = [1, 1]} : vector<8x64xf32> to vector<8x16xf32>
    %152 = arith.negf %151 : vector<8x16xf32>
    %153 = math.exp %152 : vector<8x16xf32>
    %cst_56 = arith.constant 1.000000e+00 : f32
    %154 = vector.broadcast %cst_56 : f32 to vector<8x16xf32>
    %155 = arith.addf %154, %153 : vector<8x16xf32>
    %156 = arith.divf %154, %155 : vector<8x16xf32>
    %157 = vector.extract_strided_slice %117 {offsets = [0, 16], sizes = [8, 16], strides = [1, 1]} : vector<8x64xf32> to vector<8x16xf32>
    %158 = arith.negf %157 : vector<8x16xf32>
    %159 = math.exp %158 : vector<8x16xf32>
    %cst_57 = arith.constant 1.000000e+00 : f32
    %160 = vector.broadcast %cst_57 : f32 to vector<8x16xf32>
    %161 = arith.addf %160, %159 : vector<8x16xf32>
    %162 = arith.divf %160, %161 : vector<8x16xf32>
    %163 = vector.extract_strided_slice %117 {offsets = [0, 32], sizes = [8, 16], strides = [1, 1]} : vector<8x64xf32> to vector<8x16xf32>
    %164 = math.tanh %163 : vector<8x16xf32>
    %165 = vector.extract_strided_slice %117 {offsets = [0, 48], sizes = [8, 16], strides = [1, 1]} : vector<8x64xf32> to vector<8x16xf32>
    %166 = arith.negf %165 : vector<8x16xf32>
    %167 = math.exp %166 : vector<8x16xf32>
    %cst_58 = arith.constant 1.000000e+00 : f32
    %168 = vector.broadcast %cst_58 : f32 to vector<8x16xf32>
    %169 = arith.addf %168, %167 : vector<8x16xf32>
    %170 = arith.divf %168, %169 : vector<8x16xf32>
    %171 = arith.mulf %162, %105 : vector<8x16xf32>
    %172 = arith.mulf %156, %164 : vector<8x16xf32>
    %173 = arith.addf %171, %172 : vector<8x16xf32>
    %174 = math.tanh %173 : vector<8x16xf32>
    %175 = arith.mulf %170, %174 : vector<8x16xf32>
    %176 = arith.mulf %150, %121 : vector<8x16xf32>
    %c1_59 = arith.constant 1 : index
    %c0_60 = arith.constant 0 : index
    %c0_61 = arith.constant 0 : index
    %177 = vector.load %arg13[%c1_59, %c0_60, %c0_61] : memref<8x8x32xf32, #tpu.memory_space<vmem>>, vector<1x8x16xf32>
    %178 = vector.shape_cast %177 : vector<1x8x16xf32> to vector<8x16xf32>
    %179 = vector.shape_cast %176 : vector<8x16xf32> to vector<1x8x16xf32>
    tpu.vector_store %arg13[%c1_59, %c0_60, %c0_61], %179 {strides = array<i32>} : memref<8x8x32xf32, #tpu.memory_space<vmem>>, vector<1x8x16xf32>,
    %180 = arith.mulf %175, %125 : vector<8x16xf32>
    %c6_62 = arith.constant 6 : index
    %c0_63 = arith.constant 0 : index
    %c16_64 = arith.constant 16 : index
    %181 = vector.load %arg13[%c6_62, %c0_63, %c16_64] : memref<8x8x32xf32, #tpu.memory_space<vmem>>, vector<1x8x16xf32>
    %182 = vector.shape_cast %181 : vector<1x8x16xf32> to vector<8x16xf32>
    %183 = vector.shape_cast %180 : vector<8x16xf32> to vector<1x8x16xf32>
    tpu.vector_store %arg13[%c6_62, %c0_63, %c16_64], %183 {strides = array<i32>} : memref<8x8x32xf32, #tpu.memory_space<vmem>>, vector<1x8x16xf32>,
    %184 = arith.subf %150, %96 : vector<8x16xf32>
    %185 = arith.mulf %121, %184 : vector<8x16xf32>
    %186 = arith.addf %96, %185 : vector<8x16xf32>
    %187 = arith.subf %148, %99 : vector<8x16xf32>
    %188 = arith.mulf %121, %187 : vector<8x16xf32>
    %189 = arith.addf %99, %188 : vector<8x16xf32>
    %190 = arith.subf %175, %102 : vector<8x16xf32>
    %191 = arith.mulf %125, %190 : vector<8x16xf32>
    %192 = arith.addf %102, %191 : vector<8x16xf32>
    %193 = arith.subf %173, %105 : vector<8x16xf32>
    %194 = arith.mulf %125, %193 : vector<8x16xf32>
    %195 = arith.addf %105, %194 : vector<8x16xf32>
    %196 = arith.truncf %186 : vector<8x16xf32> to vector<8x16xbf16>
    %cst_65 = arith.constant dense<0.000000e+00> : vector<8x64xf32>
    %197 = tpu.matmul %196, %10, %cst_65 {dimension_numbers = #tpu.dot_dimension_numbers<[1], [0], [0], [1], [0, 0, 1, 1], [], []>} : vector<8x16xbf16>, vector<16x64xbf16>, vector<8x64xf32> -> vector<8x64xf32>
    %198 = arith.truncf %192 : vector<8x16xf32> to vector<8x16xbf16>
    %cst_66 = arith.constant dense<0.000000e+00> : vector<8x64xf32>
    %199 = tpu.matmul %198, %11, %cst_66 {dimension_numbers = #tpu.dot_dimension_numbers<[1], [0], [0], [1], [0, 0, 1, 1], [], []>} : vector<8x16xbf16>, vector<16x64xbf16>, vector<8x64xf32> -> vector<8x64xf32>
    %c2 = arith.constant 2 : index
    %c0_67 = arith.constant 0 : index
    %c0_68 = arith.constant 0 : index
    %200 = vector.load %arg15[%c2, %c0_67, %c0_68] : memref<8x8x128xf32, #tpu.memory_space<vmem>>, vector<1x8x128xf32>
    %201 = vector.shape_cast %200 : vector<1x8x128xf32> to vector<8x128xf32>
    %202 = vector.extract_strided_slice %201 {offsets = [0, 0], sizes = [8, 64], strides = [1, 1]} : vector<8x128xf32> to vector<8x64xf32>
    %203 = arith.addf %202, %197 : vector<8x64xf32>
    %c5 = arith.constant 5 : index
    %c0_69 = arith.constant 0 : index
    %c0_70 = arith.constant 0 : index
    %204 = vector.load %arg15[%c5, %c0_69, %c0_70] : memref<8x8x128xf32, #tpu.memory_space<vmem>>, vector<1x8x128xf32>
    %205 = vector.shape_cast %204 : vector<1x8x128xf32> to vector<8x128xf32>
    %206 = vector.extract_strided_slice %205 {offsets = [0, 64], sizes = [8, 64], strides = [1, 1]} : vector<8x128xf32> to vector<8x64xf32>
    %207 = arith.addf %206, %199 : vector<8x64xf32>
    %c2_71 = arith.constant 2 : index
    %c0_72 = arith.constant 0 : index
    %c0_73 = arith.constant 0 : index
    %208 = vector.load %arg1[%c2_71, %c0_72, %c0_73] : memref<8x8x1xf32, #tpu.memory_space<vmem>>, vector<1x8x1xf32>
    %209 = vector.shape_cast %208 : vector<1x8x1xf32> to vector<8x1xf32>
    %210 = vector.shape_cast %209 : vector<8x1xf32> to vector<8x1xf32>
    %211 = vector.broadcast %210 : vector<8x1xf32> to vector<8x16xf32>
    %c5_74 = arith.constant 5 : index
    %c0_75 = arith.constant 0 : index
    %c0_76 = arith.constant 0 : index
    %212 = vector.load %arg1[%c5_74, %c0_75, %c0_76] : memref<8x8x1xf32, #tpu.memory_space<vmem>>, vector<1x8x1xf32>
    %213 = vector.shape_cast %212 : vector<1x8x1xf32> to vector<8x1xf32>
    %214 = vector.shape_cast %213 : vector<8x1xf32> to vector<8x1xf32>
    %215 = vector.broadcast %214 : vector<8x1xf32> to vector<8x16xf32>
    %216 = vector.extract_strided_slice %203 {offsets = [0, 0], sizes = [8, 16], strides = [1, 1]} : vector<8x64xf32> to vector<8x16xf32>
    %217 = arith.negf %216 : vector<8x16xf32>
    %218 = math.exp %217 : vector<8x16xf32>
    %cst_77 = arith.constant 1.000000e+00 : f32
    %219 = vector.broadcast %cst_77 : f32 to vector<8x16xf32>
    %220 = arith.addf %219, %218 : vector<8x16xf32>
    %221 = arith.divf %219, %220 : vector<8x16xf32>
    %222 = vector.extract_strided_slice %203 {offsets = [0, 16], sizes = [8, 16], strides = [1, 1]} : vector<8x64xf32> to vector<8x16xf32>
    %223 = arith.negf %222 : vector<8x16xf32>
    %224 = math.exp %223 : vector<8x16xf32>
    %cst_78 = arith.constant 1.000000e+00 : f32
    %225 = vector.broadcast %cst_78 : f32 to vector<8x16xf32>
    %226 = arith.addf %225, %224 : vector<8x16xf32>
    %227 = arith.divf %225, %226 : vector<8x16xf32>
    %228 = vector.extract_strided_slice %203 {offsets = [0, 32], sizes = [8, 16], strides = [1, 1]} : vector<8x64xf32> to vector<8x16xf32>
    %229 = math.tanh %228 : vector<8x16xf32>
    %230 = vector.extract_strided_slice %203 {offsets = [0, 48], sizes = [8, 16], strides = [1, 1]} : vector<8x64xf32> to vector<8x16xf32>
    %231 = arith.negf %230 : vector<8x16xf32>
    %232 = math.exp %231 : vector<8x16xf32>
    %cst_79 = arith.constant 1.000000e+00 : f32
    %233 = vector.broadcast %cst_79 : f32 to vector<8x16xf32>
    %234 = arith.addf %233, %232 : vector<8x16xf32>
    %235 = arith.divf %233, %234 : vector<8x16xf32>
    %236 = arith.mulf %227, %189 : vector<8x16xf32>
    %237 = arith.mulf %221, %229 : vector<8x16xf32>
    %238 = arith.addf %236, %237 : vector<8x16xf32>
    %239 = math.tanh %238 : vector<8x16xf32>
    %240 = arith.mulf %235, %239 : vector<8x16xf32>
    %241 = vector.extract_strided_slice %207 {offsets = [0, 0], sizes = [8, 16], strides = [1, 1]} : vector<8x64xf32> to vector<8x16xf32>
    %242 = arith.negf %241 : vector<8x16xf32>
    %243 = math.exp %242 : vector<8x16xf32>
    %cst_80 = arith.constant 1.000000e+00 : f32
    %244 = vector.broadcast %cst_80 : f32 to vector<8x16xf32>
    %245 = arith.addf %244, %243 : vector<8x16xf32>
    %246 = arith.divf %244, %245 : vector<8x16xf32>
    %247 = vector.extract_strided_slice %207 {offsets = [0, 16], sizes = [8, 16], strides = [1, 1]} : vector<8x64xf32> to vector<8x16xf32>
    %248 = arith.negf %247 : vector<8x16xf32>
    %249 = math.exp %248 : vector<8x16xf32>
    %cst_81 = arith.constant 1.000000e+00 : f32
    %250 = vector.broadcast %cst_81 : f32 to vector<8x16xf32>
    %251 = arith.addf %250, %249 : vector<8x16xf32>
    %252 = arith.divf %250, %251 : vector<8x16xf32>
    %253 = vector.extract_strided_slice %207 {offsets = [0, 32], sizes = [8, 16], strides = [1, 1]} : vector<8x64xf32> to vector<8x16xf32>
    %254 = math.tanh %253 : vector<8x16xf32>
    %255 = vector.extract_strided_slice %207 {offsets = [0, 48], sizes = [8, 16], strides = [1, 1]} : vector<8x64xf32> to vector<8x16xf32>
    %256 = arith.negf %255 : vector<8x16xf32>
    %257 = math.exp %256 : vector<8x16xf32>
    %cst_82 = arith.constant 1.000000e+00 : f32
    %258 = vector.broadcast %cst_82 : f32 to vector<8x16xf32>
    %259 = arith.addf %258, %257 : vector<8x16xf32>
    %260 = arith.divf %258, %259 : vector<8x16xf32>
    %261 = arith.mulf %252, %195 : vector<8x16xf32>
    %262 = arith.mulf %246, %254 : vector<8x16xf32>
    %263 = arith.addf %261, %262 : vector<8x16xf32>
    %264 = math.tanh %263 : vector<8x16xf32>
    %265 = arith.mulf %260, %264 : vector<8x16xf32>
    %266 = arith.mulf %240, %211 : vector<8x16xf32>
    %c2_83 = arith.constant 2 : index
    %c0_84 = arith.constant 0 : index
    %c0_85 = arith.constant 0 : index
    %267 = vector.load %arg13[%c2_83, %c0_84, %c0_85] : memref<8x8x32xf32, #tpu.memory_space<vmem>>, vector<1x8x16xf32>
    %268 = vector.shape_cast %267 : vector<1x8x16xf32> to vector<8x16xf32>
    %269 = vector.shape_cast %266 : vector<8x16xf32> to vector<1x8x16xf32>
    tpu.vector_store %arg13[%c2_83, %c0_84, %c0_85], %269 {strides = array<i32>} : memref<8x8x32xf32, #tpu.memory_space<vmem>>, vector<1x8x16xf32>,
    %270 = arith.mulf %265, %215 : vector<8x16xf32>
    %c5_86 = arith.constant 5 : index
    %c0_87 = arith.constant 0 : index
    %c16_88 = arith.constant 16 : index
    %271 = vector.load %arg13[%c5_86, %c0_87, %c16_88] : memref<8x8x32xf32, #tpu.memory_space<vmem>>, vector<1x8x16xf32>
    %272 = vector.shape_cast %271 : vector<1x8x16xf32> to vector<8x16xf32>
    %273 = vector.shape_cast %270 : vector<8x16xf32> to vector<1x8x16xf32>
    tpu.vector_store %arg13[%c5_86, %c0_87, %c16_88], %273 {strides = array<i32>} : memref<8x8x32xf32, #tpu.memory_space<vmem>>, vector<1x8x16xf32>,
    %274 = arith.subf %240, %186 : vector<8x16xf32>
    %275 = arith.mulf %211, %274 : vector<8x16xf32>
    %276 = arith.addf %186, %275 : vector<8x16xf32>
    %277 = arith.subf %238, %189 : vector<8x16xf32>
    %278 = arith.mulf %211, %277 : vector<8x16xf32>
    %279 = arith.addf %189, %278 : vector<8x16xf32>
    %280 = arith.subf %265, %192 : vector<8x16xf32>
    %281 = arith.mulf %215, %280 : vector<8x16xf32>
    %282 = arith.addf %192, %281 : vector<8x16xf32>
    %283 = arith.subf %263, %195 : vector<8x16xf32>
    %284 = arith.mulf %215, %283 : vector<8x16xf32>
    %285 = arith.addf %195, %284 : vector<8x16xf32>
    %286 = arith.truncf %276 : vector<8x16xf32> to vector<8x16xbf16>
    %cst_89 = arith.constant dense<0.000000e+00> : vector<8x64xf32>
    %287 = tpu.matmul %286, %10, %cst_89 {dimension_numbers = #tpu.dot_dimension_numbers<[1], [0], [0], [1], [0, 0, 1, 1], [], []>} : vector<8x16xbf16>, vector<16x64xbf16>, vector<8x64xf32> -> vector<8x64xf32>
    %288 = arith.truncf %282 : vector<8x16xf32> to vector<8x16xbf16>
    %cst_90 = arith.constant dense<0.000000e+00> : vector<8x64xf32>
    %289 = tpu.matmul %288, %11, %cst_90 {dimension_numbers = #tpu.dot_dimension_numbers<[1], [0], [0], [1], [0, 0, 1, 1], [], []>} : vector<8x16xbf16>, vector<16x64xbf16>, vector<8x64xf32> -> vector<8x64xf32>
    %c3 = arith.constant 3 : index
    %c0_91 = arith.constant 0 : index
    %c0_92 = arith.constant 0 : index
    %290 = vector.load %arg15[%c3, %c0_91, %c0_92] : memref<8x8x128xf32, #tpu.memory_space<vmem>>, vector<1x8x128xf32>
    %291 = vector.shape_cast %290 : vector<1x8x128xf32> to vector<8x128xf32>
    %292 = vector.extract_strided_slice %291 {offsets = [0, 0], sizes = [8, 64], strides = [1, 1]} : vector<8x128xf32> to vector<8x64xf32>
    %293 = arith.addf %292, %287 : vector<8x64xf32>
    %c4 = arith.constant 4 : index
    %c0_93 = arith.constant 0 : index
    %c0_94 = arith.constant 0 : index
    %294 = vector.load %arg15[%c4, %c0_93, %c0_94] : memref<8x8x128xf32, #tpu.memory_space<vmem>>, vector<1x8x128xf32>
    %295 = vector.shape_cast %294 : vector<1x8x128xf32> to vector<8x128xf32>
    %296 = vector.extract_strided_slice %295 {offsets = [0, 64], sizes = [8, 64], strides = [1, 1]} : vector<8x128xf32> to vector<8x64xf32>
    %297 = arith.addf %296, %289 : vector<8x64xf32>
    %c3_95 = arith.constant 3 : index
    %c0_96 = arith.constant 0 : index
    %c0_97 = arith.constant 0 : index
    %298 = vector.load %arg1[%c3_95, %c0_96, %c0_97] : memref<8x8x1xf32, #tpu.memory_space<vmem>>, vector<1x8x1xf32>
    %299 = vector.shape_cast %298 : vector<1x8x1xf32> to vector<8x1xf32>
    %300 = vector.shape_cast %299 : vector<8x1xf32> to vector<8x1xf32>
    %301 = vector.broadcast %300 : vector<8x1xf32> to vector<8x16xf32>
    %c4_98 = arith.constant 4 : index
    %c0_99 = arith.constant 0 : index
    %c0_100 = arith.constant 0 : index
    %302 = vector.load %arg1[%c4_98, %c0_99, %c0_100] : memref<8x8x1xf32, #tpu.memory_space<vmem>>, vector<1x8x1xf32>
    %303 = vector.shape_cast %302 : vector<1x8x1xf32> to vector<8x1xf32>
    %304 = vector.shape_cast %303 : vector<8x1xf32> to vector<8x1xf32>
    %305 = vector.broadcast %304 : vector<8x1xf32> to vector<8x16xf32>
    %306 = vector.extract_strided_slice %293 {offsets = [0, 0], sizes = [8, 16], strides = [1, 1]} : vector<8x64xf32> to vector<8x16xf32>
    %307 = arith.negf %306 : vector<8x16xf32>
    %308 = math.exp %307 : vector<8x16xf32>
    %cst_101 = arith.constant 1.000000e+00 : f32
    %309 = vector.broadcast %cst_101 : f32 to vector<8x16xf32>
    %310 = arith.addf %309, %308 : vector<8x16xf32>
    %311 = arith.divf %309, %310 : vector<8x16xf32>
    %312 = vector.extract_strided_slice %293 {offsets = [0, 16], sizes = [8, 16], strides = [1, 1]} : vector<8x64xf32> to vector<8x16xf32>
    %313 = arith.negf %312 : vector<8x16xf32>
    %314 = math.exp %313 : vector<8x16xf32>
    %cst_102 = arith.constant 1.000000e+00 : f32
    %315 = vector.broadcast %cst_102 : f32 to vector<8x16xf32>
    %316 = arith.addf %315, %314 : vector<8x16xf32>
    %317 = arith.divf %315, %316 : vector<8x16xf32>
    %318 = vector.extract_strided_slice %293 {offsets = [0, 32], sizes = [8, 16], strides = [1, 1]} : vector<8x64xf32> to vector<8x16xf32>
    %319 = math.tanh %318 : vector<8x16xf32>
    %320 = vector.extract_strided_slice %293 {offsets = [0, 48], sizes = [8, 16], strides = [1, 1]} : vector<8x64xf32> to vector<8x16xf32>
    %321 = arith.negf %320 : vector<8x16xf32>
    %322 = math.exp %321 : vector<8x16xf32>
    %cst_103 = arith.constant 1.000000e+00 : f32
    %323 = vector.broadcast %cst_103 : f32 to vector<8x16xf32>
    %324 = arith.addf %323, %322 : vector<8x16xf32>
    %325 = arith.divf %323, %324 : vector<8x16xf32>
    %326 = arith.mulf %317, %279 : vector<8x16xf32>
    %327 = arith.mulf %311, %319 : vector<8x16xf32>
    %328 = arith.addf %326, %327 : vector<8x16xf32>
    %329 = math.tanh %328 : vector<8x16xf32>
    %330 = arith.mulf %325, %329 : vector<8x16xf32>
    %331 = vector.extract_strided_slice %297 {offsets = [0, 0], sizes = [8, 16], strides = [1, 1]} : vector<8x64xf32> to vector<8x16xf32>
    %332 = arith.negf %331 : vector<8x16xf32>
    %333 = math.exp %332 : vector<8x16xf32>
    %cst_104 = arith.constant 1.000000e+00 : f32
    %334 = vector.broadcast %cst_104 : f32 to vector<8x16xf32>
    %335 = arith.addf %334, %333 : vector<8x16xf32>
    %336 = arith.divf %334, %335 : vector<8x16xf32>
    %337 = vector.extract_strided_slice %297 {offsets = [0, 16], sizes = [8, 16], strides = [1, 1]} : vector<8x64xf32> to vector<8x16xf32>
    %338 = arith.negf %337 : vector<8x16xf32>
    %339 = math.exp %338 : vector<8x16xf32>
    %cst_105 = arith.constant 1.000000e+00 : f32
    %340 = vector.broadcast %cst_105 : f32 to vector<8x16xf32>
    %341 = arith.addf %340, %339 : vector<8x16xf32>
    %342 = arith.divf %340, %341 : vector<8x16xf32>
    %343 = vector.extract_strided_slice %297 {offsets = [0, 32], sizes = [8, 16], strides = [1, 1]} : vector<8x64xf32> to vector<8x16xf32>
    %344 = math.tanh %343 : vector<8x16xf32>
    %345 = vector.extract_strided_slice %297 {offsets = [0, 48], sizes = [8, 16], strides = [1, 1]} : vector<8x64xf32> to vector<8x16xf32>
    %346 = arith.negf %345 : vector<8x16xf32>
    %347 = math.exp %346 : vector<8x16xf32>
    %cst_106 = arith.constant 1.000000e+00 : f32
    %348 = vector.broadcast %cst_106 : f32 to vector<8x16xf32>
    %349 = arith.addf %348, %347 : vector<8x16xf32>
    %350 = arith.divf %348, %349 : vector<8x16xf32>
    %351 = arith.mulf %342, %285 : vector<8x16xf32>
    %352 = arith.mulf %336, %344 : vector<8x16xf32>
    %353 = arith.addf %351, %352 : vector<8x16xf32>
    %354 = math.tanh %353 : vector<8x16xf32>
    %355 = arith.mulf %350, %354 : vector<8x16xf32>
    %356 = arith.mulf %330, %301 : vector<8x16xf32>
    %c3_107 = arith.constant 3 : index
    %c0_108 = arith.constant 0 : index
    %c0_109 = arith.constant 0 : index
    %357 = vector.load %arg13[%c3_107, %c0_108, %c0_109] : memref<8x8x32xf32, #tpu.memory_space<vmem>>, vector<1x8x16xf32>
    %358 = vector.shape_cast %357 : vector<1x8x16xf32> to vector<8x16xf32>
    %359 = vector.shape_cast %356 : vector<8x16xf32> to vector<1x8x16xf32>
    tpu.vector_store %arg13[%c3_107, %c0_108, %c0_109], %359 {strides = array<i32>} : memref<8x8x32xf32, #tpu.memory_space<vmem>>, vector<1x8x16xf32>,
    %360 = arith.mulf %355, %305 : vector<8x16xf32>
    %c4_110 = arith.constant 4 : index
    %c0_111 = arith.constant 0 : index
    %c16_112 = arith.constant 16 : index
    %361 = vector.load %arg13[%c4_110, %c0_111, %c16_112] : memref<8x8x32xf32, #tpu.memory_space<vmem>>, vector<1x8x16xf32>
    %362 = vector.shape_cast %361 : vector<1x8x16xf32> to vector<8x16xf32>
    %363 = vector.shape_cast %360 : vector<8x16xf32> to vector<1x8x16xf32>
    tpu.vector_store %arg13[%c4_110, %c0_111, %c16_112], %363 {strides = array<i32>} : memref<8x8x32xf32, #tpu.memory_space<vmem>>, vector<1x8x16xf32>,
    %364 = arith.subf %330, %276 : vector<8x16xf32>
    %365 = arith.mulf %301, %364 : vector<8x16xf32>
    %366 = arith.addf %276, %365 : vector<8x16xf32>
    %367 = arith.subf %328, %279 : vector<8x16xf32>
    %368 = arith.mulf %301, %367 : vector<8x16xf32>
    %369 = arith.addf %279, %368 : vector<8x16xf32>
    %370 = arith.subf %355, %282 : vector<8x16xf32>
    %371 = arith.mulf %305, %370 : vector<8x16xf32>
    %372 = arith.addf %282, %371 : vector<8x16xf32>
    %373 = arith.subf %353, %285 : vector<8x16xf32>
    %374 = arith.mulf %305, %373 : vector<8x16xf32>
    %375 = arith.addf %285, %374 : vector<8x16xf32>
    %376 = arith.truncf %366 : vector<8x16xf32> to vector<8x16xbf16>
    %cst_113 = arith.constant dense<0.000000e+00> : vector<8x64xf32>
    %377 = tpu.matmul %376, %10, %cst_113 {dimension_numbers = #tpu.dot_dimension_numbers<[1], [0], [0], [1], [0, 0, 1, 1], [], []>} : vector<8x16xbf16>, vector<16x64xbf16>, vector<8x64xf32> -> vector<8x64xf32>
    %378 = arith.truncf %372 : vector<8x16xf32> to vector<8x16xbf16>
    %cst_114 = arith.constant dense<0.000000e+00> : vector<8x64xf32>
    %379 = tpu.matmul %378, %11, %cst_114 {dimension_numbers = #tpu.dot_dimension_numbers<[1], [0], [0], [1], [0, 0, 1, 1], [], []>} : vector<8x16xbf16>, vector<16x64xbf16>, vector<8x64xf32> -> vector<8x64xf32>
    %c4_115 = arith.constant 4 : index
    %c0_116 = arith.constant 0 : index
    %c0_117 = arith.constant 0 : index
    %380 = vector.load %arg15[%c4_115, %c0_116, %c0_117] : memref<8x8x128xf32, #tpu.memory_space<vmem>>, vector<1x8x128xf32>
    %381 = vector.shape_cast %380 : vector<1x8x128xf32> to vector<8x128xf32>
    %382 = vector.extract_strided_slice %381 {offsets = [0, 0], sizes = [8, 64], strides = [1, 1]} : vector<8x128xf32> to vector<8x64xf32>
    %383 = arith.addf %382, %377 : vector<8x64xf32>
    %c3_118 = arith.constant 3 : index
    %c0_119 = arith.constant 0 : index
    %c0_120 = arith.constant 0 : index
    %384 = vector.load %arg15[%c3_118, %c0_119, %c0_120] : memref<8x8x128xf32, #tpu.memory_space<vmem>>, vector<1x8x128xf32>
    %385 = vector.shape_cast %384 : vector<1x8x128xf32> to vector<8x128xf32>
    %386 = vector.extract_strided_slice %385 {offsets = [0, 64], sizes = [8, 64], strides = [1, 1]} : vector<8x128xf32> to vector<8x64xf32>
    %387 = arith.addf %386, %379 : vector<8x64xf32>
    %c4_121 = arith.constant 4 : index
    %c0_122 = arith.constant 0 : index
    %c0_123 = arith.constant 0 : index
    %388 = vector.load %arg1[%c4_121, %c0_122, %c0_123] : memref<8x8x1xf32, #tpu.memory_space<vmem>>, vector<1x8x1xf32>
    %389 = vector.shape_cast %388 : vector<1x8x1xf32> to vector<8x1xf32>
    %390 = vector.shape_cast %389 : vector<8x1xf32> to vector<8x1xf32>
    %391 = vector.broadcast %390 : vector<8x1xf32> to vector<8x16xf32>
    %c3_124 = arith.constant 3 : index
    %c0_125 = arith.constant 0 : index
    %c0_126 = arith.constant 0 : index
    %392 = vector.load %arg1[%c3_124, %c0_125, %c0_126] : memref<8x8x1xf32, #tpu.memory_space<vmem>>, vector<1x8x1xf32>
    %393 = vector.shape_cast %392 : vector<1x8x1xf32> to vector<8x1xf32>
    %394 = vector.shape_cast %393 : vector<8x1xf32> to vector<8x1xf32>
    %395 = vector.broadcast %394 : vector<8x1xf32> to vector<8x16xf32>
    %396 = vector.extract_strided_slice %383 {offsets = [0, 0], sizes = [8, 16], strides = [1, 1]} : vector<8x64xf32> to vector<8x16xf32>
    %397 = arith.negf %396 : vector<8x16xf32>
    %398 = math.exp %397 : vector<8x16xf32>
    %cst_127 = arith.constant 1.000000e+00 : f32
    %399 = vector.broadcast %cst_127 : f32 to vector<8x16xf32>
    %400 = arith.addf %399, %398 : vector<8x16xf32>
    %401 = arith.divf %399, %400 : vector<8x16xf32>
    %402 = vector.extract_strided_slice %383 {offsets = [0, 16], sizes = [8, 16], strides = [1, 1]} : vector<8x64xf32> to vector<8x16xf32>
    %403 = arith.negf %402 : vector<8x16xf32>
    %404 = math.exp %403 : vector<8x16xf32>
    %cst_128 = arith.constant 1.000000e+00 : f32
    %405 = vector.broadcast %cst_128 : f32 to vector<8x16xf32>
    %406 = arith.addf %405, %404 : vector<8x16xf32>
    %407 = arith.divf %405, %406 : vector<8x16xf32>
    %408 = vector.extract_strided_slice %383 {offsets = [0, 32], sizes = [8, 16], strides = [1, 1]} : vector<8x64xf32> to vector<8x16xf32>
    %409 = math.tanh %408 : vector<8x16xf32>
    %410 = vector.extract_strided_slice %383 {offsets = [0, 48], sizes = [8, 16], strides = [1, 1]} : vector<8x64xf32> to vector<8x16xf32>
    %411 = arith.negf %410 : vector<8x16xf32>
    %412 = math.exp %411 : vector<8x16xf32>
    %cst_129 = arith.constant 1.000000e+00 : f32
    %413 = vector.broadcast %cst_129 : f32 to vector<8x16xf32>
    %414 = arith.addf %413, %412 : vector<8x16xf32>
    %415 = arith.divf %413, %414 : vector<8x16xf32>
    %416 = arith.mulf %407, %369 : vector<8x16xf32>
    %417 = arith.mulf %401, %409 : vector<8x16xf32>
    %418 = arith.addf %416, %417 : vector<8x16xf32>
    %419 = math.tanh %418 : vector<8x16xf32>
    %420 = arith.mulf %415, %419 : vector<8x16xf32>
    %421 = vector.extract_strided_slice %387 {offsets = [0, 0], sizes = [8, 16], strides = [1, 1]} : vector<8x64xf32> to vector<8x16xf32>
    %422 = arith.negf %421 : vector<8x16xf32>
    %423 = math.exp %422 : vector<8x16xf32>
    %cst_130 = arith.constant 1.000000e+00 : f32
    %424 = vector.broadcast %cst_130 : f32 to vector<8x16xf32>
    %425 = arith.addf %424, %423 : vector<8x16xf32>
    %426 = arith.divf %424, %425 : vector<8x16xf32>
    %427 = vector.extract_strided_slice %387 {offsets = [0, 16], sizes = [8, 16], strides = [1, 1]} : vector<8x64xf32> to vector<8x16xf32>
    %428 = arith.negf %427 : vector<8x16xf32>
    %429 = math.exp %428 : vector<8x16xf32>
    %cst_131 = arith.constant 1.000000e+00 : f32
    %430 = vector.broadcast %cst_131 : f32 to vector<8x16xf32>
    %431 = arith.addf %430, %429 : vector<8x16xf32>
    %432 = arith.divf %430, %431 : vector<8x16xf32>
    %433 = vector.extract_strided_slice %387 {offsets = [0, 32], sizes = [8, 16], strides = [1, 1]} : vector<8x64xf32> to vector<8x16xf32>
    %434 = math.tanh %433 : vector<8x16xf32>
    %435 = vector.extract_strided_slice %387 {offsets = [0, 48], sizes = [8, 16], strides = [1, 1]} : vector<8x64xf32> to vector<8x16xf32>
    %436 = arith.negf %435 : vector<8x16xf32>
    %437 = math.exp %436 : vector<8x16xf32>
    %cst_132 = arith.constant 1.000000e+00 : f32
    %438 = vector.broadcast %cst_132 : f32 to vector<8x16xf32>
    %439 = arith.addf %438, %437 : vector<8x16xf32>
    %440 = arith.divf %438, %439 : vector<8x16xf32>
    %441 = arith.mulf %432, %375 : vector<8x16xf32>
    %442 = arith.mulf %426, %434 : vector<8x16xf32>
    %443 = arith.addf %441, %442 : vector<8x16xf32>
    %444 = math.tanh %443 : vector<8x16xf32>
    %445 = arith.mulf %440, %444 : vector<8x16xf32>
    %446 = arith.mulf %420, %391 : vector<8x16xf32>
    %c4_133 = arith.constant 4 : index
    %c0_134 = arith.constant 0 : index
    %c0_135 = arith.constant 0 : index
    %447 = vector.load %arg13[%c4_133, %c0_134, %c0_135] : memref<8x8x32xf32, #tpu.memory_space<vmem>>, vector<1x8x16xf32>
    %448 = vector.shape_cast %447 : vector<1x8x16xf32> to vector<8x16xf32>
    %449 = vector.shape_cast %446 : vector<8x16xf32> to vector<1x8x16xf32>
    tpu.vector_store %arg13[%c4_133, %c0_134, %c0_135], %449 {strides = array<i32>} : memref<8x8x32xf32, #tpu.memory_space<vmem>>, vector<1x8x16xf32>,
    %450 = arith.mulf %445, %395 : vector<8x16xf32>
    %c3_136 = arith.constant 3 : index
    %c0_137 = arith.constant 0 : index
    %c16_138 = arith.constant 16 : index
    %451 = vector.load %arg13[%c3_136, %c0_137, %c16_138] : memref<8x8x32xf32, #tpu.memory_space<vmem>>, vector<1x8x16xf32>
    %452 = vector.shape_cast %451 : vector<1x8x16xf32> to vector<8x16xf32>
    %453 = vector.shape_cast %450 : vector<8x16xf32> to vector<1x8x16xf32>
    tpu.vector_store %arg13[%c3_136, %c0_137, %c16_138], %453 {strides = array<i32>} : memref<8x8x32xf32, #tpu.memory_space<vmem>>, vector<1x8x16xf32>,
    %454 = arith.subf %420, %366 : vector<8x16xf32>
    %455 = arith.mulf %391, %454 : vector<8x16xf32>
    %456 = arith.addf %366, %455 : vector<8x16xf32>
    %457 = arith.subf %418, %369 : vector<8x16xf32>
    %458 = arith.mulf %391, %457 : vector<8x16xf32>
    %459 = arith.addf %369, %458 : vector<8x16xf32>
    %460 = arith.subf %445, %372 : vector<8x16xf32>
    %461 = arith.mulf %395, %460 : vector<8x16xf32>
    %462 = arith.addf %372, %461 : vector<8x16xf32>
    %463 = arith.subf %443, %375 : vector<8x16xf32>
    %464 = arith.mulf %395, %463 : vector<8x16xf32>
    %465 = arith.addf %375, %464 : vector<8x16xf32>
    %466 = arith.truncf %456 : vector<8x16xf32> to vector<8x16xbf16>
    %cst_139 = arith.constant dense<0.000000e+00> : vector<8x64xf32>
    %467 = tpu.matmul %466, %10, %cst_139 {dimension_numbers = #tpu.dot_dimension_numbers<[1], [0], [0], [1], [0, 0, 1, 1], [], []>} : vector<8x16xbf16>, vector<16x64xbf16>, vector<8x64xf32> -> vector<8x64xf32>
    %468 = arith.truncf %462 : vector<8x16xf32> to vector<8x16xbf16>
    %cst_140 = arith.constant dense<0.000000e+00> : vector<8x64xf32>
    %469 = tpu.matmul %468, %11, %cst_140 {dimension_numbers = #tpu.dot_dimension_numbers<[1], [0], [0], [1], [0, 0, 1, 1], [], []>} : vector<8x16xbf16>, vector<16x64xbf16>, vector<8x64xf32> -> vector<8x64xf32>
    %c5_141 = arith.constant 5 : index
    %c0_142 = arith.constant 0 : index
    %c0_143 = arith.constant 0 : index
    %470 = vector.load %arg15[%c5_141, %c0_142, %c0_143] : memref<8x8x128xf32, #tpu.memory_space<vmem>>, vector<1x8x128xf32>
    %471 = vector.shape_cast %470 : vector<1x8x128xf32> to vector<8x128xf32>
    %472 = vector.extract_strided_slice %471 {offsets = [0, 0], sizes = [8, 64], strides = [1, 1]} : vector<8x128xf32> to vector<8x64xf32>
    %473 = arith.addf %472, %467 : vector<8x64xf32>
    %c2_144 = arith.constant 2 : index
    %c0_145 = arith.constant 0 : index
    %c0_146 = arith.constant 0 : index
    %474 = vector.load %arg15[%c2_144, %c0_145, %c0_146] : memref<8x8x128xf32, #tpu.memory_space<vmem>>, vector<1x8x128xf32>
    %475 = vector.shape_cast %474 : vector<1x8x128xf32> to vector<8x128xf32>
    %476 = vector.extract_strided_slice %475 {offsets = [0, 64], sizes = [8, 64], strides = [1, 1]} : vector<8x128xf32> to vector<8x64xf32>
    %477 = arith.addf %476, %469 : vector<8x64xf32>
    %c5_147 = arith.constant 5 : index
    %c0_148 = arith.constant 0 : index
    %c0_149 = arith.constant 0 : index
    %478 = vector.load %arg1[%c5_147, %c0_148, %c0_149] : memref<8x8x1xf32, #tpu.memory_space<vmem>>, vector<1x8x1xf32>
    %479 = vector.shape_cast %478 : vector<1x8x1xf32> to vector<8x1xf32>
    %480 = vector.shape_cast %479 : vector<8x1xf32> to vector<8x1xf32>
    %481 = vector.broadcast %480 : vector<8x1xf32> to vector<8x16xf32>
    %c2_150 = arith.constant 2 : index
    %c0_151 = arith.constant 0 : index
    %c0_152 = arith.constant 0 : index
    %482 = vector.load %arg1[%c2_150, %c0_151, %c0_152] : memref<8x8x1xf32, #tpu.memory_space<vmem>>, vector<1x8x1xf32>
    %483 = vector.shape_cast %482 : vector<1x8x1xf32> to vector<8x1xf32>
    %484 = vector.shape_cast %483 : vector<8x1xf32> to vector<8x1xf32>
    %485 = vector.broadcast %484 : vector<8x1xf32> to vector<8x16xf32>
    %486 = vector.extract_strided_slice %473 {offsets = [0, 0], sizes = [8, 16], strides = [1, 1]} : vector<8x64xf32> to vector<8x16xf32>
    %487 = arith.negf %486 : vector<8x16xf32>
    %488 = math.exp %487 : vector<8x16xf32>
    %cst_153 = arith.constant 1.000000e+00 : f32
    %489 = vector.broadcast %cst_153 : f32 to vector<8x16xf32>
    %490 = arith.addf %489, %488 : vector<8x16xf32>
    %491 = arith.divf %489, %490 : vector<8x16xf32>
    %492 = vector.extract_strided_slice %473 {offsets = [0, 16], sizes = [8, 16], strides = [1, 1]} : vector<8x64xf32> to vector<8x16xf32>
    %493 = arith.negf %492 : vector<8x16xf32>
    %494 = math.exp %493 : vector<8x16xf32>
    %cst_154 = arith.constant 1.000000e+00 : f32
    %495 = vector.broadcast %cst_154 : f32 to vector<8x16xf32>
    %496 = arith.addf %495, %494 : vector<8x16xf32>
    %497 = arith.divf %495, %496 : vector<8x16xf32>
    %498 = vector.extract_strided_slice %473 {offsets = [0, 32], sizes = [8, 16], strides = [1, 1]} : vector<8x64xf32> to vector<8x16xf32>
    %499 = math.tanh %498 : vector<8x16xf32>
    %500 = vector.extract_strided_slice %473 {offsets = [0, 48], sizes = [8, 16], strides = [1, 1]} : vector<8x64xf32> to vector<8x16xf32>
    %501 = arith.negf %500 : vector<8x16xf32>
    %502 = math.exp %501 : vector<8x16xf32>
    %cst_155 = arith.constant 1.000000e+00 : f32
    %503 = vector.broadcast %cst_155 : f32 to vector<8x16xf32>
    %504 = arith.addf %503, %502 : vector<8x16xf32>
    %505 = arith.divf %503, %504 : vector<8x16xf32>
    %506 = arith.mulf %497, %459 : vector<8x16xf32>
    %507 = arith.mulf %491, %499 : vector<8x16xf32>
    %508 = arith.addf %506, %507 : vector<8x16xf32>
    %509 = math.tanh %508 : vector<8x16xf32>
    %510 = arith.mulf %505, %509 : vector<8x16xf32>
    %511 = vector.extract_strided_slice %477 {offsets = [0, 0], sizes = [8, 16], strides = [1, 1]} : vector<8x64xf32> to vector<8x16xf32>
    %512 = arith.negf %511 : vector<8x16xf32>
    %513 = math.exp %512 : vector<8x16xf32>
    %cst_156 = arith.constant 1.000000e+00 : f32
    %514 = vector.broadcast %cst_156 : f32 to vector<8x16xf32>
    %515 = arith.addf %514, %513 : vector<8x16xf32>
    %516 = arith.divf %514, %515 : vector<8x16xf32>
    %517 = vector.extract_strided_slice %477 {offsets = [0, 16], sizes = [8, 16], strides = [1, 1]} : vector<8x64xf32> to vector<8x16xf32>
    %518 = arith.negf %517 : vector<8x16xf32>
    %519 = math.exp %518 : vector<8x16xf32>
    %cst_157 = arith.constant 1.000000e+00 : f32
    %520 = vector.broadcast %cst_157 : f32 to vector<8x16xf32>
    %521 = arith.addf %520, %519 : vector<8x16xf32>
    %522 = arith.divf %520, %521 : vector<8x16xf32>
    %523 = vector.extract_strided_slice %477 {offsets = [0, 32], sizes = [8, 16], strides = [1, 1]} : vector<8x64xf32> to vector<8x16xf32>
    %524 = math.tanh %523 : vector<8x16xf32>
    %525 = vector.extract_strided_slice %477 {offsets = [0, 48], sizes = [8, 16], strides = [1, 1]} : vector<8x64xf32> to vector<8x16xf32>
    %526 = arith.negf %525 : vector<8x16xf32>
    %527 = math.exp %526 : vector<8x16xf32>
    %cst_158 = arith.constant 1.000000e+00 : f32
    %528 = vector.broadcast %cst_158 : f32 to vector<8x16xf32>
    %529 = arith.addf %528, %527 : vector<8x16xf32>
    %530 = arith.divf %528, %529 : vector<8x16xf32>
    %531 = arith.mulf %522, %465 : vector<8x16xf32>
    %532 = arith.mulf %516, %524 : vector<8x16xf32>
    %533 = arith.addf %531, %532 : vector<8x16xf32>
    %534 = math.tanh %533 : vector<8x16xf32>
    %535 = arith.mulf %530, %534 : vector<8x16xf32>
    %536 = arith.mulf %510, %481 : vector<8x16xf32>
    %c5_159 = arith.constant 5 : index
    %c0_160 = arith.constant 0 : index
    %c0_161 = arith.constant 0 : index
    %537 = vector.load %arg13[%c5_159, %c0_160, %c0_161] : memref<8x8x32xf32, #tpu.memory_space<vmem>>, vector<1x8x16xf32>
    %538 = vector.shape_cast %537 : vector<1x8x16xf32> to vector<8x16xf32>
    %539 = vector.shape_cast %536 : vector<8x16xf32> to vector<1x8x16xf32>
    tpu.vector_store %arg13[%c5_159, %c0_160, %c0_161], %539 {strides = array<i32>} : memref<8x8x32xf32, #tpu.memory_space<vmem>>, vector<1x8x16xf32>,
    %540 = arith.mulf %535, %485 : vector<8x16xf32>
    %c2_162 = arith.constant 2 : index
    %c0_163 = arith.constant 0 : index
    %c16_164 = arith.constant 16 : index
    %541 = vector.load %arg13[%c2_162, %c0_163, %c16_164] : memref<8x8x32xf32, #tpu.memory_space<vmem>>, vector<1x8x16xf32>
    %542 = vector.shape_cast %541 : vector<1x8x16xf32> to vector<8x16xf32>
    %543 = vector.shape_cast %540 : vector<8x16xf32> to vector<1x8x16xf32>
    tpu.vector_store %arg13[%c2_162, %c0_163, %c16_164], %543 {strides = array<i32>} : memref<8x8x32xf32, #tpu.memory_space<vmem>>, vector<1x8x16xf32>,
    %544 = arith.subf %510, %456 : vector<8x16xf32>
    %545 = arith.mulf %481, %544 : vector<8x16xf32>
    %546 = arith.addf %456, %545 : vector<8x16xf32>
    %547 = arith.subf %508, %459 : vector<8x16xf32>
    %548 = arith.mulf %481, %547 : vector<8x16xf32>
    %549 = arith.addf %459, %548 : vector<8x16xf32>
    %550 = arith.subf %535, %462 : vector<8x16xf32>
    %551 = arith.mulf %485, %550 : vector<8x16xf32>
    %552 = arith.addf %462, %551 : vector<8x16xf32>
    %553 = arith.subf %533, %465 : vector<8x16xf32>
    %554 = arith.mulf %485, %553 : vector<8x16xf32>
    %555 = arith.addf %465, %554 : vector<8x16xf32>
    %556 = arith.truncf %546 : vector<8x16xf32> to vector<8x16xbf16>
    %cst_165 = arith.constant dense<0.000000e+00> : vector<8x64xf32>
    %557 = tpu.matmul %556, %10, %cst_165 {dimension_numbers = #tpu.dot_dimension_numbers<[1], [0], [0], [1], [0, 0, 1, 1], [], []>} : vector<8x16xbf16>, vector<16x64xbf16>, vector<8x64xf32> -> vector<8x64xf32>
    %558 = arith.truncf %552 : vector<8x16xf32> to vector<8x16xbf16>
    %cst_166 = arith.constant dense<0.000000e+00> : vector<8x64xf32>
    %559 = tpu.matmul %558, %11, %cst_166 {dimension_numbers = #tpu.dot_dimension_numbers<[1], [0], [0], [1], [0, 0, 1, 1], [], []>} : vector<8x16xbf16>, vector<16x64xbf16>, vector<8x64xf32> -> vector<8x64xf32>
    %c6_167 = arith.constant 6 : index
    %c0_168 = arith.constant 0 : index
    %c0_169 = arith.constant 0 : index
    %560 = vector.load %arg15[%c6_167, %c0_168, %c0_169] : memref<8x8x128xf32, #tpu.memory_space<vmem>>, vector<1x8x128xf32>
    %561 = vector.shape_cast %560 : vector<1x8x128xf32> to vector<8x128xf32>
    %562 = vector.extract_strided_slice %561 {offsets = [0, 0], sizes = [8, 64], strides = [1, 1]} : vector<8x128xf32> to vector<8x64xf32>
    %563 = arith.addf %562, %557 : vector<8x64xf32>
    %c1_170 = arith.constant 1 : index
    %c0_171 = arith.constant 0 : index
    %c0_172 = arith.constant 0 : index
    %564 = vector.load %arg15[%c1_170, %c0_171, %c0_172] : memref<8x8x128xf32, #tpu.memory_space<vmem>>, vector<1x8x128xf32>
    %565 = vector.shape_cast %564 : vector<1x8x128xf32> to vector<8x128xf32>
    %566 = vector.extract_strided_slice %565 {offsets = [0, 64], sizes = [8, 64], strides = [1, 1]} : vector<8x128xf32> to vector<8x64xf32>
    %567 = arith.addf %566, %559 : vector<8x64xf32>
    %c6_173 = arith.constant 6 : index
    %c0_174 = arith.constant 0 : index
    %c0_175 = arith.constant 0 : index
    %568 = vector.load %arg1[%c6_173, %c0_174, %c0_175] : memref<8x8x1xf32, #tpu.memory_space<vmem>>, vector<1x8x1xf32>
    %569 = vector.shape_cast %568 : vector<1x8x1xf32> to vector<8x1xf32>
    %570 = vector.shape_cast %569 : vector<8x1xf32> to vector<8x1xf32>
    %571 = vector.broadcast %570 : vector<8x1xf32> to vector<8x16xf32>
    %c1_176 = arith.constant 1 : index
    %c0_177 = arith.constant 0 : index
    %c0_178 = arith.constant 0 : index
    %572 = vector.load %arg1[%c1_176, %c0_177, %c0_178] : memref<8x8x1xf32, #tpu.memory_space<vmem>>, vector<1x8x1xf32>
    %573 = vector.shape_cast %572 : vector<1x8x1xf32> to vector<8x1xf32>
    %574 = vector.shape_cast %573 : vector<8x1xf32> to vector<8x1xf32>
    %575 = vector.broadcast %574 : vector<8x1xf32> to vector<8x16xf32>
    %576 = vector.extract_strided_slice %563 {offsets = [0, 0], sizes = [8, 16], strides = [1, 1]} : vector<8x64xf32> to vector<8x16xf32>
    %577 = arith.negf %576 : vector<8x16xf32>
    %578 = math.exp %577 : vector<8x16xf32>
    %cst_179 = arith.constant 1.000000e+00 : f32
    %579 = vector.broadcast %cst_179 : f32 to vector<8x16xf32>
    %580 = arith.addf %579, %578 : vector<8x16xf32>
    %581 = arith.divf %579, %580 : vector<8x16xf32>
    %582 = vector.extract_strided_slice %563 {offsets = [0, 16], sizes = [8, 16], strides = [1, 1]} : vector<8x64xf32> to vector<8x16xf32>
    %583 = arith.negf %582 : vector<8x16xf32>
    %584 = math.exp %583 : vector<8x16xf32>
    %cst_180 = arith.constant 1.000000e+00 : f32
    %585 = vector.broadcast %cst_180 : f32 to vector<8x16xf32>
    %586 = arith.addf %585, %584 : vector<8x16xf32>
    %587 = arith.divf %585, %586 : vector<8x16xf32>
    %588 = vector.extract_strided_slice %563 {offsets = [0, 32], sizes = [8, 16], strides = [1, 1]} : vector<8x64xf32> to vector<8x16xf32>
    %589 = math.tanh %588 : vector<8x16xf32>
    %590 = vector.extract_strided_slice %563 {offsets = [0, 48], sizes = [8, 16], strides = [1, 1]} : vector<8x64xf32> to vector<8x16xf32>
    %591 = arith.negf %590 : vector<8x16xf32>
    %592 = math.exp %591 : vector<8x16xf32>
    %cst_181 = arith.constant 1.000000e+00 : f32
    %593 = vector.broadcast %cst_181 : f32 to vector<8x16xf32>
    %594 = arith.addf %593, %592 : vector<8x16xf32>
    %595 = arith.divf %593, %594 : vector<8x16xf32>
    %596 = arith.mulf %587, %549 : vector<8x16xf32>
    %597 = arith.mulf %581, %589 : vector<8x16xf32>
    %598 = arith.addf %596, %597 : vector<8x16xf32>
    %599 = math.tanh %598 : vector<8x16xf32>
    %600 = arith.mulf %595, %599 : vector<8x16xf32>
    %601 = vector.extract_strided_slice %567 {offsets = [0, 0], sizes = [8, 16], strides = [1, 1]} : vector<8x64xf32> to vector<8x16xf32>
    %602 = arith.negf %601 : vector<8x16xf32>
    %603 = math.exp %602 : vector<8x16xf32>
    %cst_182 = arith.constant 1.000000e+00 : f32
    %604 = vector.broadcast %cst_182 : f32 to vector<8x16xf32>
    %605 = arith.addf %604, %603 : vector<8x16xf32>
    %606 = arith.divf %604, %605 : vector<8x16xf32>
    %607 = vector.extract_strided_slice %567 {offsets = [0, 16], sizes = [8, 16], strides = [1, 1]} : vector<8x64xf32> to vector<8x16xf32>
    %608 = arith.negf %607 : vector<8x16xf32>
    %609 = math.exp %608 : vector<8x16xf32>
    %cst_183 = arith.constant 1.000000e+00 : f32
    %610 = vector.broadcast %cst_183 : f32 to vector<8x16xf32>
    %611 = arith.addf %610, %609 : vector<8x16xf32>
    %612 = arith.divf %610, %611 : vector<8x16xf32>
    %613 = vector.extract_strided_slice %567 {offsets = [0, 32], sizes = [8, 16], strides = [1, 1]} : vector<8x64xf32> to vector<8x16xf32>
    %614 = math.tanh %613 : vector<8x16xf32>
    %615 = vector.extract_strided_slice %567 {offsets = [0, 48], sizes = [8, 16], strides = [1, 1]} : vector<8x64xf32> to vector<8x16xf32>
    %616 = arith.negf %615 : vector<8x16xf32>
    %617 = math.exp %616 : vector<8x16xf32>
    %cst_184 = arith.constant 1.000000e+00 : f32
    %618 = vector.broadcast %cst_184 : f32 to vector<8x16xf32>
    %619 = arith.addf %618, %617 : vector<8x16xf32>
    %620 = arith.divf %618, %619 : vector<8x16xf32>
    %621 = arith.mulf %612, %555 : vector<8x16xf32>
    %622 = arith.mulf %606, %614 : vector<8x16xf32>
    %623 = arith.addf %621, %622 : vector<8x16xf32>
    %624 = math.tanh %623 : vector<8x16xf32>
    %625 = arith.mulf %620, %624 : vector<8x16xf32>
    %626 = arith.mulf %600, %571 : vector<8x16xf32>
    %c6_185 = arith.constant 6 : index
    %c0_186 = arith.constant 0 : index
    %c0_187 = arith.constant 0 : index
    %627 = vector.load %arg13[%c6_185, %c0_186, %c0_187] : memref<8x8x32xf32, #tpu.memory_space<vmem>>, vector<1x8x16xf32>
    %628 = vector.shape_cast %627 : vector<1x8x16xf32> to vector<8x16xf32>
    %629 = vector.shape_cast %626 : vector<8x16xf32> to vector<1x8x16xf32>
    tpu.vector_store %arg13[%c6_185, %c0_186, %c0_187], %629 {strides = array<i32>} : memref<8x8x32xf32, #tpu.memory_space<vmem>>, vector<1x8x16xf32>,
    %630 = arith.mulf %625, %575 : vector<8x16xf32>
    %c1_188 = arith.constant 1 : index
    %c0_189 = arith.constant 0 : index
    %c16_190 = arith.constant 16 : index
    %631 = vector.load %arg13[%c1_188, %c0_189, %c16_190] : memref<8x8x32xf32, #tpu.memory_space<vmem>>, vector<1x8x16xf32>
    %632 = vector.shape_cast %631 : vector<1x8x16xf32> to vector<8x16xf32>
    %633 = vector.shape_cast %630 : vector<8x16xf32> to vector<1x8x16xf32>
    tpu.vector_store %arg13[%c1_188, %c0_189, %c16_190], %633 {strides = array<i32>} : memref<8x8x32xf32, #tpu.memory_space<vmem>>, vector<1x8x16xf32>,
    %634 = arith.subf %600, %546 : vector<8x16xf32>
    %635 = arith.mulf %571, %634 : vector<8x16xf32>
    %636 = arith.addf %546, %635 : vector<8x16xf32>
    %637 = arith.subf %598, %549 : vector<8x16xf32>
    %638 = arith.mulf %571, %637 : vector<8x16xf32>
    %639 = arith.addf %549, %638 : vector<8x16xf32>
    %640 = arith.subf %625, %552 : vector<8x16xf32>
    %641 = arith.mulf %575, %640 : vector<8x16xf32>
    %642 = arith.addf %552, %641 : vector<8x16xf32>
    %643 = arith.subf %623, %555 : vector<8x16xf32>
    %644 = arith.mulf %575, %643 : vector<8x16xf32>
    %645 = arith.addf %555, %644 : vector<8x16xf32>
    %646 = arith.truncf %636 : vector<8x16xf32> to vector<8x16xbf16>
    %cst_191 = arith.constant dense<0.000000e+00> : vector<8x64xf32>
    %647 = tpu.matmul %646, %10, %cst_191 {dimension_numbers = #tpu.dot_dimension_numbers<[1], [0], [0], [1], [0, 0, 1, 1], [], []>} : vector<8x16xbf16>, vector<16x64xbf16>, vector<8x64xf32> -> vector<8x64xf32>
    %648 = arith.truncf %642 : vector<8x16xf32> to vector<8x16xbf16>
    %cst_192 = arith.constant dense<0.000000e+00> : vector<8x64xf32>
    %649 = tpu.matmul %648, %11, %cst_192 {dimension_numbers = #tpu.dot_dimension_numbers<[1], [0], [0], [1], [0, 0, 1, 1], [], []>} : vector<8x16xbf16>, vector<16x64xbf16>, vector<8x64xf32> -> vector<8x64xf32>
    %c7_193 = arith.constant 7 : index
    %c0_194 = arith.constant 0 : index
    %c0_195 = arith.constant 0 : index
    %650 = vector.load %arg15[%c7_193, %c0_194, %c0_195] : memref<8x8x128xf32, #tpu.memory_space<vmem>>, vector<1x8x128xf32>
    %651 = vector.shape_cast %650 : vector<1x8x128xf32> to vector<8x128xf32>
    %652 = vector.extract_strided_slice %651 {offsets = [0, 0], sizes = [8, 64], strides = [1, 1]} : vector<8x128xf32> to vector<8x64xf32>
    %653 = arith.addf %652, %647 : vector<8x64xf32>
    %c0_196 = arith.constant 0 : index
    %c0_197 = arith.constant 0 : index
    %c0_198 = arith.constant 0 : index
    %654 = vector.load %arg15[%c0_196, %c0_197, %c0_198] : memref<8x8x128xf32, #tpu.memory_space<vmem>>, vector<1x8x128xf32>
    %655 = vector.shape_cast %654 : vector<1x8x128xf32> to vector<8x128xf32>
    %656 = vector.extract_strided_slice %655 {offsets = [0, 64], sizes = [8, 64], strides = [1, 1]} : vector<8x128xf32> to vector<8x64xf32>
    %657 = arith.addf %656, %649 : vector<8x64xf32>
    %c7_199 = arith.constant 7 : index
    %c0_200 = arith.constant 0 : index
    %c0_201 = arith.constant 0 : index
    %658 = vector.load %arg1[%c7_199, %c0_200, %c0_201] : memref<8x8x1xf32, #tpu.memory_space<vmem>>, vector<1x8x1xf32>
    %659 = vector.shape_cast %658 : vector<1x8x1xf32> to vector<8x1xf32>
    %660 = vector.shape_cast %659 : vector<8x1xf32> to vector<8x1xf32>
    %661 = vector.broadcast %660 : vector<8x1xf32> to vector<8x16xf32>
    %c0_202 = arith.constant 0 : index
    %c0_203 = arith.constant 0 : index
    %c0_204 = arith.constant 0 : index
    %662 = vector.load %arg1[%c0_202, %c0_203, %c0_204] : memref<8x8x1xf32, #tpu.memory_space<vmem>>, vector<1x8x1xf32>
    %663 = vector.shape_cast %662 : vector<1x8x1xf32> to vector<8x1xf32>
    %664 = vector.shape_cast %663 : vector<8x1xf32> to vector<8x1xf32>
    %665 = vector.broadcast %664 : vector<8x1xf32> to vector<8x16xf32>
    %666 = vector.extract_strided_slice %653 {offsets = [0, 0], sizes = [8, 16], strides = [1, 1]} : vector<8x64xf32> to vector<8x16xf32>
    %667 = arith.negf %666 : vector<8x16xf32>
    %668 = math.exp %667 : vector<8x16xf32>
    %cst_205 = arith.constant 1.000000e+00 : f32
    %669 = vector.broadcast %cst_205 : f32 to vector<8x16xf32>
    %670 = arith.addf %669, %668 : vector<8x16xf32>
    %671 = arith.divf %669, %670 : vector<8x16xf32>
    %672 = vector.extract_strided_slice %653 {offsets = [0, 16], sizes = [8, 16], strides = [1, 1]} : vector<8x64xf32> to vector<8x16xf32>
    %673 = arith.negf %672 : vector<8x16xf32>
    %674 = math.exp %673 : vector<8x16xf32>
    %cst_206 = arith.constant 1.000000e+00 : f32
    %675 = vector.broadcast %cst_206 : f32 to vector<8x16xf32>
    %676 = arith.addf %675, %674 : vector<8x16xf32>
    %677 = arith.divf %675, %676 : vector<8x16xf32>
    %678 = vector.extract_strided_slice %653 {offsets = [0, 32], sizes = [8, 16], strides = [1, 1]} : vector<8x64xf32> to vector<8x16xf32>
    %679 = math.tanh %678 : vector<8x16xf32>
    %680 = vector.extract_strided_slice %653 {offsets = [0, 48], sizes = [8, 16], strides = [1, 1]} : vector<8x64xf32> to vector<8x16xf32>
    %681 = arith.negf %680 : vector<8x16xf32>
    %682 = math.exp %681 : vector<8x16xf32>
    %cst_207 = arith.constant 1.000000e+00 : f32
    %683 = vector.broadcast %cst_207 : f32 to vector<8x16xf32>
    %684 = arith.addf %683, %682 : vector<8x16xf32>
    %685 = arith.divf %683, %684 : vector<8x16xf32>
    %686 = arith.mulf %677, %639 : vector<8x16xf32>
    %687 = arith.mulf %671, %679 : vector<8x16xf32>
    %688 = arith.addf %686, %687 : vector<8x16xf32>
    %689 = math.tanh %688 : vector<8x16xf32>
    %690 = arith.mulf %685, %689 : vector<8x16xf32>
    %691 = vector.extract_strided_slice %657 {offsets = [0, 0], sizes = [8, 16], strides = [1, 1]} : vector<8x64xf32> to vector<8x16xf32>
    %692 = arith.negf %691 : vector<8x16xf32>
    %693 = math.exp %692 : vector<8x16xf32>
    %cst_208 = arith.constant 1.000000e+00 : f32
    %694 = vector.broadcast %cst_208 : f32 to vector<8x16xf32>
    %695 = arith.addf %694, %693 : vector<8x16xf32>
    %696 = arith.divf %694, %695 : vector<8x16xf32>
    %697 = vector.extract_strided_slice %657 {offsets = [0, 16], sizes = [8, 16], strides = [1, 1]} : vector<8x64xf32> to vector<8x16xf32>
    %698 = arith.negf %697 : vector<8x16xf32>
    %699 = math.exp %698 : vector<8x16xf32>
    %cst_209 = arith.constant 1.000000e+00 : f32
    %700 = vector.broadcast %cst_209 : f32 to vector<8x16xf32>
    %701 = arith.addf %700, %699 : vector<8x16xf32>
    %702 = arith.divf %700, %701 : vector<8x16xf32>
    %703 = vector.extract_strided_slice %657 {offsets = [0, 32], sizes = [8, 16], strides = [1, 1]} : vector<8x64xf32> to vector<8x16xf32>
    %704 = math.tanh %703 : vector<8x16xf32>
    %705 = vector.extract_strided_slice %657 {offsets = [0, 48], sizes = [8, 16], strides = [1, 1]} : vector<8x64xf32> to vector<8x16xf32>
    %706 = arith.negf %705 : vector<8x16xf32>
    %707 = math.exp %706 : vector<8x16xf32>
    %cst_210 = arith.constant 1.000000e+00 : f32
    %708 = vector.broadcast %cst_210 : f32 to vector<8x16xf32>
    %709 = arith.addf %708, %707 : vector<8x16xf32>
    %710 = arith.divf %708, %709 : vector<8x16xf32>
    %711 = arith.mulf %702, %645 : vector<8x16xf32>
    %712 = arith.mulf %696, %704 : vector<8x16xf32>
    %713 = arith.addf %711, %712 : vector<8x16xf32>
    %714 = math.tanh %713 : vector<8x16xf32>
    %715 = arith.mulf %710, %714 : vector<8x16xf32>
    %716 = arith.mulf %690, %661 : vector<8x16xf32>
    %c7_211 = arith.constant 7 : index
    %c0_212 = arith.constant 0 : index
    %c0_213 = arith.constant 0 : index
    %717 = vector.load %arg13[%c7_211, %c0_212, %c0_213] : memref<8x8x32xf32, #tpu.memory_space<vmem>>, vector<1x8x16xf32>
    %718 = vector.shape_cast %717 : vector<1x8x16xf32> to vector<8x16xf32>
    %719 = vector.shape_cast %716 : vector<8x16xf32> to vector<1x8x16xf32>
    tpu.vector_store %arg13[%c7_211, %c0_212, %c0_213], %719 {strides = array<i32>} : memref<8x8x32xf32, #tpu.memory_space<vmem>>, vector<1x8x16xf32>,
    %720 = arith.mulf %715, %665 : vector<8x16xf32>
    %c0_214 = arith.constant 0 : index
    %c0_215 = arith.constant 0 : index
    %c16_216 = arith.constant 16 : index
    %721 = vector.load %arg13[%c0_214, %c0_215, %c16_216] : memref<8x8x32xf32, #tpu.memory_space<vmem>>, vector<1x8x16xf32>
    %722 = vector.shape_cast %721 : vector<1x8x16xf32> to vector<8x16xf32>
    %723 = vector.shape_cast %720 : vector<8x16xf32> to vector<1x8x16xf32>
    tpu.vector_store %arg13[%c0_214, %c0_215, %c16_216], %723 {strides = array<i32>} : memref<8x8x32xf32, #tpu.memory_space<vmem>>, vector<1x8x16xf32>,
    %c0_217 = arith.constant 0 : index
    %c0_218 = arith.constant 0 : index
    %c0_219 = arith.constant 0 : index
    %724 = vector.load %arg13[%c0_217, %c0_218, %c0_219] : memref<8x8x32xf32, #tpu.memory_space<vmem>>, vector<8x8x32xf32>
    %725 = vector.shape_cast %724 : vector<8x8x32xf32> to vector<64x32xf32>
    %726 = arith.truncf %725 : vector<64x32xf32> to vector<64x32xbf16>
    %c0_220 = arith.constant 0 : index
    %c0_221 = arith.constant 0 : index
    %727 = vector.load %arg6[%c0_220, %c0_221] : memref<32x128xbf16, #tpu.memory_space<vmem>>, vector<32x128xbf16>
    %cst_222 = arith.constant dense<0.000000e+00> : vector<64x128xf32>
    %728 = tpu.matmul %726, %727, %cst_222 {dimension_numbers = #tpu.dot_dimension_numbers<[1], [0], [0], [1], [0, 0, 1, 1], [], []>} : vector<64x32xbf16>, vector<32x128xbf16>, vector<64x128xf32> -> vector<64x128xf32>
    %c0_223 = arith.constant 0 : index
    %c0_224 = arith.constant 0 : index
    %729 = vector.load %arg9[%c0_223, %c0_224] : memref<1x128xf32, #tpu.memory_space<vmem>>, vector<1x128xf32>
    %730 = vector.broadcast %729 : vector<1x128xf32> to vector<64x128xf32>
    %731 = arith.addf %728, %730 : vector<64x128xf32>
    %732 = vector.shape_cast %731 : vector<64x128xf32> to vector<8x8x128xf32>
    %c0_225 = arith.constant 0 : index
    %c0_226 = arith.constant 0 : index
    %c0_227 = arith.constant 0 : index
    %733 = vector.load %arg15[%c0_225, %c0_226, %c0_227] : memref<8x8x128xf32, #tpu.memory_space<vmem>>, vector<8x8x128xf32>
    tpu.vector_store %arg15[%c0_225, %c0_226, %c0_227], %732 {strides = array<i32>} : memref<8x8x128xf32, #tpu.memory_space<vmem>>, vector<8x8x128xf32>,
    %c0_228 = arith.constant 0 : index
    %c0_229 = arith.constant 0 : index
    %734 = vector.load %arg7[%c0_228, %c0_229] : memref<16x64xbf16, #tpu.memory_space<vmem>>, vector<16x64xbf16>
    %c0_230 = arith.constant 0 : index
    %c0_231 = arith.constant 0 : index
    %735 = vector.load %arg8[%c0_230, %c0_231] : memref<16x64xbf16, #tpu.memory_space<vmem>>, vector<16x64xbf16>
    %cst_232 = arith.constant 0.000000e+00 : f32
    %736 = vector.broadcast %cst_232 : f32 to vector<8x16xf32>
    %cst_233 = arith.constant 0.000000e+00 : f32
    %737 = vector.broadcast %cst_233 : f32 to vector<8x16xf32>
    %cst_234 = arith.constant 0.000000e+00 : f32
    %738 = vector.broadcast %cst_234 : f32 to vector<8x16xf32>
    %cst_235 = arith.constant 0.000000e+00 : f32
    %739 = vector.broadcast %cst_235 : f32 to vector<8x16xf32>
    %740 = arith.truncf %736 : vector<8x16xf32> to vector<8x16xbf16>
    %cst_236 = arith.constant dense<0.000000e+00> : vector<8x64xf32>
    %741 = tpu.matmul %740, %734, %cst_236 {dimension_numbers = #tpu.dot_dimension_numbers<[1], [0], [0], [1], [0, 0, 1, 1], [], []>} : vector<8x16xbf16>, vector<16x64xbf16>, vector<8x64xf32> -> vector<8x64xf32>
    %742 = arith.truncf %738 : vector<8x16xf32> to vector<8x16xbf16>
    %cst_237 = arith.constant dense<0.000000e+00> : vector<8x64xf32>
    %743 = tpu.matmul %742, %735, %cst_237 {dimension_numbers = #tpu.dot_dimension_numbers<[1], [0], [0], [1], [0, 0, 1, 1], [], []>} : vector<8x16xbf16>, vector<16x64xbf16>, vector<8x64xf32> -> vector<8x64xf32>
    %c0_238 = arith.constant 0 : index
    %c0_239 = arith.constant 0 : index
    %c0_240 = arith.constant 0 : index
    %744 = vector.load %arg15[%c0_238, %c0_239, %c0_240] : memref<8x8x128xf32, #tpu.memory_space<vmem>>, vector<1x8x128xf32>
    %745 = vector.shape_cast %744 : vector<1x8x128xf32> to vector<8x128xf32>
    %746 = vector.extract_strided_slice %745 {offsets = [0, 0], sizes = [8, 64], strides = [1, 1]} : vector<8x128xf32> to vector<8x64xf32>
    %747 = arith.addf %746, %741 : vector<8x64xf32>
    %c7_241 = arith.constant 7 : index
    %c0_242 = arith.constant 0 : index
    %c0_243 = arith.constant 0 : index
    %748 = vector.load %arg15[%c7_241, %c0_242, %c0_243] : memref<8x8x128xf32, #tpu.memory_space<vmem>>, vector<1x8x128xf32>
    %749 = vector.shape_cast %748 : vector<1x8x128xf32> to vector<8x128xf32>
    %750 = vector.extract_strided_slice %749 {offsets = [0, 64], sizes = [8, 64], strides = [1, 1]} : vector<8x128xf32> to vector<8x64xf32>
    %751 = arith.addf %750, %743 : vector<8x64xf32>
    %c0_244 = arith.constant 0 : index
    %c0_245 = arith.constant 0 : index
    %c0_246 = arith.constant 0 : index
    %752 = vector.load %arg1[%c0_244, %c0_245, %c0_246] : memref<8x8x1xf32, #tpu.memory_space<vmem>>, vector<1x8x1xf32>
    %753 = vector.shape_cast %752 : vector<1x8x1xf32> to vector<8x1xf32>
    %754 = vector.shape_cast %753 : vector<8x1xf32> to vector<8x1xf32>
    %755 = vector.broadcast %754 : vector<8x1xf32> to vector<8x16xf32>
    %c7_247 = arith.constant 7 : index
    %c0_248 = arith.constant 0 : index
    %c0_249 = arith.constant 0 : index
    %756 = vector.load %arg1[%c7_247, %c0_248, %c0_249] : memref<8x8x1xf32, #tpu.memory_space<vmem>>, vector<1x8x1xf32>
    %757 = vector.shape_cast %756 : vector<1x8x1xf32> to vector<8x1xf32>
    %758 = vector.shape_cast %757 : vector<8x1xf32> to vector<8x1xf32>
    %759 = vector.broadcast %758 : vector<8x1xf32> to vector<8x16xf32>
    %760 = vector.extract_strided_slice %747 {offsets = [0, 0], sizes = [8, 16], strides = [1, 1]} : vector<8x64xf32> to vector<8x16xf32>
    %761 = arith.negf %760 : vector<8x16xf32>
    %762 = math.exp %761 : vector<8x16xf32>
    %cst_250 = arith.constant 1.000000e+00 : f32
    %763 = vector.broadcast %cst_250 : f32 to vector<8x16xf32>
    %764 = arith.addf %763, %762 : vector<8x16xf32>
    %765 = arith.divf %763, %764 : vector<8x16xf32>
    %766 = vector.extract_strided_slice %747 {offsets = [0, 16], sizes = [8, 16], strides = [1, 1]} : vector<8x64xf32> to vector<8x16xf32>
    %767 = arith.negf %766 : vector<8x16xf32>
    %768 = math.exp %767 : vector<8x16xf32>
    %cst_251 = arith.constant 1.000000e+00 : f32
    %769 = vector.broadcast %cst_251 : f32 to vector<8x16xf32>
    %770 = arith.addf %769, %768 : vector<8x16xf32>
    %771 = arith.divf %769, %770 : vector<8x16xf32>
    %772 = vector.extract_strided_slice %747 {offsets = [0, 32], sizes = [8, 16], strides = [1, 1]} : vector<8x64xf32> to vector<8x16xf32>
    %773 = math.tanh %772 : vector<8x16xf32>
    %774 = vector.extract_strided_slice %747 {offsets = [0, 48], sizes = [8, 16], strides = [1, 1]} : vector<8x64xf32> to vector<8x16xf32>
    %775 = arith.negf %774 : vector<8x16xf32>
    %776 = math.exp %775 : vector<8x16xf32>
    %cst_252 = arith.constant 1.000000e+00 : f32
    %777 = vector.broadcast %cst_252 : f32 to vector<8x16xf32>
    %778 = arith.addf %777, %776 : vector<8x16xf32>
    %779 = arith.divf %777, %778 : vector<8x16xf32>
    %780 = arith.mulf %771, %737 : vector<8x16xf32>
    %781 = arith.mulf %765, %773 : vector<8x16xf32>
    %782 = arith.addf %780, %781 : vector<8x16xf32>
    %783 = math.tanh %782 : vector<8x16xf32>
    %784 = arith.mulf %779, %783 : vector<8x16xf32>
    %785 = vector.extract_strided_slice %751 {offsets = [0, 0], sizes = [8, 16], strides = [1, 1]} : vector<8x64xf32> to vector<8x16xf32>
    %786 = arith.negf %785 : vector<8x16xf32>
    %787 = math.exp %786 : vector<8x16xf32>
    %cst_253 = arith.constant 1.000000e+00 : f32
    %788 = vector.broadcast %cst_253 : f32 to vector<8x16xf32>
    %789 = arith.addf %788, %787 : vector<8x16xf32>
    %790 = arith.divf %788, %789 : vector<8x16xf32>
    %791 = vector.extract_strided_slice %751 {offsets = [0, 16], sizes = [8, 16], strides = [1, 1]} : vector<8x64xf32> to vector<8x16xf32>
    %792 = arith.negf %791 : vector<8x16xf32>
    %793 = math.exp %792 : vector<8x16xf32>
    %cst_254 = arith.constant 1.000000e+00 : f32
    %794 = vector.broadcast %cst_254 : f32 to vector<8x16xf32>
    %795 = arith.addf %794, %793 : vector<8x16xf32>
    %796 = arith.divf %794, %795 : vector<8x16xf32>
    %797 = vector.extract_strided_slice %751 {offsets = [0, 32], sizes = [8, 16], strides = [1, 1]} : vector<8x64xf32> to vector<8x16xf32>
    %798 = math.tanh %797 : vector<8x16xf32>
    %799 = vector.extract_strided_slice %751 {offsets = [0, 48], sizes = [8, 16], strides = [1, 1]} : vector<8x64xf32> to vector<8x16xf32>
    %800 = arith.negf %799 : vector<8x16xf32>
    %801 = math.exp %800 : vector<8x16xf32>
    %cst_255 = arith.constant 1.000000e+00 : f32
    %802 = vector.broadcast %cst_255 : f32 to vector<8x16xf32>
    %803 = arith.addf %802, %801 : vector<8x16xf32>
    %804 = arith.divf %802, %803 : vector<8x16xf32>
    %805 = arith.mulf %796, %739 : vector<8x16xf32>
    %806 = arith.mulf %790, %798 : vector<8x16xf32>
    %807 = arith.addf %805, %806 : vector<8x16xf32>
    %808 = math.tanh %807 : vector<8x16xf32>
    %809 = arith.mulf %804, %808 : vector<8x16xf32>
    %810 = arith.mulf %784, %755 : vector<8x16xf32>
    %c0_256 = arith.constant 0 : index
    %c0_257 = arith.constant 0 : index
    %c0_258 = arith.constant 0 : index
    %811 = vector.load %arg14[%c0_256, %c0_257, %c0_258] : memref<8x8x32xf32, #tpu.memory_space<vmem>>, vector<1x8x16xf32>
    %812 = vector.shape_cast %811 : vector<1x8x16xf32> to vector<8x16xf32>
    %813 = vector.shape_cast %810 : vector<8x16xf32> to vector<1x8x16xf32>
    tpu.vector_store %arg14[%c0_256, %c0_257, %c0_258], %813 {strides = array<i32>} : memref<8x8x32xf32, #tpu.memory_space<vmem>>, vector<1x8x16xf32>,
    %814 = arith.mulf %809, %759 : vector<8x16xf32>
    %c7_259 = arith.constant 7 : index
    %c0_260 = arith.constant 0 : index
    %c16_261 = arith.constant 16 : index
    %815 = vector.load %arg14[%c7_259, %c0_260, %c16_261] : memref<8x8x32xf32, #tpu.memory_space<vmem>>, vector<1x8x16xf32>
    %816 = vector.shape_cast %815 : vector<1x8x16xf32> to vector<8x16xf32>
    %817 = vector.shape_cast %814 : vector<8x16xf32> to vector<1x8x16xf32>
    tpu.vector_store %arg14[%c7_259, %c0_260, %c16_261], %817 {strides = array<i32>} : memref<8x8x32xf32, #tpu.memory_space<vmem>>, vector<1x8x16xf32>,
    %818 = arith.subf %784, %736 : vector<8x16xf32>
    %819 = arith.mulf %755, %818 : vector<8x16xf32>
    %820 = arith.addf %736, %819 : vector<8x16xf32>
    %821 = arith.subf %782, %737 : vector<8x16xf32>
    %822 = arith.mulf %755, %821 : vector<8x16xf32>
    %823 = arith.addf %737, %822 : vector<8x16xf32>
    %824 = arith.subf %809, %738 : vector<8x16xf32>
    %825 = arith.mulf %759, %824 : vector<8x16xf32>
    %826 = arith.addf %738, %825 : vector<8x16xf32>
    %827 = arith.subf %807, %739 : vector<8x16xf32>
    %828 = arith.mulf %759, %827 : vector<8x16xf32>
    %829 = arith.addf %739, %828 : vector<8x16xf32>
    %830 = arith.truncf %820 : vector<8x16xf32> to vector<8x16xbf16>
    %cst_262 = arith.constant dense<0.000000e+00> : vector<8x64xf32>
    %831 = tpu.matmul %830, %734, %cst_262 {dimension_numbers = #tpu.dot_dimension_numbers<[1], [0], [0], [1], [0, 0, 1, 1], [], []>} : vector<8x16xbf16>, vector<16x64xbf16>, vector<8x64xf32> -> vector<8x64xf32>
    %832 = arith.truncf %826 : vector<8x16xf32> to vector<8x16xbf16>
    %cst_263 = arith.constant dense<0.000000e+00> : vector<8x64xf32>
    %833 = tpu.matmul %832, %735, %cst_263 {dimension_numbers = #tpu.dot_dimension_numbers<[1], [0], [0], [1], [0, 0, 1, 1], [], []>} : vector<8x16xbf16>, vector<16x64xbf16>, vector<8x64xf32> -> vector<8x64xf32>
    %c1_264 = arith.constant 1 : index
    %c0_265 = arith.constant 0 : index
    %c0_266 = arith.constant 0 : index
    %834 = vector.load %arg15[%c1_264, %c0_265, %c0_266] : memref<8x8x128xf32, #tpu.memory_space<vmem>>, vector<1x8x128xf32>
    %835 = vector.shape_cast %834 : vector<1x8x128xf32> to vector<8x128xf32>
    %836 = vector.extract_strided_slice %835 {offsets = [0, 0], sizes = [8, 64], strides = [1, 1]} : vector<8x128xf32> to vector<8x64xf32>
    %837 = arith.addf %836, %831 : vector<8x64xf32>
    %c6_267 = arith.constant 6 : index
    %c0_268 = arith.constant 0 : index
    %c0_269 = arith.constant 0 : index
    %838 = vector.load %arg15[%c6_267, %c0_268, %c0_269] : memref<8x8x128xf32, #tpu.memory_space<vmem>>, vector<1x8x128xf32>
    %839 = vector.shape_cast %838 : vector<1x8x128xf32> to vector<8x128xf32>
    %840 = vector.extract_strided_slice %839 {offsets = [0, 64], sizes = [8, 64], strides = [1, 1]} : vector<8x128xf32> to vector<8x64xf32>
    %841 = arith.addf %840, %833 : vector<8x64xf32>
    %c1_270 = arith.constant 1 : index
    %c0_271 = arith.constant 0 : index
    %c0_272 = arith.constant 0 : index
    %842 = vector.load %arg1[%c1_270, %c0_271, %c0_272] : memref<8x8x1xf32, #tpu.memory_space<vmem>>, vector<1x8x1xf32>
    %843 = vector.shape_cast %842 : vector<1x8x1xf32> to vector<8x1xf32>
    %844 = vector.shape_cast %843 : vector<8x1xf32> to vector<8x1xf32>
    %845 = vector.broadcast %844 : vector<8x1xf32> to vector<8x16xf32>
    %c6_273 = arith.constant 6 : index
    %c0_274 = arith.constant 0 : index
    %c0_275 = arith.constant 0 : index
    %846 = vector.load %arg1[%c6_273, %c0_274, %c0_275] : memref<8x8x1xf32, #tpu.memory_space<vmem>>, vector<1x8x1xf32>
    %847 = vector.shape_cast %846 : vector<1x8x1xf32> to vector<8x1xf32>
    %848 = vector.shape_cast %847 : vector<8x1xf32> to vector<8x1xf32>
    %849 = vector.broadcast %848 : vector<8x1xf32> to vector<8x16xf32>
    %850 = vector.extract_strided_slice %837 {offsets = [0, 0], sizes = [8, 16], strides = [1, 1]} : vector<8x64xf32> to vector<8x16xf32>
    %851 = arith.negf %850 : vector<8x16xf32>
    %852 = math.exp %851 : vector<8x16xf32>
    %cst_276 = arith.constant 1.000000e+00 : f32
    %853 = vector.broadcast %cst_276 : f32 to vector<8x16xf32>
    %854 = arith.addf %853, %852 : vector<8x16xf32>
    %855 = arith.divf %853, %854 : vector<8x16xf32>
    %856 = vector.extract_strided_slice %837 {offsets = [0, 16], sizes = [8, 16], strides = [1, 1]} : vector<8x64xf32> to vector<8x16xf32>
    %857 = arith.negf %856 : vector<8x16xf32>
    %858 = math.exp %857 : vector<8x16xf32>
    %cst_277 = arith.constant 1.000000e+00 : f32
    %859 = vector.broadcast %cst_277 : f32 to vector<8x16xf32>
    %860 = arith.addf %859, %858 : vector<8x16xf32>
    %861 = arith.divf %859, %860 : vector<8x16xf32>
    %862 = vector.extract_strided_slice %837 {offsets = [0, 32], sizes = [8, 16], strides = [1, 1]} : vector<8x64xf32> to vector<8x16xf32>
    %863 = math.tanh %862 : vector<8x16xf32>
    %864 = vector.extract_strided_slice %837 {offsets = [0, 48], sizes = [8, 16], strides = [1, 1]} : vector<8x64xf32> to vector<8x16xf32>
    %865 = arith.negf %864 : vector<8x16xf32>
    %866 = math.exp %865 : vector<8x16xf32>
    %cst_278 = arith.constant 1.000000e+00 : f32
    %867 = vector.broadcast %cst_278 : f32 to vector<8x16xf32>
    %868 = arith.addf %867, %866 : vector<8x16xf32>
    %869 = arith.divf %867, %868 : vector<8x16xf32>
    %870 = arith.mulf %861, %823 : vector<8x16xf32>
    %871 = arith.mulf %855, %863 : vector<8x16xf32>
    %872 = arith.addf %870, %871 : vector<8x16xf32>
    %873 = math.tanh %872 : vector<8x16xf32>
    %874 = arith.mulf %869, %873 : vector<8x16xf32>
    %875 = vector.extract_strided_slice %841 {offsets = [0, 0], sizes = [8, 16], strides = [1, 1]} : vector<8x64xf32> to vector<8x16xf32>
    %876 = arith.negf %875 : vector<8x16xf32>
    %877 = math.exp %876 : vector<8x16xf32>
    %cst_279 = arith.constant 1.000000e+00 : f32
    %878 = vector.broadcast %cst_279 : f32 to vector<8x16xf32>
    %879 = arith.addf %878, %877 : vector<8x16xf32>
    %880 = arith.divf %878, %879 : vector<8x16xf32>
    %881 = vector.extract_strided_slice %841 {offsets = [0, 16], sizes = [8, 16], strides = [1, 1]} : vector<8x64xf32> to vector<8x16xf32>
    %882 = arith.negf %881 : vector<8x16xf32>
    %883 = math.exp %882 : vector<8x16xf32>
    %cst_280 = arith.constant 1.000000e+00 : f32
    %884 = vector.broadcast %cst_280 : f32 to vector<8x16xf32>
    %885 = arith.addf %884, %883 : vector<8x16xf32>
    %886 = arith.divf %884, %885 : vector<8x16xf32>
    %887 = vector.extract_strided_slice %841 {offsets = [0, 32], sizes = [8, 16], strides = [1, 1]} : vector<8x64xf32> to vector<8x16xf32>
    %888 = math.tanh %887 : vector<8x16xf32>
    %889 = vector.extract_strided_slice %841 {offsets = [0, 48], sizes = [8, 16], strides = [1, 1]} : vector<8x64xf32> to vector<8x16xf32>
    %890 = arith.negf %889 : vector<8x16xf32>
    %891 = math.exp %890 : vector<8x16xf32>
    %cst_281 = arith.constant 1.000000e+00 : f32
    %892 = vector.broadcast %cst_281 : f32 to vector<8x16xf32>
    %893 = arith.addf %892, %891 : vector<8x16xf32>
    %894 = arith.divf %892, %893 : vector<8x16xf32>
    %895 = arith.mulf %886, %829 : vector<8x16xf32>
    %896 = arith.mulf %880, %888 : vector<8x16xf32>
    %897 = arith.addf %895, %896 : vector<8x16xf32>
    %898 = math.tanh %897 : vector<8x16xf32>
    %899 = arith.mulf %894, %898 : vector<8x16xf32>
    %900 = arith.mulf %874, %845 : vector<8x16xf32>
    %c1_282 = arith.constant 1 : index
    %c0_283 = arith.constant 0 : index
    %c0_284 = arith.constant 0 : index
    %901 = vector.load %arg14[%c1_282, %c0_283, %c0_284] : memref<8x8x32xf32, #tpu.memory_space<vmem>>, vector<1x8x16xf32>
    %902 = vector.shape_cast %901 : vector<1x8x16xf32> to vector<8x16xf32>
    %903 = vector.shape_cast %900 : vector<8x16xf32> to vector<1x8x16xf32>
    tpu.vector_store %arg14[%c1_282, %c0_283, %c0_284], %903 {strides = array<i32>} : memref<8x8x32xf32, #tpu.memory_space<vmem>>, vector<1x8x16xf32>,
    %904 = arith.mulf %899, %849 : vector<8x16xf32>
    %c6_285 = arith.constant 6 : index
    %c0_286 = arith.constant 0 : index
    %c16_287 = arith.constant 16 : index
    %905 = vector.load %arg14[%c6_285, %c0_286, %c16_287] : memref<8x8x32xf32, #tpu.memory_space<vmem>>, vector<1x8x16xf32>
    %906 = vector.shape_cast %905 : vector<1x8x16xf32> to vector<8x16xf32>
    %907 = vector.shape_cast %904 : vector<8x16xf32> to vector<1x8x16xf32>
    tpu.vector_store %arg14[%c6_285, %c0_286, %c16_287], %907 {strides = array<i32>} : memref<8x8x32xf32, #tpu.memory_space<vmem>>, vector<1x8x16xf32>,
    %908 = arith.subf %874, %820 : vector<8x16xf32>
    %909 = arith.mulf %845, %908 : vector<8x16xf32>
    %910 = arith.addf %820, %909 : vector<8x16xf32>
    %911 = arith.subf %872, %823 : vector<8x16xf32>
    %912 = arith.mulf %845, %911 : vector<8x16xf32>
    %913 = arith.addf %823, %912 : vector<8x16xf32>
    %914 = arith.subf %899, %826 : vector<8x16xf32>
    %915 = arith.mulf %849, %914 : vector<8x16xf32>
    %916 = arith.addf %826, %915 : vector<8x16xf32>
    %917 = arith.subf %897, %829 : vector<8x16xf32>
    %918 = arith.mulf %849, %917 : vector<8x16xf32>
    %919 = arith.addf %829, %918 : vector<8x16xf32>
    %920 = arith.truncf %910 : vector<8x16xf32> to vector<8x16xbf16>
    %cst_288 = arith.constant dense<0.000000e+00> : vector<8x64xf32>
    %921 = tpu.matmul %920, %734, %cst_288 {dimension_numbers = #tpu.dot_dimension_numbers<[1], [0], [0], [1], [0, 0, 1, 1], [], []>} : vector<8x16xbf16>, vector<16x64xbf16>, vector<8x64xf32> -> vector<8x64xf32>
    %922 = arith.truncf %916 : vector<8x16xf32> to vector<8x16xbf16>
    %cst_289 = arith.constant dense<0.000000e+00> : vector<8x64xf32>
    %923 = tpu.matmul %922, %735, %cst_289 {dimension_numbers = #tpu.dot_dimension_numbers<[1], [0], [0], [1], [0, 0, 1, 1], [], []>} : vector<8x16xbf16>, vector<16x64xbf16>, vector<8x64xf32> -> vector<8x64xf32>
    %c2_290 = arith.constant 2 : index
    %c0_291 = arith.constant 0 : index
    %c0_292 = arith.constant 0 : index
    %924 = vector.load %arg15[%c2_290, %c0_291, %c0_292] : memref<8x8x128xf32, #tpu.memory_space<vmem>>, vector<1x8x128xf32>
    %925 = vector.shape_cast %924 : vector<1x8x128xf32> to vector<8x128xf32>
    %926 = vector.extract_strided_slice %925 {offsets = [0, 0], sizes = [8, 64], strides = [1, 1]} : vector<8x128xf32> to vector<8x64xf32>
    %927 = arith.addf %926, %921 : vector<8x64xf32>
    %c5_293 = arith.constant 5 : index
    %c0_294 = arith.constant 0 : index
    %c0_295 = arith.constant 0 : index
    %928 = vector.load %arg15[%c5_293, %c0_294, %c0_295] : memref<8x8x128xf32, #tpu.memory_space<vmem>>, vector<1x8x128xf32>
    %929 = vector.shape_cast %928 : vector<1x8x128xf32> to vector<8x128xf32>
    %930 = vector.extract_strided_slice %929 {offsets = [0, 64], sizes = [8, 64], strides = [1, 1]} : vector<8x128xf32> to vector<8x64xf32>
    %931 = arith.addf %930, %923 : vector<8x64xf32>
    %c2_296 = arith.constant 2 : index
    %c0_297 = arith.constant 0 : index
    %c0_298 = arith.constant 0 : index
    %932 = vector.load %arg1[%c2_296, %c0_297, %c0_298] : memref<8x8x1xf32, #tpu.memory_space<vmem>>, vector<1x8x1xf32>
    %933 = vector.shape_cast %932 : vector<1x8x1xf32> to vector<8x1xf32>
    %934 = vector.shape_cast %933 : vector<8x1xf32> to vector<8x1xf32>
    %935 = vector.broadcast %934 : vector<8x1xf32> to vector<8x16xf32>
    %c5_299 = arith.constant 5 : index
    %c0_300 = arith.constant 0 : index
    %c0_301 = arith.constant 0 : index
    %936 = vector.load %arg1[%c5_299, %c0_300, %c0_301] : memref<8x8x1xf32, #tpu.memory_space<vmem>>, vector<1x8x1xf32>
    %937 = vector.shape_cast %936 : vector<1x8x1xf32> to vector<8x1xf32>
    %938 = vector.shape_cast %937 : vector<8x1xf32> to vector<8x1xf32>
    %939 = vector.broadcast %938 : vector<8x1xf32> to vector<8x16xf32>
    %940 = vector.extract_strided_slice %927 {offsets = [0, 0], sizes = [8, 16], strides = [1, 1]} : vector<8x64xf32> to vector<8x16xf32>
    %941 = arith.negf %940 : vector<8x16xf32>
    %942 = math.exp %941 : vector<8x16xf32>
    %cst_302 = arith.constant 1.000000e+00 : f32
    %943 = vector.broadcast %cst_302 : f32 to vector<8x16xf32>
    %944 = arith.addf %943, %942 : vector<8x16xf32>
    %945 = arith.divf %943, %944 : vector<8x16xf32>
    %946 = vector.extract_strided_slice %927 {offsets = [0, 16], sizes = [8, 16], strides = [1, 1]} : vector<8x64xf32> to vector<8x16xf32>
    %947 = arith.negf %946 : vector<8x16xf32>
    %948 = math.exp %947 : vector<8x16xf32>
    %cst_303 = arith.constant 1.000000e+00 : f32
    %949 = vector.broadcast %cst_303 : f32 to vector<8x16xf32>
    %950 = arith.addf %949, %948 : vector<8x16xf32>
    %951 = arith.divf %949, %950 : vector<8x16xf32>
    %952 = vector.extract_strided_slice %927 {offsets = [0, 32], sizes = [8, 16], strides = [1, 1]} : vector<8x64xf32> to vector<8x16xf32>
    %953 = math.tanh %952 : vector<8x16xf32>
    %954 = vector.extract_strided_slice %927 {offsets = [0, 48], sizes = [8, 16], strides = [1, 1]} : vector<8x64xf32> to vector<8x16xf32>
    %955 = arith.negf %954 : vector<8x16xf32>
    %956 = math.exp %955 : vector<8x16xf32>
    %cst_304 = arith.constant 1.000000e+00 : f32
    %957 = vector.broadcast %cst_304 : f32 to vector<8x16xf32>
    %958 = arith.addf %957, %956 : vector<8x16xf32>
    %959 = arith.divf %957, %958 : vector<8x16xf32>
    %960 = arith.mulf %951, %913 : vector<8x16xf32>
    %961 = arith.mulf %945, %953 : vector<8x16xf32>
    %962 = arith.addf %960, %961 : vector<8x16xf32>
    %963 = math.tanh %962 : vector<8x16xf32>
    %964 = arith.mulf %959, %963 : vector<8x16xf32>
    %965 = vector.extract_strided_slice %931 {offsets = [0, 0], sizes = [8, 16], strides = [1, 1]} : vector<8x64xf32> to vector<8x16xf32>
    %966 = arith.negf %965 : vector<8x16xf32>
    %967 = math.exp %966 : vector<8x16xf32>
    %cst_305 = arith.constant 1.000000e+00 : f32
    %968 = vector.broadcast %cst_305 : f32 to vector<8x16xf32>
    %969 = arith.addf %968, %967 : vector<8x16xf32>
    %970 = arith.divf %968, %969 : vector<8x16xf32>
    %971 = vector.extract_strided_slice %931 {offsets = [0, 16], sizes = [8, 16], strides = [1, 1]} : vector<8x64xf32> to vector<8x16xf32>
    %972 = arith.negf %971 : vector<8x16xf32>
    %973 = math.exp %972 : vector<8x16xf32>
    %cst_306 = arith.constant 1.000000e+00 : f32
    %974 = vector.broadcast %cst_306 : f32 to vector<8x16xf32>
    %975 = arith.addf %974, %973 : vector<8x16xf32>
    %976 = arith.divf %974, %975 : vector<8x16xf32>
    %977 = vector.extract_strided_slice %931 {offsets = [0, 32], sizes = [8, 16], strides = [1, 1]} : vector<8x64xf32> to vector<8x16xf32>
    %978 = math.tanh %977 : vector<8x16xf32>
    %979 = vector.extract_strided_slice %931 {offsets = [0, 48], sizes = [8, 16], strides = [1, 1]} : vector<8x64xf32> to vector<8x16xf32>
    %980 = arith.negf %979 : vector<8x16xf32>
    %981 = math.exp %980 : vector<8x16xf32>
    %cst_307 = arith.constant 1.000000e+00 : f32
    %982 = vector.broadcast %cst_307 : f32 to vector<8x16xf32>
    %983 = arith.addf %982, %981 : vector<8x16xf32>
    %984 = arith.divf %982, %983 : vector<8x16xf32>
    %985 = arith.mulf %976, %919 : vector<8x16xf32>
    %986 = arith.mulf %970, %978 : vector<8x16xf32>
    %987 = arith.addf %985, %986 : vector<8x16xf32>
    %988 = math.tanh %987 : vector<8x16xf32>
    %989 = arith.mulf %984, %988 : vector<8x16xf32>
    %990 = arith.mulf %964, %935 : vector<8x16xf32>
    %c2_308 = arith.constant 2 : index
    %c0_309 = arith.constant 0 : index
    %c0_310 = arith.constant 0 : index
    %991 = vector.load %arg14[%c2_308, %c0_309, %c0_310] : memref<8x8x32xf32, #tpu.memory_space<vmem>>, vector<1x8x16xf32>
    %992 = vector.shape_cast %991 : vector<1x8x16xf32> to vector<8x16xf32>
    %993 = vector.shape_cast %990 : vector<8x16xf32> to vector<1x8x16xf32>
    tpu.vector_store %arg14[%c2_308, %c0_309, %c0_310], %993 {strides = array<i32>} : memref<8x8x32xf32, #tpu.memory_space<vmem>>, vector<1x8x16xf32>,
    %994 = arith.mulf %989, %939 : vector<8x16xf32>
    %c5_311 = arith.constant 5 : index
    %c0_312 = arith.constant 0 : index
    %c16_313 = arith.constant 16 : index
    %995 = vector.load %arg14[%c5_311, %c0_312, %c16_313] : memref<8x8x32xf32, #tpu.memory_space<vmem>>, vector<1x8x16xf32>
    %996 = vector.shape_cast %995 : vector<1x8x16xf32> to vector<8x16xf32>
    %997 = vector.shape_cast %994 : vector<8x16xf32> to vector<1x8x16xf32>
    tpu.vector_store %arg14[%c5_311, %c0_312, %c16_313], %997 {strides = array<i32>} : memref<8x8x32xf32, #tpu.memory_space<vmem>>, vector<1x8x16xf32>,
    %998 = arith.subf %964, %910 : vector<8x16xf32>
    %999 = arith.mulf %935, %998 : vector<8x16xf32>
    %1000 = arith.addf %910, %999 : vector<8x16xf32>
    %1001 = arith.subf %962, %913 : vector<8x16xf32>
    %1002 = arith.mulf %935, %1001 : vector<8x16xf32>
    %1003 = arith.addf %913, %1002 : vector<8x16xf32>
    %1004 = arith.subf %989, %916 : vector<8x16xf32>
    %1005 = arith.mulf %939, %1004 : vector<8x16xf32>
    %1006 = arith.addf %916, %1005 : vector<8x16xf32>
    %1007 = arith.subf %987, %919 : vector<8x16xf32>
    %1008 = arith.mulf %939, %1007 : vector<8x16xf32>
    %1009 = arith.addf %919, %1008 : vector<8x16xf32>
    %1010 = arith.truncf %1000 : vector<8x16xf32> to vector<8x16xbf16>
    %cst_314 = arith.constant dense<0.000000e+00> : vector<8x64xf32>
    %1011 = tpu.matmul %1010, %734, %cst_314 {dimension_numbers = #tpu.dot_dimension_numbers<[1], [0], [0], [1], [0, 0, 1, 1], [], []>} : vector<8x16xbf16>, vector<16x64xbf16>, vector<8x64xf32> -> vector<8x64xf32>
    %1012 = arith.truncf %1006 : vector<8x16xf32> to vector<8x16xbf16>
    %cst_315 = arith.constant dense<0.000000e+00> : vector<8x64xf32>
    %1013 = tpu.matmul %1012, %735, %cst_315 {dimension_numbers = #tpu.dot_dimension_numbers<[1], [0], [0], [1], [0, 0, 1, 1], [], []>} : vector<8x16xbf16>, vector<16x64xbf16>, vector<8x64xf32> -> vector<8x64xf32>
    %c3_316 = arith.constant 3 : index
    %c0_317 = arith.constant 0 : index
    %c0_318 = arith.constant 0 : index
    %1014 = vector.load %arg15[%c3_316, %c0_317, %c0_318] : memref<8x8x128xf32, #tpu.memory_space<vmem>>, vector<1x8x128xf32>
    %1015 = vector.shape_cast %1014 : vector<1x8x128xf32> to vector<8x128xf32>
    %1016 = vector.extract_strided_slice %1015 {offsets = [0, 0], sizes = [8, 64], strides = [1, 1]} : vector<8x128xf32> to vector<8x64xf32>
    %1017 = arith.addf %1016, %1011 : vector<8x64xf32>
    %c4_319 = arith.constant 4 : index
    %c0_320 = arith.constant 0 : index
    %c0_321 = arith.constant 0 : index
    %1018 = vector.load %arg15[%c4_319, %c0_320, %c0_321] : memref<8x8x128xf32, #tpu.memory_space<vmem>>, vector<1x8x128xf32>
    %1019 = vector.shape_cast %1018 : vector<1x8x128xf32> to vector<8x128xf32>
    %1020 = vector.extract_strided_slice %1019 {offsets = [0, 64], sizes = [8, 64], strides = [1, 1]} : vector<8x128xf32> to vector<8x64xf32>
    %1021 = arith.addf %1020, %1013 : vector<8x64xf32>
    %c3_322 = arith.constant 3 : index
    %c0_323 = arith.constant 0 : index
    %c0_324 = arith.constant 0 : index
    %1022 = vector.load %arg1[%c3_322, %c0_323, %c0_324] : memref<8x8x1xf32, #tpu.memory_space<vmem>>, vector<1x8x1xf32>
    %1023 = vector.shape_cast %1022 : vector<1x8x1xf32> to vector<8x1xf32>
    %1024 = vector.shape_cast %1023 : vector<8x1xf32> to vector<8x1xf32>
    %1025 = vector.broadcast %1024 : vector<8x1xf32> to vector<8x16xf32>
    %c4_325 = arith.constant 4 : index
    %c0_326 = arith.constant 0 : index
    %c0_327 = arith.constant 0 : index
    %1026 = vector.load %arg1[%c4_325, %c0_326, %c0_327] : memref<8x8x1xf32, #tpu.memory_space<vmem>>, vector<1x8x1xf32>
    %1027 = vector.shape_cast %1026 : vector<1x8x1xf32> to vector<8x1xf32>
    %1028 = vector.shape_cast %1027 : vector<8x1xf32> to vector<8x1xf32>
    %1029 = vector.broadcast %1028 : vector<8x1xf32> to vector<8x16xf32>
    %1030 = vector.extract_strided_slice %1017 {offsets = [0, 0], sizes = [8, 16], strides = [1, 1]} : vector<8x64xf32> to vector<8x16xf32>
    %1031 = arith.negf %1030 : vector<8x16xf32>
    %1032 = math.exp %1031 : vector<8x16xf32>
    %cst_328 = arith.constant 1.000000e+00 : f32
    %1033 = vector.broadcast %cst_328 : f32 to vector<8x16xf32>
    %1034 = arith.addf %1033, %1032 : vector<8x16xf32>
    %1035 = arith.divf %1033, %1034 : vector<8x16xf32>
    %1036 = vector.extract_strided_slice %1017 {offsets = [0, 16], sizes = [8, 16], strides = [1, 1]} : vector<8x64xf32> to vector<8x16xf32>
    %1037 = arith.negf %1036 : vector<8x16xf32>
    %1038 = math.exp %1037 : vector<8x16xf32>
    %cst_329 = arith.constant 1.000000e+00 : f32
    %1039 = vector.broadcast %cst_329 : f32 to vector<8x16xf32>
    %1040 = arith.addf %1039, %1038 : vector<8x16xf32>
    %1041 = arith.divf %1039, %1040 : vector<8x16xf32>
    %1042 = vector.extract_strided_slice %1017 {offsets = [0, 32], sizes = [8, 16], strides = [1, 1]} : vector<8x64xf32> to vector<8x16xf32>
    %1043 = math.tanh %1042 : vector<8x16xf32>
    %1044 = vector.extract_strided_slice %1017 {offsets = [0, 48], sizes = [8, 16], strides = [1, 1]} : vector<8x64xf32> to vector<8x16xf32>
    %1045 = arith.negf %1044 : vector<8x16xf32>
    %1046 = math.exp %1045 : vector<8x16xf32>
    %cst_330 = arith.constant 1.000000e+00 : f32
    %1047 = vector.broadcast %cst_330 : f32 to vector<8x16xf32>
    %1048 = arith.addf %1047, %1046 : vector<8x16xf32>
    %1049 = arith.divf %1047, %1048 : vector<8x16xf32>
    %1050 = arith.mulf %1041, %1003 : vector<8x16xf32>
    %1051 = arith.mulf %1035, %1043 : vector<8x16xf32>
    %1052 = arith.addf %1050, %1051 : vector<8x16xf32>
    %1053 = math.tanh %1052 : vector<8x16xf32>
    %1054 = arith.mulf %1049, %1053 : vector<8x16xf32>
    %1055 = vector.extract_strided_slice %1021 {offsets = [0, 0], sizes = [8, 16], strides = [1, 1]} : vector<8x64xf32> to vector<8x16xf32>
    %1056 = arith.negf %1055 : vector<8x16xf32>
    %1057 = math.exp %1056 : vector<8x16xf32>
    %cst_331 = arith.constant 1.000000e+00 : f32
    %1058 = vector.broadcast %cst_331 : f32 to vector<8x16xf32>
    %1059 = arith.addf %1058, %1057 : vector<8x16xf32>
    %1060 = arith.divf %1058, %1059 : vector<8x16xf32>
    %1061 = vector.extract_strided_slice %1021 {offsets = [0, 16], sizes = [8, 16], strides = [1, 1]} : vector<8x64xf32> to vector<8x16xf32>
    %1062 = arith.negf %1061 : vector<8x16xf32>
    %1063 = math.exp %1062 : vector<8x16xf32>
    %cst_332 = arith.constant 1.000000e+00 : f32
    %1064 = vector.broadcast %cst_332 : f32 to vector<8x16xf32>
    %1065 = arith.addf %1064, %1063 : vector<8x16xf32>
    %1066 = arith.divf %1064, %1065 : vector<8x16xf32>
    %1067 = vector.extract_strided_slice %1021 {offsets = [0, 32], sizes = [8, 16], strides = [1, 1]} : vector<8x64xf32> to vector<8x16xf32>
    %1068 = math.tanh %1067 : vector<8x16xf32>
    %1069 = vector.extract_strided_slice %1021 {offsets = [0, 48], sizes = [8, 16], strides = [1, 1]} : vector<8x64xf32> to vector<8x16xf32>
    %1070 = arith.negf %1069 : vector<8x16xf32>
    %1071 = math.exp %1070 : vector<8x16xf32>
    %cst_333 = arith.constant 1.000000e+00 : f32
    %1072 = vector.broadcast %cst_333 : f32 to vector<8x16xf32>
    %1073 = arith.addf %1072, %1071 : vector<8x16xf32>
    %1074 = arith.divf %1072, %1073 : vector<8x16xf32>
    %1075 = arith.mulf %1066, %1009 : vector<8x16xf32>
    %1076 = arith.mulf %1060, %1068 : vector<8x16xf32>
    %1077 = arith.addf %1075, %1076 : vector<8x16xf32>
    %1078 = math.tanh %1077 : vector<8x16xf32>
    %1079 = arith.mulf %1074, %1078 : vector<8x16xf32>
    %1080 = arith.mulf %1054, %1025 : vector<8x16xf32>
    %c3_334 = arith.constant 3 : index
    %c0_335 = arith.constant 0 : index
    %c0_336 = arith.constant 0 : index
    %1081 = vector.load %arg14[%c3_334, %c0_335, %c0_336] : memref<8x8x32xf32, #tpu.memory_space<vmem>>, vector<1x8x16xf32>
    %1082 = vector.shape_cast %1081 : vector<1x8x16xf32> to vector<8x16xf32>
    %1083 = vector.shape_cast %1080 : vector<8x16xf32> to vector<1x8x16xf32>
    tpu.vector_store %arg14[%c3_334, %c0_335, %c0_336], %1083 {strides = array<i32>} : memref<8x8x32xf32, #tpu.memory_space<vmem>>, vector<1x8x16xf32>,
    %1084 = arith.mulf %1079, %1029 : vector<8x16xf32>
    %c4_337 = arith.constant 4 : index
    %c0_338 = arith.constant 0 : index
    %c16_339 = arith.constant 16 : index
    %1085 = vector.load %arg14[%c4_337, %c0_338, %c16_339] : memref<8x8x32xf32, #tpu.memory_space<vmem>>, vector<1x8x16xf32>
    %1086 = vector.shape_cast %1085 : vector<1x8x16xf32> to vector<8x16xf32>
    %1087 = vector.shape_cast %1084 : vector<8x16xf32> to vector<1x8x16xf32>
    tpu.vector_store %arg14[%c4_337, %c0_338, %c16_339], %1087 {strides = array<i32>} : memref<8x8x32xf32, #tpu.memory_space<vmem>>, vector<1x8x16xf32>,
    %1088 = arith.subf %1054, %1000 : vector<8x16xf32>
    %1089 = arith.mulf %1025, %1088 : vector<8x16xf32>
    %1090 = arith.addf %1000, %1089 : vector<8x16xf32>
    %1091 = arith.subf %1052, %1003 : vector<8x16xf32>
    %1092 = arith.mulf %1025, %1091 : vector<8x16xf32>
    %1093 = arith.addf %1003, %1092 : vector<8x16xf32>
    %1094 = arith.subf %1079, %1006 : vector<8x16xf32>
    %1095 = arith.mulf %1029, %1094 : vector<8x16xf32>
    %1096 = arith.addf %1006, %1095 : vector<8x16xf32>
    %1097 = arith.subf %1077, %1009 : vector<8x16xf32>
    %1098 = arith.mulf %1029, %1097 : vector<8x16xf32>
    %1099 = arith.addf %1009, %1098 : vector<8x16xf32>
    %1100 = arith.truncf %1090 : vector<8x16xf32> to vector<8x16xbf16>
    %cst_340 = arith.constant dense<0.000000e+00> : vector<8x64xf32>
    %1101 = tpu.matmul %1100, %734, %cst_340 {dimension_numbers = #tpu.dot_dimension_numbers<[1], [0], [0], [1], [0, 0, 1, 1], [], []>} : vector<8x16xbf16>, vector<16x64xbf16>, vector<8x64xf32> -> vector<8x64xf32>
    %1102 = arith.truncf %1096 : vector<8x16xf32> to vector<8x16xbf16>
    %cst_341 = arith.constant dense<0.000000e+00> : vector<8x64xf32>
    %1103 = tpu.matmul %1102, %735, %cst_341 {dimension_numbers = #tpu.dot_dimension_numbers<[1], [0], [0], [1], [0, 0, 1, 1], [], []>} : vector<8x16xbf16>, vector<16x64xbf16>, vector<8x64xf32> -> vector<8x64xf32>
    %c4_342 = arith.constant 4 : index
    %c0_343 = arith.constant 0 : index
    %c0_344 = arith.constant 0 : index
    %1104 = vector.load %arg15[%c4_342, %c0_343, %c0_344] : memref<8x8x128xf32, #tpu.memory_space<vmem>>, vector<1x8x128xf32>
    %1105 = vector.shape_cast %1104 : vector<1x8x128xf32> to vector<8x128xf32>
    %1106 = vector.extract_strided_slice %1105 {offsets = [0, 0], sizes = [8, 64], strides = [1, 1]} : vector<8x128xf32> to vector<8x64xf32>
    %1107 = arith.addf %1106, %1101 : vector<8x64xf32>
    %c3_345 = arith.constant 3 : index
    %c0_346 = arith.constant 0 : index
    %c0_347 = arith.constant 0 : index
    %1108 = vector.load %arg15[%c3_345, %c0_346, %c0_347] : memref<8x8x128xf32, #tpu.memory_space<vmem>>, vector<1x8x128xf32>
    %1109 = vector.shape_cast %1108 : vector<1x8x128xf32> to vector<8x128xf32>
    %1110 = vector.extract_strided_slice %1109 {offsets = [0, 64], sizes = [8, 64], strides = [1, 1]} : vector<8x128xf32> to vector<8x64xf32>
    %1111 = arith.addf %1110, %1103 : vector<8x64xf32>
    %c4_348 = arith.constant 4 : index
    %c0_349 = arith.constant 0 : index
    %c0_350 = arith.constant 0 : index
    %1112 = vector.load %arg1[%c4_348, %c0_349, %c0_350] : memref<8x8x1xf32, #tpu.memory_space<vmem>>, vector<1x8x1xf32>
    %1113 = vector.shape_cast %1112 : vector<1x8x1xf32> to vector<8x1xf32>
    %1114 = vector.shape_cast %1113 : vector<8x1xf32> to vector<8x1xf32>
    %1115 = vector.broadcast %1114 : vector<8x1xf32> to vector<8x16xf32>
    %c3_351 = arith.constant 3 : index
    %c0_352 = arith.constant 0 : index
    %c0_353 = arith.constant 0 : index
    %1116 = vector.load %arg1[%c3_351, %c0_352, %c0_353] : memref<8x8x1xf32, #tpu.memory_space<vmem>>, vector<1x8x1xf32>
    %1117 = vector.shape_cast %1116 : vector<1x8x1xf32> to vector<8x1xf32>
    %1118 = vector.shape_cast %1117 : vector<8x1xf32> to vector<8x1xf32>
    %1119 = vector.broadcast %1118 : vector<8x1xf32> to vector<8x16xf32>
    %1120 = vector.extract_strided_slice %1107 {offsets = [0, 0], sizes = [8, 16], strides = [1, 1]} : vector<8x64xf32> to vector<8x16xf32>
    %1121 = arith.negf %1120 : vector<8x16xf32>
    %1122 = math.exp %1121 : vector<8x16xf32>
    %cst_354 = arith.constant 1.000000e+00 : f32
    %1123 = vector.broadcast %cst_354 : f32 to vector<8x16xf32>
    %1124 = arith.addf %1123, %1122 : vector<8x16xf32>
    %1125 = arith.divf %1123, %1124 : vector<8x16xf32>
    %1126 = vector.extract_strided_slice %1107 {offsets = [0, 16], sizes = [8, 16], strides = [1, 1]} : vector<8x64xf32> to vector<8x16xf32>
    %1127 = arith.negf %1126 : vector<8x16xf32>
    %1128 = math.exp %1127 : vector<8x16xf32>
    %cst_355 = arith.constant 1.000000e+00 : f32
    %1129 = vector.broadcast %cst_355 : f32 to vector<8x16xf32>
    %1130 = arith.addf %1129, %1128 : vector<8x16xf32>
    %1131 = arith.divf %1129, %1130 : vector<8x16xf32>
    %1132 = vector.extract_strided_slice %1107 {offsets = [0, 32], sizes = [8, 16], strides = [1, 1]} : vector<8x64xf32> to vector<8x16xf32>
    %1133 = math.tanh %1132 : vector<8x16xf32>
    %1134 = vector.extract_strided_slice %1107 {offsets = [0, 48], sizes = [8, 16], strides = [1, 1]} : vector<8x64xf32> to vector<8x16xf32>
    %1135 = arith.negf %1134 : vector<8x16xf32>
    %1136 = math.exp %1135 : vector<8x16xf32>
    %cst_356 = arith.constant 1.000000e+00 : f32
    %1137 = vector.broadcast %cst_356 : f32 to vector<8x16xf32>
    %1138 = arith.addf %1137, %1136 : vector<8x16xf32>
    %1139 = arith.divf %1137, %1138 : vector<8x16xf32>
    %1140 = arith.mulf %1131, %1093 : vector<8x16xf32>
    %1141 = arith.mulf %1125, %1133 : vector<8x16xf32>
    %1142 = arith.addf %1140, %1141 : vector<8x16xf32>
    %1143 = math.tanh %1142 : vector<8x16xf32>
    %1144 = arith.mulf %1139, %1143 : vector<8x16xf32>
    %1145 = vector.extract_strided_slice %1111 {offsets = [0, 0], sizes = [8, 16], strides = [1, 1]} : vector<8x64xf32> to vector<8x16xf32>
    %1146 = arith.negf %1145 : vector<8x16xf32>
    %1147 = math.exp %1146 : vector<8x16xf32>
    %cst_357 = arith.constant 1.000000e+00 : f32
    %1148 = vector.broadcast %cst_357 : f32 to vector<8x16xf32>
    %1149 = arith.addf %1148, %1147 : vector<8x16xf32>
    %1150 = arith.divf %1148, %1149 : vector<8x16xf32>
    %1151 = vector.extract_strided_slice %1111 {offsets = [0, 16], sizes = [8, 16], strides = [1, 1]} : vector<8x64xf32> to vector<8x16xf32>
    %1152 = arith.negf %1151 : vector<8x16xf32>
    %1153 = math.exp %1152 : vector<8x16xf32>
    %cst_358 = arith.constant 1.000000e+00 : f32
    %1154 = vector.broadcast %cst_358 : f32 to vector<8x16xf32>
    %1155 = arith.addf %1154, %1153 : vector<8x16xf32>
    %1156 = arith.divf %1154, %1155 : vector<8x16xf32>
    %1157 = vector.extract_strided_slice %1111 {offsets = [0, 32], sizes = [8, 16], strides = [1, 1]} : vector<8x64xf32> to vector<8x16xf32>
    %1158 = math.tanh %1157 : vector<8x16xf32>
    %1159 = vector.extract_strided_slice %1111 {offsets = [0, 48], sizes = [8, 16], strides = [1, 1]} : vector<8x64xf32> to vector<8x16xf32>
    %1160 = arith.negf %1159 : vector<8x16xf32>
    %1161 = math.exp %1160 : vector<8x16xf32>
    %cst_359 = arith.constant 1.000000e+00 : f32
    %1162 = vector.broadcast %cst_359 : f32 to vector<8x16xf32>
    %1163 = arith.addf %1162, %1161 : vector<8x16xf32>
    %1164 = arith.divf %1162, %1163 : vector<8x16xf32>
    %1165 = arith.mulf %1156, %1099 : vector<8x16xf32>
    %1166 = arith.mulf %1150, %1158 : vector<8x16xf32>
    %1167 = arith.addf %1165, %1166 : vector<8x16xf32>
    %1168 = math.tanh %1167 : vector<8x16xf32>
    %1169 = arith.mulf %1164, %1168 : vector<8x16xf32>
    %1170 = arith.mulf %1144, %1115 : vector<8x16xf32>
    %c4_360 = arith.constant 4 : index
    %c0_361 = arith.constant 0 : index
    %c0_362 = arith.constant 0 : index
    %1171 = vector.load %arg14[%c4_360, %c0_361, %c0_362] : memref<8x8x32xf32, #tpu.memory_space<vmem>>, vector<1x8x16xf32>
    %1172 = vector.shape_cast %1171 : vector<1x8x16xf32> to vector<8x16xf32>
    %1173 = vector.shape_cast %1170 : vector<8x16xf32> to vector<1x8x16xf32>
    tpu.vector_store %arg14[%c4_360, %c0_361, %c0_362], %1173 {strides = array<i32>} : memref<8x8x32xf32, #tpu.memory_space<vmem>>, vector<1x8x16xf32>,
    %1174 = arith.mulf %1169, %1119 : vector<8x16xf32>
    %c3_363 = arith.constant 3 : index
    %c0_364 = arith.constant 0 : index
    %c16_365 = arith.constant 16 : index
    %1175 = vector.load %arg14[%c3_363, %c0_364, %c16_365] : memref<8x8x32xf32, #tpu.memory_space<vmem>>, vector<1x8x16xf32>
    %1176 = vector.shape_cast %1175 : vector<1x8x16xf32> to vector<8x16xf32>
    %1177 = vector.shape_cast %1174 : vector<8x16xf32> to vector<1x8x16xf32>
    tpu.vector_store %arg14[%c3_363, %c0_364, %c16_365], %1177 {strides = array<i32>} : memref<8x8x32xf32, #tpu.memory_space<vmem>>, vector<1x8x16xf32>,
    %1178 = arith.subf %1144, %1090 : vector<8x16xf32>
    %1179 = arith.mulf %1115, %1178 : vector<8x16xf32>
    %1180 = arith.addf %1090, %1179 : vector<8x16xf32>
    %1181 = arith.subf %1142, %1093 : vector<8x16xf32>
    %1182 = arith.mulf %1115, %1181 : vector<8x16xf32>
    %1183 = arith.addf %1093, %1182 : vector<8x16xf32>
    %1184 = arith.subf %1169, %1096 : vector<8x16xf32>
    %1185 = arith.mulf %1119, %1184 : vector<8x16xf32>
    %1186 = arith.addf %1096, %1185 : vector<8x16xf32>
    %1187 = arith.subf %1167, %1099 : vector<8x16xf32>
    %1188 = arith.mulf %1119, %1187 : vector<8x16xf32>
    %1189 = arith.addf %1099, %1188 : vector<8x16xf32>
    %1190 = arith.truncf %1180 : vector<8x16xf32> to vector<8x16xbf16>
    %cst_366 = arith.constant dense<0.000000e+00> : vector<8x64xf32>
    %1191 = tpu.matmul %1190, %734, %cst_366 {dimension_numbers = #tpu.dot_dimension_numbers<[1], [0], [0], [1], [0, 0, 1, 1], [], []>} : vector<8x16xbf16>, vector<16x64xbf16>, vector<8x64xf32> -> vector<8x64xf32>
    %1192 = arith.truncf %1186 : vector<8x16xf32> to vector<8x16xbf16>
    %cst_367 = arith.constant dense<0.000000e+00> : vector<8x64xf32>
    %1193 = tpu.matmul %1192, %735, %cst_367 {dimension_numbers = #tpu.dot_dimension_numbers<[1], [0], [0], [1], [0, 0, 1, 1], [], []>} : vector<8x16xbf16>, vector<16x64xbf16>, vector<8x64xf32> -> vector<8x64xf32>
    %c5_368 = arith.constant 5 : index
    %c0_369 = arith.constant 0 : index
    %c0_370 = arith.constant 0 : index
    %1194 = vector.load %arg15[%c5_368, %c0_369, %c0_370] : memref<8x8x128xf32, #tpu.memory_space<vmem>>, vector<1x8x128xf32>
    %1195 = vector.shape_cast %1194 : vector<1x8x128xf32> to vector<8x128xf32>
    %1196 = vector.extract_strided_slice %1195 {offsets = [0, 0], sizes = [8, 64], strides = [1, 1]} : vector<8x128xf32> to vector<8x64xf32>
    %1197 = arith.addf %1196, %1191 : vector<8x64xf32>
    %c2_371 = arith.constant 2 : index
    %c0_372 = arith.constant 0 : index
    %c0_373 = arith.constant 0 : index
    %1198 = vector.load %arg15[%c2_371, %c0_372, %c0_373] : memref<8x8x128xf32, #tpu.memory_space<vmem>>, vector<1x8x128xf32>
    %1199 = vector.shape_cast %1198 : vector<1x8x128xf32> to vector<8x128xf32>
    %1200 = vector.extract_strided_slice %1199 {offsets = [0, 64], sizes = [8, 64], strides = [1, 1]} : vector<8x128xf32> to vector<8x64xf32>
    %1201 = arith.addf %1200, %1193 : vector<8x64xf32>
    %c5_374 = arith.constant 5 : index
    %c0_375 = arith.constant 0 : index
    %c0_376 = arith.constant 0 : index
    %1202 = vector.load %arg1[%c5_374, %c0_375, %c0_376] : memref<8x8x1xf32, #tpu.memory_space<vmem>>, vector<1x8x1xf32>
    %1203 = vector.shape_cast %1202 : vector<1x8x1xf32> to vector<8x1xf32>
    %1204 = vector.shape_cast %1203 : vector<8x1xf32> to vector<8x1xf32>
    %1205 = vector.broadcast %1204 : vector<8x1xf32> to vector<8x16xf32>
    %c2_377 = arith.constant 2 : index
    %c0_378 = arith.constant 0 : index
    %c0_379 = arith.constant 0 : index
    %1206 = vector.load %arg1[%c2_377, %c0_378, %c0_379] : memref<8x8x1xf32, #tpu.memory_space<vmem>>, vector<1x8x1xf32>
    %1207 = vector.shape_cast %1206 : vector<1x8x1xf32> to vector<8x1xf32>
    %1208 = vector.shape_cast %1207 : vector<8x1xf32> to vector<8x1xf32>
    %1209 = vector.broadcast %1208 : vector<8x1xf32> to vector<8x16xf32>
    %1210 = vector.extract_strided_slice %1197 {offsets = [0, 0], sizes = [8, 16], strides = [1, 1]} : vector<8x64xf32> to vector<8x16xf32>
    %1211 = arith.negf %1210 : vector<8x16xf32>
    %1212 = math.exp %1211 : vector<8x16xf32>
    %cst_380 = arith.constant 1.000000e+00 : f32
    %1213 = vector.broadcast %cst_380 : f32 to vector<8x16xf32>
    %1214 = arith.addf %1213, %1212 : vector<8x16xf32>
    %1215 = arith.divf %1213, %1214 : vector<8x16xf32>
    %1216 = vector.extract_strided_slice %1197 {offsets = [0, 16], sizes = [8, 16], strides = [1, 1]} : vector<8x64xf32> to vector<8x16xf32>
    %1217 = arith.negf %1216 : vector<8x16xf32>
    %1218 = math.exp %1217 : vector<8x16xf32>
    %cst_381 = arith.constant 1.000000e+00 : f32
    %1219 = vector.broadcast %cst_381 : f32 to vector<8x16xf32>
    %1220 = arith.addf %1219, %1218 : vector<8x16xf32>
    %1221 = arith.divf %1219, %1220 : vector<8x16xf32>
    %1222 = vector.extract_strided_slice %1197 {offsets = [0, 32], sizes = [8, 16], strides = [1, 1]} : vector<8x64xf32> to vector<8x16xf32>
    %1223 = math.tanh %1222 : vector<8x16xf32>
    %1224 = vector.extract_strided_slice %1197 {offsets = [0, 48], sizes = [8, 16], strides = [1, 1]} : vector<8x64xf32> to vector<8x16xf32>
    %1225 = arith.negf %1224 : vector<8x16xf32>
    %1226 = math.exp %1225 : vector<8x16xf32>
    %cst_382 = arith.constant 1.000000e+00 : f32
    %1227 = vector.broadcast %cst_382 : f32 to vector<8x16xf32>
    %1228 = arith.addf %1227, %1226 : vector<8x16xf32>
    %1229 = arith.divf %1227, %1228 : vector<8x16xf32>
    %1230 = arith.mulf %1221, %1183 : vector<8x16xf32>
    %1231 = arith.mulf %1215, %1223 : vector<8x16xf32>
    %1232 = arith.addf %1230, %1231 : vector<8x16xf32>
    %1233 = math.tanh %1232 : vector<8x16xf32>
    %1234 = arith.mulf %1229, %1233 : vector<8x16xf32>
    %1235 = vector.extract_strided_slice %1201 {offsets = [0, 0], sizes = [8, 16], strides = [1, 1]} : vector<8x64xf32> to vector<8x16xf32>
    %1236 = arith.negf %1235 : vector<8x16xf32>
    %1237 = math.exp %1236 : vector<8x16xf32>
    %cst_383 = arith.constant 1.000000e+00 : f32
    %1238 = vector.broadcast %cst_383 : f32 to vector<8x16xf32>
    %1239 = arith.addf %1238, %1237 : vector<8x16xf32>
    %1240 = arith.divf %1238, %1239 : vector<8x16xf32>
    %1241 = vector.extract_strided_slice %1201 {offsets = [0, 16], sizes = [8, 16], strides = [1, 1]} : vector<8x64xf32> to vector<8x16xf32>
    %1242 = arith.negf %1241 : vector<8x16xf32>
    %1243 = math.exp %1242 : vector<8x16xf32>
    %cst_384 = arith.constant 1.000000e+00 : f32
    %1244 = vector.broadcast %cst_384 : f32 to vector<8x16xf32>
    %1245 = arith.addf %1244, %1243 : vector<8x16xf32>
    %1246 = arith.divf %1244, %1245 : vector<8x16xf32>
    %1247 = vector.extract_strided_slice %1201 {offsets = [0, 32], sizes = [8, 16], strides = [1, 1]} : vector<8x64xf32> to vector<8x16xf32>
    %1248 = math.tanh %1247 : vector<8x16xf32>
    %1249 = vector.extract_strided_slice %1201 {offsets = [0, 48], sizes = [8, 16], strides = [1, 1]} : vector<8x64xf32> to vector<8x16xf32>
    %1250 = arith.negf %1249 : vector<8x16xf32>
    %1251 = math.exp %1250 : vector<8x16xf32>
    %cst_385 = arith.constant 1.000000e+00 : f32
    %1252 = vector.broadcast %cst_385 : f32 to vector<8x16xf32>
    %1253 = arith.addf %1252, %1251 : vector<8x16xf32>
    %1254 = arith.divf %1252, %1253 : vector<8x16xf32>
    %1255 = arith.mulf %1246, %1189 : vector<8x16xf32>
    %1256 = arith.mulf %1240, %1248 : vector<8x16xf32>
    %1257 = arith.addf %1255, %1256 : vector<8x16xf32>
    %1258 = math.tanh %1257 : vector<8x16xf32>
    %1259 = arith.mulf %1254, %1258 : vector<8x16xf32>
    %1260 = arith.mulf %1234, %1205 : vector<8x16xf32>
    %c5_386 = arith.constant 5 : index
    %c0_387 = arith.constant 0 : index
    %c0_388 = arith.constant 0 : index
    %1261 = vector.load %arg14[%c5_386, %c0_387, %c0_388] : memref<8x8x32xf32, #tpu.memory_space<vmem>>, vector<1x8x16xf32>
    %1262 = vector.shape_cast %1261 : vector<1x8x16xf32> to vector<8x16xf32>
    %1263 = vector.shape_cast %1260 : vector<8x16xf32> to vector<1x8x16xf32>
    tpu.vector_store %arg14[%c5_386, %c0_387, %c0_388], %1263 {strides = array<i32>} : memref<8x8x32xf32, #tpu.memory_space<vmem>>, vector<1x8x16xf32>,
    %1264 = arith.mulf %1259, %1209 : vector<8x16xf32>
    %c2_389 = arith.constant 2 : index
    %c0_390 = arith.constant 0 : index
    %c16_391 = arith.constant 16 : index
    %1265 = vector.load %arg14[%c2_389, %c0_390, %c16_391] : memref<8x8x32xf32, #tpu.memory_space<vmem>>, vector<1x8x16xf32>
    %1266 = vector.shape_cast %1265 : vector<1x8x16xf32> to vector<8x16xf32>
    %1267 = vector.shape_cast %1264 : vector<8x16xf32> to vector<1x8x16xf32>
    tpu.vector_store %arg14[%c2_389, %c0_390, %c16_391], %1267 {strides = array<i32>} : memref<8x8x32xf32, #tpu.memory_space<vmem>>, vector<1x8x16xf32>,
    %1268 = arith.subf %1234, %1180 : vector<8x16xf32>
    %1269 = arith.mulf %1205, %1268 : vector<8x16xf32>
    %1270 = arith.addf %1180, %1269 : vector<8x16xf32>
    %1271 = arith.subf %1232, %1183 : vector<8x16xf32>
    %1272 = arith.mulf %1205, %1271 : vector<8x16xf32>
    %1273 = arith.addf %1183, %1272 : vector<8x16xf32>
    %1274 = arith.subf %1259, %1186 : vector<8x16xf32>
    %1275 = arith.mulf %1209, %1274 : vector<8x16xf32>
    %1276 = arith.addf %1186, %1275 : vector<8x16xf32>
    %1277 = arith.subf %1257, %1189 : vector<8x16xf32>
    %1278 = arith.mulf %1209, %1277 : vector<8x16xf32>
    %1279 = arith.addf %1189, %1278 : vector<8x16xf32>
    %1280 = arith.truncf %1270 : vector<8x16xf32> to vector<8x16xbf16>
    %cst_392 = arith.constant dense<0.000000e+00> : vector<8x64xf32>
    %1281 = tpu.matmul %1280, %734, %cst_392 {dimension_numbers = #tpu.dot_dimension_numbers<[1], [0], [0], [1], [0, 0, 1, 1], [], []>} : vector<8x16xbf16>, vector<16x64xbf16>, vector<8x64xf32> -> vector<8x64xf32>
    %1282 = arith.truncf %1276 : vector<8x16xf32> to vector<8x16xbf16>
    %cst_393 = arith.constant dense<0.000000e+00> : vector<8x64xf32>
    %1283 = tpu.matmul %1282, %735, %cst_393 {dimension_numbers = #tpu.dot_dimension_numbers<[1], [0], [0], [1], [0, 0, 1, 1], [], []>} : vector<8x16xbf16>, vector<16x64xbf16>, vector<8x64xf32> -> vector<8x64xf32>
    %c6_394 = arith.constant 6 : index
    %c0_395 = arith.constant 0 : index
    %c0_396 = arith.constant 0 : index
    %1284 = vector.load %arg15[%c6_394, %c0_395, %c0_396] : memref<8x8x128xf32, #tpu.memory_space<vmem>>, vector<1x8x128xf32>
    %1285 = vector.shape_cast %1284 : vector<1x8x128xf32> to vector<8x128xf32>
    %1286 = vector.extract_strided_slice %1285 {offsets = [0, 0], sizes = [8, 64], strides = [1, 1]} : vector<8x128xf32> to vector<8x64xf32>
    %1287 = arith.addf %1286, %1281 : vector<8x64xf32>
    %c1_397 = arith.constant 1 : index
    %c0_398 = arith.constant 0 : index
    %c0_399 = arith.constant 0 : index
    %1288 = vector.load %arg15[%c1_397, %c0_398, %c0_399] : memref<8x8x128xf32, #tpu.memory_space<vmem>>, vector<1x8x128xf32>
    %1289 = vector.shape_cast %1288 : vector<1x8x128xf32> to vector<8x128xf32>
    %1290 = vector.extract_strided_slice %1289 {offsets = [0, 64], sizes = [8, 64], strides = [1, 1]} : vector<8x128xf32> to vector<8x64xf32>
    %1291 = arith.addf %1290, %1283 : vector<8x64xf32>
    %c6_400 = arith.constant 6 : index
    %c0_401 = arith.constant 0 : index
    %c0_402 = arith.constant 0 : index
    %1292 = vector.load %arg1[%c6_400, %c0_401, %c0_402] : memref<8x8x1xf32, #tpu.memory_space<vmem>>, vector<1x8x1xf32>
    %1293 = vector.shape_cast %1292 : vector<1x8x1xf32> to vector<8x1xf32>
    %1294 = vector.shape_cast %1293 : vector<8x1xf32> to vector<8x1xf32>
    %1295 = vector.broadcast %1294 : vector<8x1xf32> to vector<8x16xf32>
    %c1_403 = arith.constant 1 : index
    %c0_404 = arith.constant 0 : index
    %c0_405 = arith.constant 0 : index
    %1296 = vector.load %arg1[%c1_403, %c0_404, %c0_405] : memref<8x8x1xf32, #tpu.memory_space<vmem>>, vector<1x8x1xf32>
    %1297 = vector.shape_cast %1296 : vector<1x8x1xf32> to vector<8x1xf32>
    %1298 = vector.shape_cast %1297 : vector<8x1xf32> to vector<8x1xf32>
    %1299 = vector.broadcast %1298 : vector<8x1xf32> to vector<8x16xf32>
    %1300 = vector.extract_strided_slice %1287 {offsets = [0, 0], sizes = [8, 16], strides = [1, 1]} : vector<8x64xf32> to vector<8x16xf32>
    %1301 = arith.negf %1300 : vector<8x16xf32>
    %1302 = math.exp %1301 : vector<8x16xf32>
    %cst_406 = arith.constant 1.000000e+00 : f32
    %1303 = vector.broadcast %cst_406 : f32 to vector<8x16xf32>
    %1304 = arith.addf %1303, %1302 : vector<8x16xf32>
    %1305 = arith.divf %1303, %1304 : vector<8x16xf32>
    %1306 = vector.extract_strided_slice %1287 {offsets = [0, 16], sizes = [8, 16], strides = [1, 1]} : vector<8x64xf32> to vector<8x16xf32>
    %1307 = arith.negf %1306 : vector<8x16xf32>
    %1308 = math.exp %1307 : vector<8x16xf32>
    %cst_407 = arith.constant 1.000000e+00 : f32
    %1309 = vector.broadcast %cst_407 : f32 to vector<8x16xf32>
    %1310 = arith.addf %1309, %1308 : vector<8x16xf32>
    %1311 = arith.divf %1309, %1310 : vector<8x16xf32>
    %1312 = vector.extract_strided_slice %1287 {offsets = [0, 32], sizes = [8, 16], strides = [1, 1]} : vector<8x64xf32> to vector<8x16xf32>
    %1313 = math.tanh %1312 : vector<8x16xf32>
    %1314 = vector.extract_strided_slice %1287 {offsets = [0, 48], sizes = [8, 16], strides = [1, 1]} : vector<8x64xf32> to vector<8x16xf32>
    %1315 = arith.negf %1314 : vector<8x16xf32>
    %1316 = math.exp %1315 : vector<8x16xf32>
    %cst_408 = arith.constant 1.000000e+00 : f32
    %1317 = vector.broadcast %cst_408 : f32 to vector<8x16xf32>
    %1318 = arith.addf %1317, %1316 : vector<8x16xf32>
    %1319 = arith.divf %1317, %1318 : vector<8x16xf32>
    %1320 = arith.mulf %1311, %1273 : vector<8x16xf32>
    %1321 = arith.mulf %1305, %1313 : vector<8x16xf32>
    %1322 = arith.addf %1320, %1321 : vector<8x16xf32>
    %1323 = math.tanh %1322 : vector<8x16xf32>
    %1324 = arith.mulf %1319, %1323 : vector<8x16xf32>
    %1325 = vector.extract_strided_slice %1291 {offsets = [0, 0], sizes = [8, 16], strides = [1, 1]} : vector<8x64xf32> to vector<8x16xf32>
    %1326 = arith.negf %1325 : vector<8x16xf32>
    %1327 = math.exp %1326 : vector<8x16xf32>
    %cst_409 = arith.constant 1.000000e+00 : f32
    %1328 = vector.broadcast %cst_409 : f32 to vector<8x16xf32>
    %1329 = arith.addf %1328, %1327 : vector<8x16xf32>
    %1330 = arith.divf %1328, %1329 : vector<8x16xf32>
    %1331 = vector.extract_strided_slice %1291 {offsets = [0, 16], sizes = [8, 16], strides = [1, 1]} : vector<8x64xf32> to vector<8x16xf32>
    %1332 = arith.negf %1331 : vector<8x16xf32>
    %1333 = math.exp %1332 : vector<8x16xf32>
    %cst_410 = arith.constant 1.000000e+00 : f32
    %1334 = vector.broadcast %cst_410 : f32 to vector<8x16xf32>
    %1335 = arith.addf %1334, %1333 : vector<8x16xf32>
    %1336 = arith.divf %1334, %1335 : vector<8x16xf32>
    %1337 = vector.extract_strided_slice %1291 {offsets = [0, 32], sizes = [8, 16], strides = [1, 1]} : vector<8x64xf32> to vector<8x16xf32>
    %1338 = math.tanh %1337 : vector<8x16xf32>
    %1339 = vector.extract_strided_slice %1291 {offsets = [0, 48], sizes = [8, 16], strides = [1, 1]} : vector<8x64xf32> to vector<8x16xf32>
    %1340 = arith.negf %1339 : vector<8x16xf32>
    %1341 = math.exp %1340 : vector<8x16xf32>
    %cst_411 = arith.constant 1.000000e+00 : f32
    %1342 = vector.broadcast %cst_411 : f32 to vector<8x16xf32>
    %1343 = arith.addf %1342, %1341 : vector<8x16xf32>
    %1344 = arith.divf %1342, %1343 : vector<8x16xf32>
    %1345 = arith.mulf %1336, %1279 : vector<8x16xf32>
    %1346 = arith.mulf %1330, %1338 : vector<8x16xf32>
    %1347 = arith.addf %1345, %1346 : vector<8x16xf32>
    %1348 = math.tanh %1347 : vector<8x16xf32>
    %1349 = arith.mulf %1344, %1348 : vector<8x16xf32>
    %1350 = arith.mulf %1324, %1295 : vector<8x16xf32>
    %c6_412 = arith.constant 6 : index
    %c0_413 = arith.constant 0 : index
    %c0_414 = arith.constant 0 : index
    %1351 = vector.load %arg14[%c6_412, %c0_413, %c0_414] : memref<8x8x32xf32, #tpu.memory_space<vmem>>, vector<1x8x16xf32>
    %1352 = vector.shape_cast %1351 : vector<1x8x16xf32> to vector<8x16xf32>
    %1353 = vector.shape_cast %1350 : vector<8x16xf32> to vector<1x8x16xf32>
    tpu.vector_store %arg14[%c6_412, %c0_413, %c0_414], %1353 {strides = array<i32>} : memref<8x8x32xf32, #tpu.memory_space<vmem>>, vector<1x8x16xf32>,
    %1354 = arith.mulf %1349, %1299 : vector<8x16xf32>
    %c1_415 = arith.constant 1 : index
    %c0_416 = arith.constant 0 : index
    %c16_417 = arith.constant 16 : index
    %1355 = vector.load %arg14[%c1_415, %c0_416, %c16_417] : memref<8x8x32xf32, #tpu.memory_space<vmem>>, vector<1x8x16xf32>
    %1356 = vector.shape_cast %1355 : vector<1x8x16xf32> to vector<8x16xf32>
    %1357 = vector.shape_cast %1354 : vector<8x16xf32> to vector<1x8x16xf32>
    tpu.vector_store %arg14[%c1_415, %c0_416, %c16_417], %1357 {strides = array<i32>} : memref<8x8x32xf32, #tpu.memory_space<vmem>>, vector<1x8x16xf32>,
    %1358 = arith.subf %1324, %1270 : vector<8x16xf32>
    %1359 = arith.mulf %1295, %1358 : vector<8x16xf32>
    %1360 = arith.addf %1270, %1359 : vector<8x16xf32>
    %1361 = arith.subf %1322, %1273 : vector<8x16xf32>
    %1362 = arith.mulf %1295, %1361 : vector<8x16xf32>
    %1363 = arith.addf %1273, %1362 : vector<8x16xf32>
    %1364 = arith.subf %1349, %1276 : vector<8x16xf32>
    %1365 = arith.mulf %1299, %1364 : vector<8x16xf32>
    %1366 = arith.addf %1276, %1365 : vector<8x16xf32>
    %1367 = arith.subf %1347, %1279 : vector<8x16xf32>
    %1368 = arith.mulf %1299, %1367 : vector<8x16xf32>
    %1369 = arith.addf %1279, %1368 : vector<8x16xf32>
    %1370 = arith.truncf %1360 : vector<8x16xf32> to vector<8x16xbf16>
    %cst_418 = arith.constant dense<0.000000e+00> : vector<8x64xf32>
    %1371 = tpu.matmul %1370, %734, %cst_418 {dimension_numbers = #tpu.dot_dimension_numbers<[1], [0], [0], [1], [0, 0, 1, 1], [], []>} : vector<8x16xbf16>, vector<16x64xbf16>, vector<8x64xf32> -> vector<8x64xf32>
    %1372 = arith.truncf %1366 : vector<8x16xf32> to vector<8x16xbf16>
    %cst_419 = arith.constant dense<0.000000e+00> : vector<8x64xf32>
    %1373 = tpu.matmul %1372, %735, %cst_419 {dimension_numbers = #tpu.dot_dimension_numbers<[1], [0], [0], [1], [0, 0, 1, 1], [], []>} : vector<8x16xbf16>, vector<16x64xbf16>, vector<8x64xf32> -> vector<8x64xf32>
    %c7_420 = arith.constant 7 : index
    %c0_421 = arith.constant 0 : index
    %c0_422 = arith.constant 0 : index
    %1374 = vector.load %arg15[%c7_420, %c0_421, %c0_422] : memref<8x8x128xf32, #tpu.memory_space<vmem>>, vector<1x8x128xf32>
    %1375 = vector.shape_cast %1374 : vector<1x8x128xf32> to vector<8x128xf32>
    %1376 = vector.extract_strided_slice %1375 {offsets = [0, 0], sizes = [8, 64], strides = [1, 1]} : vector<8x128xf32> to vector<8x64xf32>
    %1377 = arith.addf %1376, %1371 : vector<8x64xf32>
    %c0_423 = arith.constant 0 : index
    %c0_424 = arith.constant 0 : index
    %c0_425 = arith.constant 0 : index
    %1378 = vector.load %arg15[%c0_423, %c0_424, %c0_425] : memref<8x8x128xf32, #tpu.memory_space<vmem>>, vector<1x8x128xf32>
    %1379 = vector.shape_cast %1378 : vector<1x8x128xf32> to vector<8x128xf32>
    %1380 = vector.extract_strided_slice %1379 {offsets = [0, 64], sizes = [8, 64], strides = [1, 1]} : vector<8x128xf32> to vector<8x64xf32>
    %1381 = arith.addf %1380, %1373 : vector<8x64xf32>
    %c7_426 = arith.constant 7 : index
    %c0_427 = arith.constant 0 : index
    %c0_428 = arith.constant 0 : index
    %1382 = vector.load %arg1[%c7_426, %c0_427, %c0_428] : memref<8x8x1xf32, #tpu.memory_space<vmem>>, vector<1x8x1xf32>
    %1383 = vector.shape_cast %1382 : vector<1x8x1xf32> to vector<8x1xf32>
    %1384 = vector.shape_cast %1383 : vector<8x1xf32> to vector<8x1xf32>
    %1385 = vector.broadcast %1384 : vector<8x1xf32> to vector<8x16xf32>
    %c0_429 = arith.constant 0 : index
    %c0_430 = arith.constant 0 : index
    %c0_431 = arith.constant 0 : index
    %1386 = vector.load %arg1[%c0_429, %c0_430, %c0_431] : memref<8x8x1xf32, #tpu.memory_space<vmem>>, vector<1x8x1xf32>
    %1387 = vector.shape_cast %1386 : vector<1x8x1xf32> to vector<8x1xf32>
    %1388 = vector.shape_cast %1387 : vector<8x1xf32> to vector<8x1xf32>
    %1389 = vector.broadcast %1388 : vector<8x1xf32> to vector<8x16xf32>
    %1390 = vector.extract_strided_slice %1377 {offsets = [0, 0], sizes = [8, 16], strides = [1, 1]} : vector<8x64xf32> to vector<8x16xf32>
    %1391 = arith.negf %1390 : vector<8x16xf32>
    %1392 = math.exp %1391 : vector<8x16xf32>
    %cst_432 = arith.constant 1.000000e+00 : f32
    %1393 = vector.broadcast %cst_432 : f32 to vector<8x16xf32>
    %1394 = arith.addf %1393, %1392 : vector<8x16xf32>
    %1395 = arith.divf %1393, %1394 : vector<8x16xf32>
    %1396 = vector.extract_strided_slice %1377 {offsets = [0, 16], sizes = [8, 16], strides = [1, 1]} : vector<8x64xf32> to vector<8x16xf32>
    %1397 = arith.negf %1396 : vector<8x16xf32>
    %1398 = math.exp %1397 : vector<8x16xf32>
    %cst_433 = arith.constant 1.000000e+00 : f32
    %1399 = vector.broadcast %cst_433 : f32 to vector<8x16xf32>
    %1400 = arith.addf %1399, %1398 : vector<8x16xf32>
    %1401 = arith.divf %1399, %1400 : vector<8x16xf32>
    %1402 = vector.extract_strided_slice %1377 {offsets = [0, 32], sizes = [8, 16], strides = [1, 1]} : vector<8x64xf32> to vector<8x16xf32>
    %1403 = math.tanh %1402 : vector<8x16xf32>
    %1404 = vector.extract_strided_slice %1377 {offsets = [0, 48], sizes = [8, 16], strides = [1, 1]} : vector<8x64xf32> to vector<8x16xf32>
    %1405 = arith.negf %1404 : vector<8x16xf32>
    %1406 = math.exp %1405 : vector<8x16xf32>
    %cst_434 = arith.constant 1.000000e+00 : f32
    %1407 = vector.broadcast %cst_434 : f32 to vector<8x16xf32>
    %1408 = arith.addf %1407, %1406 : vector<8x16xf32>
    %1409 = arith.divf %1407, %1408 : vector<8x16xf32>
    %1410 = arith.mulf %1401, %1363 : vector<8x16xf32>
    %1411 = arith.mulf %1395, %1403 : vector<8x16xf32>
    %1412 = arith.addf %1410, %1411 : vector<8x16xf32>
    %1413 = math.tanh %1412 : vector<8x16xf32>
    %1414 = arith.mulf %1409, %1413 : vector<8x16xf32>
    %1415 = vector.extract_strided_slice %1381 {offsets = [0, 0], sizes = [8, 16], strides = [1, 1]} : vector<8x64xf32> to vector<8x16xf32>
    %1416 = arith.negf %1415 : vector<8x16xf32>
    %1417 = math.exp %1416 : vector<8x16xf32>
    %cst_435 = arith.constant 1.000000e+00 : f32
    %1418 = vector.broadcast %cst_435 : f32 to vector<8x16xf32>
    %1419 = arith.addf %1418, %1417 : vector<8x16xf32>
    %1420 = arith.divf %1418, %1419 : vector<8x16xf32>
    %1421 = vector.extract_strided_slice %1381 {offsets = [0, 16], sizes = [8, 16], strides = [1, 1]} : vector<8x64xf32> to vector<8x16xf32>
    %1422 = arith.negf %1421 : vector<8x16xf32>
    %1423 = math.exp %1422 : vector<8x16xf32>
    %cst_436 = arith.constant 1.000000e+00 : f32
    %1424 = vector.broadcast %cst_436 : f32 to vector<8x16xf32>
    %1425 = arith.addf %1424, %1423 : vector<8x16xf32>
    %1426 = arith.divf %1424, %1425 : vector<8x16xf32>
    %1427 = vector.extract_strided_slice %1381 {offsets = [0, 32], sizes = [8, 16], strides = [1, 1]} : vector<8x64xf32> to vector<8x16xf32>
    %1428 = math.tanh %1427 : vector<8x16xf32>
    %1429 = vector.extract_strided_slice %1381 {offsets = [0, 48], sizes = [8, 16], strides = [1, 1]} : vector<8x64xf32> to vector<8x16xf32>
    %1430 = arith.negf %1429 : vector<8x16xf32>
    %1431 = math.exp %1430 : vector<8x16xf32>
    %cst_437 = arith.constant 1.000000e+00 : f32
    %1432 = vector.broadcast %cst_437 : f32 to vector<8x16xf32>
    %1433 = arith.addf %1432, %1431 : vector<8x16xf32>
    %1434 = arith.divf %1432, %1433 : vector<8x16xf32>
    %1435 = arith.mulf %1426, %1369 : vector<8x16xf32>
    %1436 = arith.mulf %1420, %1428 : vector<8x16xf32>
    %1437 = arith.addf %1435, %1436 : vector<8x16xf32>
    %1438 = math.tanh %1437 : vector<8x16xf32>
    %1439 = arith.mulf %1434, %1438 : vector<8x16xf32>
    %1440 = arith.mulf %1414, %1385 : vector<8x16xf32>
    %c7_438 = arith.constant 7 : index
    %c0_439 = arith.constant 0 : index
    %c0_440 = arith.constant 0 : index
    %1441 = vector.load %arg14[%c7_438, %c0_439, %c0_440] : memref<8x8x32xf32, #tpu.memory_space<vmem>>, vector<1x8x16xf32>
    %1442 = vector.shape_cast %1441 : vector<1x8x16xf32> to vector<8x16xf32>
    %1443 = vector.shape_cast %1440 : vector<8x16xf32> to vector<1x8x16xf32>
    tpu.vector_store %arg14[%c7_438, %c0_439, %c0_440], %1443 {strides = array<i32>} : memref<8x8x32xf32, #tpu.memory_space<vmem>>, vector<1x8x16xf32>,
    %1444 = arith.mulf %1439, %1389 : vector<8x16xf32>
    %c0_441 = arith.constant 0 : index
    %c0_442 = arith.constant 0 : index
    %c16_443 = arith.constant 16 : index
    %1445 = vector.load %arg14[%c0_441, %c0_442, %c16_443] : memref<8x8x32xf32, #tpu.memory_space<vmem>>, vector<1x8x16xf32>
    %1446 = vector.shape_cast %1445 : vector<1x8x16xf32> to vector<8x16xf32>
    %1447 = vector.shape_cast %1444 : vector<8x16xf32> to vector<1x8x16xf32>
    tpu.vector_store %arg14[%c0_441, %c0_442, %c16_443], %1447 {strides = array<i32>} : memref<8x8x32xf32, #tpu.memory_space<vmem>>, vector<1x8x16xf32>,
    %c0_444 = arith.constant 0 : index
    %c0_445 = arith.constant 0 : index
    %c0_446 = arith.constant 0 : index
    %1448 = vector.load %arg14[%c0_444, %c0_445, %c0_446] : memref<8x8x32xf32, #tpu.memory_space<vmem>>, vector<8x8x32xf32>
    %1449 = vector.shape_cast %1448 : vector<8x8x32xf32> to vector<64x32xf32>
    %1450 = arith.truncf %1449 : vector<64x32xf32> to vector<64x32xbf16>
    %c0_447 = arith.constant 0 : index
    %c0_448 = arith.constant 0 : index
    %1451 = vector.load %arg10[%c0_447, %c0_448] : memref<32x128xbf16, #tpu.memory_space<vmem>>, vector<32x128xbf16>
    %cst_449 = arith.constant dense<0.000000e+00> : vector<64x128xf32>
    %1452 = tpu.matmul %1450, %1451, %cst_449 {dimension_numbers = #tpu.dot_dimension_numbers<[1], [0], [0], [1], [0, 0, 1, 1], [], []>} : vector<64x32xbf16>, vector<32x128xbf16>, vector<64x128xf32> -> vector<64x128xf32>
    %c0_450 = arith.constant 0 : index
    %c0_451 = arith.constant 0 : index
    %1453 = vector.load %arg11[%c0_450, %c0_451] : memref<1x128xf32, #tpu.memory_space<vmem>>, vector<1x128xf32>
    %1454 = vector.broadcast %1453 : vector<1x128xf32> to vector<64x128xf32>
    %1455 = arith.addf %1452, %1454 : vector<64x128xf32>
    %1456 = vector.shape_cast %1455 : vector<64x128xf32> to vector<8x8x128xf32>
    %c0_452 = arith.constant 0 : index
    %c0_453 = arith.constant 0 : index
    %c0_454 = arith.constant 0 : index
    %1457 = vector.load %arg12[%c0_452, %c0_453, %c0_454] : memref<8x8x128xf32, #tpu.memory_space<vmem>>, vector<8x8x128xf32>
    tpu.vector_store %arg12[%c0_452, %c0_453, %c0_454], %1456 {strides = array<i32>} : memref<8x8x128xf32, #tpu.memory_space<vmem>>, vector<8x8x128xf32>,
    return
  }
}

</mosaic_0001>

<bundles_post_ra>
// kernel: tpu_custom_call.1
= control target key start
LH: loop header
LB: loop body
LE: loop exit
PB: predicated region body
PF: predicated region fallthrough
CT: control target
= control target key end

     0   :  { %17 = vsyncpa [#allocation6], 0  ;;  %s5686_s0 = inlined_call_operand.vmem [shape: f32[8,8,16], index: 0, kind: input, shape index: {}]   ;;  %s5687_s1 = inlined_call_operand.vmem [shape: f32[8,8,1], index: 1, kind: input, shape index: {}]   ;;  %s5688_s2 = inlined_call_operand.hbm [shape: bf16[16,128], index: 2, kind: input, shape index: {}]   ;;  %s5689_s3 = inlined_call_operand.hbm [shape: bf16[16,64], index: 3, kind: input, shape index: {}]   ;;  %s5690_s4 = inlined_call_operand.hbm [shape: bf16[16,64], index: 4, kind: input, shape index: {}]   ;;  %s5691_s5 = inlined_call_operand.vmem [shape: f32[1,128], index: 5, kind: input, shape index: {}]   ;;  %s5692_s6 = inlined_call_operand.vmem [shape: bf16[32,128], index: 6, kind: input, shape index: {}]   ;;  %s5693_s7 = inlined_call_operand.hbm [shape: bf16[16,64], index: 7, kind: input, shape index: {}]   ;;  %s5694_s8 = inlined_call_operand.hbm [shape: bf16[16,64], index: 8, kind: input, shape index: {}]   ;;  %s5695_s9 = inlined_call_operand.vmem [shape: f32[1,128], index: 9, kind: input, shape index: {}]   ;;  %s5696_s10 = inlined_call_operand.hbm [shape: bf16[32,128], index: 10, kind: input, shape index: {}]   ;;  %s5697_s11 = inlined_call_operand.vmem [shape: f32[1,128], index: 11, kind: input, shape index: {}]   ;;  %s5698_s12 = inlined_call_operand.hbm [shape: f32[8,8,128], index: 12, kind: output, shape index: {}]  }
   0x1   :  { %18 = vsyncpa [#allocation9], 0 }
   0x2   :  { %19 = vsyncpa [#allocation12], 0 }
   0x3   :  { %20 = vsyncpa [#allocation15], 0 }
   0x4   :  { %21 = vsyncpa [#allocation7], 0  ;;  %s4334_s21 = smov [#allocation8]   ;;  %s4335_s23 = smov [#allocation11]  }
   0x5   :  { %s43_s22 = sshll.u32 %s4334_s21, 4  ;;  %s71_s24 = sshll.u32 %s4335_s23, 4  ;;  %s44_s22 = int_to_ptr.vmem [resolvable:$true] %s43_s22  ;;  %s72_s24 = int_to_ptr.vmem [resolvable:$true] %s71_s24 }
   0x6   :  { %s4192_s25 = scalar_lea.vmem %s44_s22, 128  ;;  %p4197_p1 = scmp.lt.s32.totalorder %s44_s22, %s44_s22 }
   0x7   :  { %p4193_p0 = scmp.ne.s32.totalorder %s44_s22, %s4192_s25  ;;  %p4198_p2 = scmp.lt.s32.totalorder %s4192_s25, %s4192_s25 }
   0x9   :  { %p4199_p3 = por %p4198_p2, %p4197_p1 }
   0xb   :  { %p4200_p4 = pnand %p4199_p3, %p4193_p0 }
   0xd   :  { %4203 = shalt.err (!%p4200_p4)
}
   0xe   :  { %s4336_s26 = smov 64   ;;  %s4337_s27 = smov 4  }
   0xf   :  { %49 = dma.hbm_to_vmem [thread:$0]  %s5689_s3, 128, %s44_s22, [#allocation9], %s4336_s26, %s4336_s26, %s4337_s27  }
  0x10   :  { %s4212_s30 = scalar_lea.vmem %s72_s24, 128  ;;  %p4217_p6 = scmp.lt.s32.totalorder %s72_s24, %s72_s24 }
  0x11   :  { %p4213_p5 = scmp.ne.s32.totalorder %s72_s24, %s4212_s30  ;;  %p4218_p7 = scmp.lt.s32.totalorder %s4212_s30, %s4212_s30 }
  0x13   :  { %p4219_p8 = por %p4218_p7, %p4217_p6 }
  0x15   :  { %p4220_p9 = pnand %p4219_p8, %p4213_p5 }
  0x17   :  { %4223 = shalt.err (!%p4220_p9)
}
  0x18   :  { %77 = dma.hbm_to_vmem [thread:$0]  %s5693_s7, 128, %s72_s24, [#allocation12], %s4336_s26, %s4336_s26, %s4337_s27  }
  0x19   :  { %s4338_s15 = smov [#allocation5]   ;;  %s4339_s17 = smov [#allocation10]  }
  0x1a   :  { %s31_s16 = sshll.u32 %s4338_s15, 4  ;;  %s55_s18 = sshll.u32 %s4339_s17, 4  ;;  %s32_s16 = int_to_ptr.vmem [resolvable:$true] %s31_s16  ;;  %s56_s18 = int_to_ptr.vmem [resolvable:$true] %s55_s18 }
  0x1b   :  { %s4232_s3 = scalar_lea.vmem %s32_s16, 128  ;;  %p4237_p11 = scmp.lt.s32.totalorder %s32_s16, %s32_s16 }
  0x1c   :  { %p4233_p10 = scmp.ne.s32.totalorder %s32_s16, %s4232_s3  ;;  %p4238_p12 = scmp.lt.s32.totalorder %s4232_s3, %s4232_s3 }
  0x1e   :  { %p4239_p13 = por %p4238_p12, %p4237_p11 }
  0x20   :  { %p4240_p0 = pnand %p4239_p13, %p4233_p10 }
  0x22   :  { %4243 = shalt.err (!%p4240_p0)
}
  0x23   :  { %37 = dma.hbm_to_vmem [thread:$0]  %s5688_s2, 128, %s32_s16, [#allocation6], %s4336_s26, %s4336_s26, %s4337_s27  }
  0x24   :  { %s4252_s7 = scalar_lea.vmem %s56_s18, 128  ;;  %p4257_p2 = scmp.lt.s32.totalorder %s56_s18, %s56_s18 }
  0x25   :  { %p4253_p1 = scmp.ne.s32.totalorder %s56_s18, %s4252_s7  ;;  %p4258_p3 = scmp.lt.s32.totalorder %s4252_s7, %s4252_s7 }
  0x27   :  { %p4259_p4 = por %p4258_p3, %p4257_p2 }
  0x29   :  { %p4260_p5 = pnand %p4259_p4, %p4253_p1 }
  0x2b   :  { %4263 = shalt.err (!%p4260_p5)
}
  0x2c   :  { %61 = dma.hbm_to_vmem [thread:$0]  %s5690_s4, 128, %s56_s18, [#allocation9], %s4336_s26, %s4336_s26, %s4337_s27  }
  0x2d   :  { %s4340_s23 = smov [#allocation13]   ;;  %s4341_s25 = smov [#allocation14]  }
  0x2e   :  { %s83_s24 = sshll.u32 %s4340_s23, 4  ;;  %s97_s28 = sshll.u32 %s4341_s25, 4  ;;  %s84_s24 = int_to_ptr.vmem [resolvable:$true] %s83_s24  ;;  %s98_s28 = int_to_ptr.vmem [resolvable:$true] %s97_s28 }
  0x2f   :  { %s4272_s2 = scalar_lea.vmem %s84_s24, 128  ;;  %p4277_p7 = scmp.lt.s32.totalorder %s84_s24, %s84_s24 }
  0x30   :  { %p4273_p6 = scmp.ne.s32.totalorder %s84_s24, %s4272_s2  ;;  %p4278_p8 = scmp.lt.s32.totalorder %s4272_s2, %s4272_s2 }
  0x32   :  { %p4279_p9 = por %p4278_p8, %p4277_p7 }
  0x34   :  { %p4280_p10 = pnand %p4279_p9, %p4273_p6 }
  0x36   :  { %4283 = shalt.err (!%p4280_p10)
}
  0x37   :  { %89 = dma.hbm_to_vmem [thread:$0]  %s5694_s8, 128, %s84_s24, [#allocation12], %s4336_s26, %s4336_s26, %s4337_s27  }
  0x38   :  { %s4292_s4 = scalar_lea.vmem %s98_s28, 256  ;;  %p4297_p12 = scmp.lt.s32.totalorder %s98_s28, %s98_s28 }
  0x39   :  { %p4293_p11 = scmp.ne.s32.totalorder %s98_s28, %s4292_s4  ;;  %p4298_p13 = scmp.lt.s32.totalorder %s4292_s4, %s4292_s4 }
  0x3b   :  { %p4299_p0 = por %p4298_p13, %p4297_p12 }
  0x3d   :  { %p4300_p1 = pnand %p4299_p0, %p4293_p11 }
  0x3f   :  { %4303 = shalt.err (!%p4300_p1)
}
  0x40   :  { %103 = dma.hbm_to_vmem [thread:$0]  %s5696_s10, 256, %s98_s28, [#allocation15], %s4336_s26, %s4336_s26, %s4337_s27  }
  0x41   :  { %4324 = dma.done.wait [#allocation6], 128  }
  0x42   :  { %4325 = vsyncadd [#allocation6], 4294967168 }
  0x43   :  { %4326 = dma.done.wait [#allocation9], 256  }
  0x44   :  { %4327 = vsyncadd [#allocation9], 4294967040 }
  0x45   :  { %4328 = dma.done.wait [#allocation12], 256  }
  0x46   :  { %4329 = vsyncadd [#allocation12], 4294967040 }
  0x47   :  { %4330 = dma.done.wait [#allocation15], 256  }
  0x48   :  { %4331 = vsyncadd [#allocation15], 4294967040  ;;  %v4342_v0 = vmov 0   ;;  %v3916_v1 = vld [vmem:[#allocation5] sm:$0xff]   ;;  %v130_v3 = vld [vmem:[%s5686_s0 + $0x28] sm:$0xff]  ;;  %vm152_vm0 = vcmask 130048  }
  0x49   :  { %3914 = vset.pattern.permute.xlu1 %v4342_v0  ;;  %3915 = vset.pattern.permute.xlu0 %v4342_v0  ;;  %v129_v2 = vld [vmem:[%s5686_s0 + $0x20] sm:$0xff]  ;;  %v131_v4 = vld [vmem:[%s5686_s0 + $0x30] sm:$0xff]  ;;  %v132_v6 = vld [vmem:[%s5686_s0 + $0x38] sm:$0xff]  ;;  %v4343_v11 = vmov 0.0   ;;  %vm4344_vm1 = vmmov 0   ;;  %s4345_s2 = smov 96  }
  0x4a   :  { %3894 = vmatprep.subr.bf16.mxu1 %v3916_v1  ;;  %v135_v5 = vpack.c.bf16 %v130_v3, %v129_v2  ;;  %3668 = vmatprep.subr.bf16.mxu0 %v3916_v1  ;;  %v136_v7 = vpack.c.bf16 %v132_v6, %v131_v4  ;;  %v4467_v8 = vld [vmem:[#allocation8] sm:$0xff]   ;;  %v125_v9 = vld [vmem:[%s5686_s0] sm:$0xff]  ;;  %v127_v13 = vld [vmem:[%s5686_s0 + $0x10] sm:$0xff]  ;;  %s4347_s4 = smov 32   ;;  %s4348_s16 = smov 80   ;;  %vm419_vm2 = vcmask 261248  }
  0x4b   :  { %3895 = vmatpush3.bf16.msra.mxu1 %v3916_v1  ;;  %3669 = vmatpush3.bf16.msra.mxu0 %v3916_v1  ;;  %v126_v10 = vld [vmem:[%s5686_s0 + $0x8] sm:$0xff]  ;;  %v128_v14 = vld [vmem:[%s5686_s0 + $0x18] sm:$0xff]  ;;  %v4495_v16 = vld [vmem:[#allocation10] sm:$0xff]   ;;  %vm1770_vm3 = vcmask 261120  }
  0x4c   :  { %3674 = vmatprep.mubr.msk.bf16.mxu1 %vm152_vm0, %v135_v5  ;;  %3678 = vmatprep.subr.bf16.mxu1 %v4343_v11  ;;  %v133_v12 = vpack.c.bf16 %v126_v10, %v125_v9  ;;  %v134_v15 = vpack.c.bf16 %v128_v14, %v127_v13  ;;  %v4517_v29 = vld [vmem:[%s5691_s5] ss:$0 sm:$0xff]  ;;  %s4346_s5 = smov 16   ;;  %v3483_v40 = vld [vmem:[%s5687_s1 + $0x38] sm:$0xff] }
  0x4d   :  { %3690 = vmatprep.subr.bf16.mxu0 %v4343_v11  ;;  %v346_v61 = vld [vmem:[%s5687_s1] sm:$0xff] }
  0x4e   :  { %3675 = vmatmul.mubr.msk.bf16.vlgmr.msra.gmra.mxu1 %vm152_vm0, %v136_v7  ;;  %3670 = vmatprep.mubr.msk.bf16.mxu0 %vm152_vm0, %v133_v12 }
  0x4f   :  { %3679 = vmatpush3.bf16.msra.mxu1 %v4467_v8  ;;  %3671 = vmatmul.mubr.msk.bf16.vlgmr.msra.gmra.mxu0 %vm152_vm0, %v134_v15 }
  0x50   :  { %3680 = vmatprep.mubr.msk.bf16.mxu1 %vm4344_vm1, %v4343_v11  ;;  %3684 = vmatprep.subr.bf16.mxu1 %v4343_v11 }
  0x51   :  { %3691 = vmatpush3.bf16.msra.mxu0 %v4467_v8  ;;  %3692 = vmatprep.mubr.msk.bf16.mxu0 %vm4344_vm1, %v4343_v11 }
  0x52   :  { %3702 = vmatprep.subr.bf16.mxu0 %v4343_v11 }
  0x56   :  { %3681 = vmatmul.mubr.bf16.vlgmr.msra.gmra.mxu1 %v4342_v0 }
  0x57   :  { %3685 = vmatpush3.bf16.msra.mxu1 %v4495_v16  ;;  %3686 = vmatprep.mubr.msk.bf16.mxu1 %vm4344_vm1, %v4343_v11 }
  0x58   :  { %3696 = vmatprep.subr.bf16.mxu1 %v4343_v11 }
  0x5e   :  { %3687 = vmatmul.mubr.bf16.vlgmr.msra.gmra.mxu1 %v4342_v0 }
  0x5f   :  { %3697 = vmatpush3.bf16.msra.mxu1 %v4495_v16  ;;  %3698 = vmatprep.mubr.msk.bf16.mxu1 %vm4344_vm1, %v4343_v11 }
  0x60   :  { %3708 = vmatprep.subr.bf16.mxu1 %v4343_v11 }
 0x10e   :  { %v4507_v17 = vpop.f32.mrf.mxu1 }
 0x10f   :  { %v4528_v41 = vpop.f32.mrf.mxu0  ;;  %v4556_v4 = vadd.f32 %v4507_v17, %v4517_v29 }
 0x110   :  { %v4509_v18 = vpop.f32.mrf.mxu1 }
 0x111   :  { %v199_v42 = vpop.f32.mrf.mxu0 }
 0x112   :  { %v3677_v19 = vpop.f32.mrf.mxu1  ;;  %v4531_v43 = vadd.f32 %v4517_v29, %v199_v42 }
 0x113   :  { %v4520_v30 = vadd.f32 %v3677_v19, %v4517_v29 }
 0x114   :  { %v4511_v20 = vpop.f32.mrf.mxu1 }
 0x116   :  { %v285_v21 = vpop.f32.mrf.mxu1 }
 0x117   :  { %v338_v47 = vadd.f32 %v285_v21, %v4531_v43 }
 0x118   :  { %v3682_v22 = vpop.f32.mrf.mxu1 }
 0x119   :  { %v3484_v50 = vmul.f32 -1.442695, %v338_v47 }
 0x11a   :  { %v288_v23 = vpop.f32.mrf.mxu1 }
 0x11c   :  { %v3683_v24 = vpop.f32.mrf.mxu1 }
 0x11d   :  { %v4568_v24 = vld [vmem:[%s5687_s1 + $0x30] sm:$0xff] }
 0x11e   :  { %v331_v25 = vpop.f32.mrf.mxu1 }
 0x11f   :  { %342 = vrot.lane.b32.xlu0 %v331_v25, %s4336_s26 }
 0x120   :  { %v3688_v26 = vpop.f32.mrf.mxu1 }
 0x122   :  { %v334_v27 = vpop.f32.mrf.mxu1 }
 0x124   :  { %v3689_v28 = vpop.f32.mrf.mxu1 }
 0x191   :  { %v343_v31 = vpop.permute.xlu0 %342 }
 0x192   :  { %v345_v32 = vadd.f32 %v343_v31, %v4520_v30 }
 0x194   :  { %3925 = vtanh.f32 %v345_v32  ;;  %v3485_v34 = vmul.f32 -1.442695, %v345_v32 }
 0x196   :  { %3927 = vpow2.f32 %v3485_v34 }
 0x1a1   :  { %v3926_v33 = vpop.eup %3925 }
 0x1a2   :  { %392 = vrot.lane.b32.xlu0 %v3926_v33, %s4345_s2 }
 0x1a3   :  { %v3928_v35 = vpop.eup %3927 }
 0x1a4   :  { %v386_v36 = vadd.f32 1.0, %v3928_v35 }
 0x1a6   :  { %3929 = vrcp.f32 %v386_v36 }
 0x1b3   :  { %v3930_v37 = vpop.eup %3929 }
 0x1b4   :  { %v390_v44 = vmul.f32 0.0, %v3930_v37 }
 0x214   :  { %v393_v38 = vpop.permute.xlu0 %392 }
 0x215   :  { %v395_v39 = vmul.f32 %v3930_v37, %v393_v38 }
 0x217   :  { %397 = vrot.lane.b32.xlu1 %v395_v39, %s4346_s5 }
 0x21b   :  { %356 = vperm.xlu1 %3914, %v3483_v40  }
 0x289   :  { %v398_v45 = vpop.permute.xlu1 %397 }
 0x28a   :  { %v4533_v46 = vadd.f32 %v398_v45, %v390_v44 }
 0x28c   :  { %3931 = vtanh.f32 %v4533_v46 }
 0x28d   :  { %3933 = vtanh.f32 %v338_v47 }
 0x28e   :  { %3935 = vpow2.f32 %v3484_v50 }
 0x296   :  { %v357_v55 = vpop.permute.xlu1 %356 }
 0x297   :  { %v4577_v31 = vmul.f32 %v4533_v46, %v357_v55  ;;  %v4602_v46 = vpop.f32.mrf.mxu0 }
 0x299   :  { %v3932_v48 = vpop.eup %3931  ;;  %v202_v47 = vpop.f32.mrf.mxu0 }
 0x29a   :  { %403 = vrot.lane.b32.xlu0 %v3932_v48, %s4347_s4  ;;  %v3934_v49 = vpop.eup %3933  ;;  %v4605_v48 = vadd.f32 %v4517_v29, %v202_v47 }
 0x29b   :  { %v3936_v51 = vpop.eup %3935 }
 0x29c   :  { %v362_v52 = vadd.f32 1.0, %v3936_v51 }
 0x29e   :  { %368 = vrot.lane.b32.xlu0 %v3934_v49, %s4345_s2  ;;  %3937 = vrcp.f32 %v362_v52 }
 0x2ab   :  { %v3938_v57 = vpop.eup %3937 }
 0x2ac   :  { %v366_v7 = vmul.f32 0.0, %v3938_v57 }
 0x30c   :  { %v404_v53 = vpop.permute.xlu0 %403 }
 0x30d   :  { %v406_v54 = vmul.f32 %v3930_v37, %v404_v53 }
 0x30f   :  { %v4539_v56 = vmul.f32 %v406_v54, %v357_v55 }
 0x310   :  { %v369_v58 = vpop.permute.xlu0 %368 }
 0x311   :  { %v371_v59 = vmul.f32 %v3938_v57, %v369_v58  ;;  %v474_v60 = vpack.c.bf16 %v4539_v56, %v4539_v56 }
 0x313   :  { %476 = vrot.lane.b32.xlu1 %v474_v60, %s4346_s5  ;;  %373 = vrot.lane.b32.xlu0 %v371_v59, %s4346_s5 }
 0x317   :  { %349 = vperm.xlu0 %3915, %v346_v61  }
 0x385   :  { %v477_v62 = vpop.permute.xlu1 %476  ;;  %v374_v5 = vpop.permute.xlu0 %373 }
 0x386   :  { %3699 = vmatmul.mubr.msk.bf16.vlgmr.msra.gmra.mxu1 %vm152_vm0, %v477_v62  ;;  %v4559_v10 = vadd.f32 %v374_v5, %v366_v7 }
 0x387   :  { %3709 = vmatpush3.bf16.msra.mxu1 %v4495_v16  ;;  %3710 = vmatprep.mubr.msk.bf16.mxu1 %vm4344_vm1, %v4343_v11 }
 0x388   :  { %3720 = vmatprep.subr.bf16.mxu1 %v4343_v11 }
 0x392   :  { %v350_v26 = vpop.permute.xlu0 %349 }
 0x446   :  { %v515_v63 = vpop.f32.mrf.mxu1 }
 0x447   :  { %527 = vrot.lane.b32.xlu1 %v515_v63, %s4336_s26  ;;  %v4618_v63 = vld [vmem:[%s5687_s1 + $0x8] sm:$0xff] }
 0x448   :  { %v3700_v1 = vpop.f32.mrf.mxu1 }
 0x449   :  { %v4622_v1 = vmul.f32 %v4559_v10, %v350_v26 }
 0x44a   :  { %v518_v2 = vpop.f32.mrf.mxu1 }
 0x44c   :  { %v3701_v3 = vpop.f32.mrf.mxu1 }
 0x4b9   :  { %v528_v6 = vpop.permute.xlu1 %527 }
 0x4ba   :  { %v530_v9 = vadd.f32 %v528_v6, %v4556_v4 }
 0x4bc   :  { %3939 = vtanh.f32 %v530_v9  ;;  %v3491_v14 = vmul.f32 -1.442695, %v530_v9 }
 0x4bd   :  { %3941 = vtanh.f32 %v4559_v10  ;;  %v4632_v10 = vadd.f32 %v4517_v29, %v4511_v20 }
 0x4be   :  { %3943 = vpow2.f32 %v3491_v14 }
 0x4c9   :  { %v3940_v12 = vpop.eup %3939 }
 0x4ca   :  { %578 = vrot.lane.b32.xlu1 %v3940_v12, %s4345_s2  ;;  %v3942_v13 = vpop.eup %3941 }
 0x4cb   :  { %v3944_v15 = vpop.eup %3943 }
 0x4cc   :  { %v572_v17 = vadd.f32 1.0, %v3944_v15 }
 0x4ce   :  { %379 = vrot.lane.b32.xlu1 %v3942_v13, %s4347_s4  ;;  %3945 = vrcp.f32 %v572_v17 }
 0x4db   :  { %v3946_v19 = vpop.eup %3945 }
 0x4dc   :  { %v576_v32 = vmul.f32 %v3946_v19, %v4577_v31 }
 0x53c   :  { %v579_v21 = vpop.permute.xlu1 %578 }
 0x53d   :  { %v581_v22 = vmul.f32 %v3946_v19, %v579_v21 }
 0x53f   :  { %583 = vrot.lane.b32.xlu1 %v581_v22, %s4346_s5 }
 0x540   :  { %v380_v23 = vpop.permute.xlu1 %379 }
 0x541   :  { %v382_v25 = vmul.f32 %v3938_v57, %v380_v23 }
 0x543   :  { %v4570_v27 = vmul.f32 %v382_v25, %v350_v26  ;;  %542 = vperm.xlu1 %3914, %v4568_v24  }
 0x545   :  { %v427_v28 = vpack.c.bf16 %v4570_v27, %v4570_v27 }
 0x547   :  { %429 = vrot.lane.b32.xlu0 %v427_v28, %s4348_s16  ;;  %v4652_v28 = vld [vmem:[%s5687_s1 + $0x28] sm:$0xff] }
 0x5b1   :  { %v584_v33 = vpop.permute.xlu1 %583 }
 0x5b2   :  { %v4580_v34 = vadd.f32 %v584_v33, %v576_v32 }
 0x5b4   :  { %3947 = vtanh.f32 %v4580_v34 }
 0x5b9   :  { %v430_v35 = vpop.permute.xlu0 %429 }
 0x5ba   :  { %3693 = vmatmul.mubr.msk.bf16.vlgmr.msra.gmra.mxu0 %vm152_vm0, %v430_v35 }
 0x5bb   :  { %3703 = vmatpush3.bf16.msra.mxu0 %v4467_v8  ;;  %3704 = vmatprep.mubr.msk.bf16.mxu0 %vm4344_vm1, %v4343_v11 }
 0x5bc   :  { %3714 = vmatprep.subr.bf16.mxu0 %v4343_v11 }
 0x5be   :  { %v4593_v40 = vpop.permute.xlu1 %542 }
 0x5c1   :  { %v3948_v36 = vpop.eup %3947 }
 0x5c2   :  { %589 = vrot.lane.b32.xlu0 %v3948_v36, %s4347_s4 }
 0x634   :  { %v590_v37 = vpop.permute.xlu0 %589 }
 0x635   :  { %v4589_v38 = vmul.f32 %v3946_v19, %v590_v37 }
 0x637   :  { %v613_v39 = vsub.f32 %v4589_v38, %v4539_v56 }
 0x639   :  { %v614_v42 = vmul.f32 %v613_v39, %v4593_v40 }
 0x63b   :  { %v4597_v44 = vadd.f32 %v614_v42, %v4539_v56 }
 0x63d   :  { %v666_v45 = vpack.c.bf16 %v4597_v44, %v4597_v44 }
 0x63f   :  { %668 = vrot.lane.b32.xlu1 %v666_v45, %s4346_s5  ;;  %v616_v45 = vsub.f32 %v4580_v34, %v4577_v31 }
 0x641   :  { %v617_v47 = vmul.f32 %v616_v45, %v4593_v40 }
 0x67a   :  { %v468_v49 = vpop.f32.mrf.mxu0 }
 0x67b   :  { %v523_v50 = vadd.f32 %v468_v49, %v4605_v48  ;;  %v4665_v49 = vadd.f32 %v617_v47, %v4577_v31 }
 0x67c   :  { %v3694_v51 = vpop.f32.mrf.mxu0 }
 0x67d   :  { %3949 = vtanh.f32 %v523_v50  ;;  %v3490_v57 = vmul.f32 -1.442695, %v523_v50 }
 0x67e   :  { %v471_v52 = vpop.f32.mrf.mxu0 }
 0x67f   :  { %3951 = vpow2.f32 %v3490_v57 }
 0x680   :  { %v3695_v53 = vpop.f32.mrf.mxu0 }
 0x68a   :  { %v3950_v54 = vpop.eup %3949 }
 0x68b   :  { %554 = vrot.lane.b32.xlu0 %v3950_v54, %s4345_s2  ;;  %v4674_v54 = vadd.f32 %v4528_v41, %v4517_v29 }
 0x68c   :  { %v3952_v58 = vpop.eup %3951 }
 0x68d   :  { %v548_v59 = vadd.f32 1.0, %v3952_v58 }
 0x68f   :  { %3953 = vrcp.f32 %v548_v59 }
 0x69c   :  { %v3954_v60 = vpop.eup %3953 }
 0x69d   :  { %v552_v2 = vmul.f32 %v3954_v60, %v4622_v1 }
 0x6b1   :  { %v669_v55 = vpop.permute.xlu1 %668 }
 0x6b2   :  { %3711 = vmatmul.mubr.msk.bf16.vlgmr.msra.gmra.mxu1 %vm152_vm0, %v669_v55 }
 0x6b3   :  { %3721 = vmatpush3.bf16.msra.mxu1 %v4495_v16  ;;  %3722 = vmatprep.mubr.msk.bf16.mxu1 %vm4344_vm1, %v4343_v11 }
 0x6b4   :  { %3732 = vmatprep.subr.bf16.mxu1 %v4343_v11 }
 0x6fd   :  { %v555_v61 = vpop.permute.xlu0 %554 }
 0x6fe   :  { %v557_v62 = vmul.f32 %v3954_v60, %v555_v61 }
 0x700   :  { %559 = vrot.lane.b32.xlu1 %v557_v62, %s4346_s5 }
 0x704   :  { %535 = vperm.xlu1 %3914, %v4618_v63  }
 0x772   :  { %v707_v3 = vpop.f32.mrf.mxu1  ;;  %v560_v5 = vpop.permute.xlu1 %559 }
 0x773   :  { %v4625_v6 = vadd.f32 %v560_v5, %v552_v2  ;;  %719 = vrot.lane.b32.xlu0 %v707_v3, %s4336_s26 }
 0x774   :  { %v3712_v7 = vpop.f32.mrf.mxu1 }
 0x775   :  { %3955 = vtanh.f32 %v4625_v6 }
 0x776   :  { %v710_v9 = vpop.f32.mrf.mxu1 }
 0x778   :  { %v3713_v12 = vpop.f32.mrf.mxu1 }
 0x77f   :  { %v4640_v23 = vpop.permute.xlu1 %535 }
 0x782   :  { %v3956_v13 = vpop.eup %3955 }
 0x783   :  { %565 = vrot.lane.b32.xlu0 %v3956_v13, %s4347_s4 }
 0x7e5   :  { %v720_v14 = vpop.permute.xlu0 %719 }
 0x7e6   :  { %v722_v15 = vadd.f32 %v720_v14, %v4632_v10 }
 0x7e8   :  { %3957 = vtanh.f32 %v722_v15  ;;  %v3497_v32 = vmul.f32 -1.442695, %v722_v15 }
 0x7ea   :  { %3959 = vpow2.f32 %v3497_v32 }
 0x7f5   :  { %v3958_v17 = vpop.eup %3957  ;;  %v566_v19 = vpop.permute.xlu0 %565 }
 0x7f6   :  { %v4635_v21 = vmul.f32 %v3954_v60, %v566_v19  ;;  %770 = vrot.lane.b32.xlu1 %v3958_v17, %s4345_s2  ;;  %v4681_v60 = vld [vmem:[%s5687_s1 + $0x10] sm:$0xff] }
 0x7f7   :  { %v3960_v33 = vpop.eup %3959 }
 0x7f8   :  { %v607_v22 = vsub.f32 %v4635_v21, %v4570_v27  ;;  %v764_v35 = vadd.f32 1.0, %v3960_v33 }
 0x7fa   :  { %v608_v25 = vmul.f32 %v607_v22, %v4640_v23  ;;  %3961 = vrcp.f32 %v764_v35 }
 0x7fc   :  { %v4644_v20 = vadd.f32 %v608_v25, %v4570_v27 }
 0x7fe   :  { %v619_v26 = vpack.c.bf16 %v4644_v20, %v4644_v20 }
 0x800   :  { %621 = vrot.lane.b32.xlu0 %v619_v26, %s4348_s16 }
 0x804   :  { %734 = vperm.xlu0 %3915, %v4652_v28  }
 0x807   :  { %v3962_v36 = vpop.eup %3961 }
 0x808   :  { %v768_v50 = vmul.f32 %v3962_v36, %v4665_v49 }
 0x868   :  { %v771_v37 = vpop.permute.xlu1 %770 }
 0x869   :  { %v773_v39 = vmul.f32 %v3962_v36, %v771_v37 }
 0x86b   :  { %775 = vrot.lane.b32.xlu1 %v773_v39, %s4346_s5 }
 0x872   :  { %v622_v42 = vpop.permute.xlu0 %621 }
 0x873   :  { %3705 = vmatmul.mubr.msk.bf16.vlgmr.msra.gmra.mxu0 %vm152_vm0, %v622_v42 }
 0x874   :  { %3715 = vmatpush3.bf16.msra.mxu0 %v4467_v8  ;;  %3716 = vmatprep.mubr.msk.bf16.mxu0 %vm4344_vm1, %v4343_v11 }
 0x875   :  { %3726 = vmatprep.subr.bf16.mxu0 %v4343_v11 }
 0x87f   :  { %v4688_v2 = vpop.permute.xlu0 %734 }
 0x8dd   :  { %v776_v51 = vpop.permute.xlu1 %775 }
 0x8de   :  { %v4668_v52 = vadd.f32 %v776_v51, %v768_v50 }
 0x8e0   :  { %3963 = vtanh.f32 %v4668_v52 }
 0x8ed   :  { %v3964_v53 = vpop.eup %3963 }
 0x8ee   :  { %781 = vrot.lane.b32.xlu1 %v3964_v53, %s4347_s4 }
 0x933   :  { %v660_v34 = vpop.f32.mrf.mxu0 }
 0x934   :  { %v715_v55 = vadd.f32 %v660_v34, %v4674_v54  ;;  %v4730_v34 = vadd.f32 %v4517_v29, %v4509_v18 }
 0x935   :  { %v3706_v57 = vpop.f32.mrf.mxu0 }
 0x936   :  { %3965 = vtanh.f32 %v715_v55  ;;  %v3496_v9 = vmul.f32 -1.442695, %v715_v55 }
 0x937   :  { %v663_v31 = vpop.f32.mrf.mxu0 }
 0x938   :  { %3967 = vpow2.f32 %v3496_v9 }
 0x939   :  { %v3707_v58 = vpop.f32.mrf.mxu0 }
 0x943   :  { %v3966_v59 = vpop.eup %3965 }
 0x944   :  { %746 = vrot.lane.b32.xlu1 %v3966_v59, %s4345_s2 }
 0x945   :  { %v3968_v12 = vpop.eup %3967 }
 0x946   :  { %v740_v13 = vadd.f32 1.0, %v3968_v12 }
 0x948   :  { %727 = vperm.xlu1 %3914, %v4681_v60   ;;  %3969 = vrcp.f32 %v740_v13 }
 0x955   :  { %v3970_v14 = vpop.eup %3969 }
 0x960   :  { %v782_v61 = vpop.permute.xlu1 %781 }
 0x961   :  { %v4684_v41 = vmul.f32 %v3962_v36, %v782_v61 }
 0x963   :  { %v805_v62 = vsub.f32 %v4684_v41, %v4597_v44 }
 0x965   :  { %v806_v3 = vmul.f32 %v805_v62, %v4688_v2 }
 0x967   :  { %v4692_v5 = vadd.f32 %v806_v3, %v4597_v44  ;;  %v610_v44 = vsub.f32 %v4625_v6, %v4622_v1 }
 0x969   :  { %v858_v7 = vpack.c.bf16 %v4692_v5, %v4692_v5  ;;  %v611_v22 = vmul.f32 %v610_v44, %v4640_v23 }
 0x96b   :  { %860 = vrot.lane.b32.xlu0 %v858_v7, %s4346_s5  ;;  %v4707_v25 = vadd.f32 %v611_v22, %v4622_v1 }
 0x96d   :  { %v744_v26 = vmul.f32 %v3970_v14, %v4707_v25 }
 0x9b6   :  { %v747_v15 = vpop.permute.xlu1 %746 }
 0x9b7   :  { %v749_v17 = vmul.f32 %v3970_v14, %v747_v15  ;;  %v808_v15 = vsub.f32 %v4668_v52, %v4665_v49 }
 0x9b9   :  { %751 = vrot.lane.b32.xlu0 %v749_v17, %s4346_s5  ;;  %v809_v17 = vmul.f32 %v808_v15, %v4688_v2 }
 0x9c3   :  { %v4719_v47 = vpop.permute.xlu1 %727 }
 0x9dd   :  { %v861_v19 = vpop.permute.xlu0 %860 }
 0x9de   :  { %3723 = vmatmul.mubr.msk.bf16.vlgmr.msra.gmra.mxu1 %vm152_vm0, %v861_v19  ;;  %v4750_v19 = vadd.f32 %v809_v17, %v4665_v49  ;;  %v3500_v49 = vld [vmem:[%s5687_s1 + $0x18] sm:$0xff] }
 0x9df   :  { %3733 = vmatpush3.bf16.msra.mxu1 %v4495_v16  ;;  %3734 = vmatprep.mubr.msk.bf16.mxu1 %vm4344_vm1, %v4343_v11 }
 0x9e0   :  { %3744 = vmatprep.subr.bf16.mxu1 %v4343_v11 }
 0xa2b   :  { %v752_v32 = vpop.permute.xlu0 %751 }
 0xa2c   :  { %v4710_v33 = vadd.f32 %v752_v32, %v744_v26  ;;  %v211_v26 = vadd.f32 %v4602_v46, %v4517_v29 }
 0xa2e   :  { %3971 = vtanh.f32 %v4710_v33 }
 0xa3b   :  { %v3972_v35 = vpop.eup %3971 }
 0xa3c   :  { %757 = vrot.lane.b32.xlu0 %v3972_v35, %s4347_s4 }
 0xa9e   :  { %v899_v36 = vpop.f32.mrf.mxu1 }
 0xa9f   :  { %911 = vrot.lane.b32.xlu1 %v899_v36, %s4336_s26 }
 0xaa0   :  { %v3724_v37 = vpop.f32.mrf.mxu1 }
 0xaa2   :  { %v902_v6 = vpop.f32.mrf.mxu1 }
 0xaa4   :  { %v3725_v39 = vpop.f32.mrf.mxu1 }
 0xaae   :  { %v758_v42 = vpop.permute.xlu0 %757 }
 0xaaf   :  { %v4715_v45 = vmul.f32 %v3970_v14, %v758_v42 }
 0xab1   :  { %v799_v1 = vsub.f32 %v4715_v45, %v4644_v20 }
 0xab3   :  { %v800_v50 = vmul.f32 %v799_v1, %v4719_v47 }
 0xab5   :  { %v4723_v51 = vadd.f32 %v800_v50, %v4644_v20  ;;  %v4737_v20 = vld [vmem:[%s5687_s1 + $0x20] sm:$0xff] }
 0xab7   :  { %v811_v53 = vpack.c.bf16 %v4723_v51, %v4723_v51 }
 0xab9   :  { %813 = vrot.lane.b32.xlu0 %v811_v53, %s4348_s16 }
 0xb11   :  { %v912_v55 = vpop.permute.xlu1 %911 }
 0xb12   :  { %v914_v57 = vadd.f32 %v912_v55, %v4730_v34 }
 0xb14   :  { %3973 = vtanh.f32 %v914_v57  ;;  %v3503_v18 = vmul.f32 -1.442695, %v914_v57 }
 0xb16   :  { %3975 = vpow2.f32 %v3503_v18  ;;  %v802_v18 = vsub.f32 %v4710_v33, %v4707_v25 }
 0xb21   :  { %v3974_v31 = vpop.eup %3973 }
 0xb22   :  { %962 = vrot.lane.b32.xlu1 %v3974_v31, %s4345_s2 }
 0xb23   :  { %v3976_v59 = vpop.eup %3975 }
 0xb24   :  { %v956_v61 = vadd.f32 1.0, %v3976_v59  ;;  %v803_v59 = vmul.f32 %v802_v18, %v4719_v47 }
 0xb26   :  { %926 = vperm.xlu1 %3914, %v4737_v20   ;;  %3977 = vrcp.f32 %v956_v61 }
 0xb2b   :  { %v814_v58 = vpop.permute.xlu0 %813 }
 0xb2c   :  { %3717 = vmatmul.mubr.msk.bf16.vlgmr.msra.gmra.mxu0 %vm152_vm0, %v814_v58 }
 0xb2d   :  { %3727 = vmatpush3.bf16.msra.mxu0 %v4467_v8  ;;  %3728 = vmatprep.mubr.msk.bf16.mxu0 %vm4344_vm1, %v4343_v11 }
 0xb2e   :  { %3738 = vmatprep.subr.bf16.mxu0 %v4343_v11 }
 0xb33   :  { %v3978_v62 = vpop.eup %3977 }
 0xb34   :  { %v960_v44 = vmul.f32 %v3978_v62, %v4750_v19 }
 0xb94   :  { %v963_v3 = vpop.permute.xlu1 %962 }
 0xb95   :  { %v965_v7 = vmul.f32 %v3978_v62, %v963_v3 }
 0xb97   :  { %967 = vrot.lane.b32.xlu0 %v965_v7, %s4346_s5 }
 0xba1   :  { %v4767_v1 = vpop.permute.xlu1 %926 }
 0xbec   :  { %v852_v9 = vpop.f32.mrf.mxu0 }
 0xbed   :  { %v907_v35 = vadd.f32 %v852_v9, %v211_v26 }
 0xbee   :  { %v3718_v12 = vpop.f32.mrf.mxu0 }
 0xbef   :  { %v3502_v37 = vmul.f32 -1.442695, %v907_v35 }
 0xbf0   :  { %v855_v13 = vpop.f32.mrf.mxu0 }
 0xbf2   :  { %v3719_v14 = vpop.f32.mrf.mxu0 }
 0xc09   :  { %v968_v22 = vpop.permute.xlu0 %967 }
 0xc0a   :  { %v4755_v32 = vadd.f32 %v968_v22, %v960_v44 }
 0xc0c   :  { %3979 = vtanh.f32 %v4755_v32 }
 0xc0d   :  { %3981 = vtanh.f32 %v907_v35 }
 0xc0e   :  { %3983 = vpow2.f32 %v3502_v37 }
 0xc19   :  { %v3980_v36 = vpop.eup %3979 }
 0xc1a   :  { %973 = vrot.lane.b32.xlu0 %v3980_v36, %s4347_s4  ;;  %v3982_v52 = vpop.eup %3981 }
 0xc1b   :  { %v3984_v29 = vpop.eup %3983 }
 0xc1c   :  { %v932_v46 = vadd.f32 1.0, %v3984_v29 }
 0xc1e   :  { %938 = vrot.lane.b32.xlu0 %v3982_v52, %s4345_s2  ;;  %3985 = vrcp.f32 %v932_v46 }
 0xc22   :  { %919 = vperm.xlu0 %3915, %v3500_v49  }
 0xc2b   :  { %v3986_v31 = vpop.eup %3985 }
 0xc8c   :  { %v974_v6 = vpop.permute.xlu0 %973 }
 0xc8d   :  { %v4763_v39 = vmul.f32 %v3978_v62, %v974_v6  ;;  %v4781_v62 = vadd.f32 %v803_v59, %v4707_v25 }
 0xc8f   :  { %v997_v42 = vsub.f32 %v4763_v39, %v4692_v5 }
 0xc90   :  { %v939_v57 = vpop.permute.xlu0 %938 }
 0xc91   :  { %v998_v50 = vmul.f32 %v997_v42, %v4767_v1  ;;  %v941_v58 = vmul.f32 %v3986_v31, %v939_v57 }
 0xc93   :  { %v4771_v53 = vadd.f32 %v998_v50, %v4692_v5  ;;  %v936_v5 = vmul.f32 %v3986_v31, %v4781_v62 }
 0xc95   :  { %v1050_v55 = vpack.c.bf16 %v4771_v53, %v4771_v53 }
 0xc97   :  { %1052 = vrot.lane.b32.xlu1 %v1050_v55, %s4346_s5 }
 0xc9b   :  { %943 = vrot.lane.b32.xlu1 %v941_v58, %s4346_s5 }
 0xc9d   :  { %v4797_v13 = vpop.permute.xlu0 %919 }
 0xd09   :  { %v1053_v61 = vpop.permute.xlu1 %1052 }
 0xd0a   :  { %3735 = vmatmul.mubr.msk.bf16.vlgmr.msra.gmra.mxu1 %vm152_vm0, %v1053_v61 }
 0xd0b   :  { %3745 = vmatpush3.bf16.msra.mxu1 %v4495_v16  ;;  %3746 = vmatprep.mubr.msk.bf16.mxu1 %vm4344_vm1, %v4343_v11 }
 0xd0c   :  { %3756 = vmatprep.subr.bf16.mxu1 %v4343_v11 }
 0xd0d   :  { %v944_v3 = vpop.permute.xlu1 %943 }
 0xd0e   :  { %v4789_v7 = vadd.f32 %v944_v3, %v936_v5 }
 0xd10   :  { %3987 = vtanh.f32 %v4789_v7 }
 0xd1d   :  { %v3988_v33 = vpop.eup %3987 }
 0xd1e   :  { %949 = vrot.lane.b32.xlu1 %v3988_v33, %s4347_s4 }
 0xd90   :  { %v950_v25 = vpop.permute.xlu1 %949 }
 0xd91   :  { %v4793_v9 = vmul.f32 %v3986_v31, %v950_v25 }
 0xd93   :  { %v991_v12 = vsub.f32 %v4793_v9, %v4723_v51 }
 0xd95   :  { %v992_v14 = vmul.f32 %v991_v12, %v4797_v13 }
 0xd97   :  { %v4801_v15 = vadd.f32 %v992_v14, %v4723_v51 }
 0xd99   :  { %v1003_v17 = vpack.c.bf16 %v4801_v15, %v4801_v15 }
 0xd9b   :  { %1005 = vrot.lane.b32.xlu0 %v1003_v17, %s4348_s16 }
 0xdca   :  { %v1091_v44 = vpop.f32.mrf.mxu1 }
 0xdcb   :  { %1101 = vrot.lane.b32.xlu1 %v1091_v44, %s4336_s26 }
 0xdcc   :  { %v3736_v22 = vpop.f32.mrf.mxu1 }
 0xdce   :  { %v1094_v35 = vpop.f32.mrf.mxu1 }
 0xdd0   :  { %v3737_v36 = vpop.f32.mrf.mxu1 }
 0xe0d   :  { %v1006_v52 = vpop.permute.xlu0 %1005 }
 0xe0e   :  { %3729 = vmatmul.mubr.msk.bf16.vlgmr.msra.gmra.mxu0 %vm152_vm0, %v1006_v52 }
 0xe0f   :  { %3739 = vmatpush3.bf16.msra.mxu0 %v4467_v8  ;;  %3740 = vmatprep.mubr.msk.bf16.mxu0 %vm4344_vm1, %v4343_v11 }
 0xe10   :  { %3750 = vmatprep.subr.bf16.mxu0 %v4343_v11 }
 0xe3d   :  { %v1102_v51 = vpop.permute.xlu1 %1101 }
 0xe3e   :  { %v1104_v37 = vadd.f32 %v1102_v51, %v211_v26  ;;  %v994_v51 = vsub.f32 %v4789_v7, %v4781_v62 }
 0xe40   :  { %3989 = vtanh.f32 %v1104_v37  ;;  %v3509_v46 = vmul.f32 -1.442695, %v1104_v37 }
 0xe42   :  { %3991 = vpow2.f32 %v3509_v46  ;;  %v995_v46 = vmul.f32 %v994_v51, %v4797_v13 }
 0xe4d   :  { %v3990_v29 = vpop.eup %3989 }
 0xe4e   :  { %1150 = vrot.lane.b32.xlu0 %v3990_v29, %s4345_s2 }
 0xe4f   :  { %v3992_v6 = vpop.eup %3991 }
 0xe50   :  { %v1144_v42 = vadd.f32 1.0, %v3992_v6 }
 0xe52   :  { %1114 = vperm.xlu0 %3915, %v3500_v49   ;;  %3993 = vrcp.f32 %v1144_v42  ;;  %v1000_v49 = vsub.f32 %v4755_v32, %v4750_v19 }
 0xe54   :  { %v1001_v3 = vmul.f32 %v1000_v49, %v4767_v1 }
 0xe56   :  { %v4820_v33 = vadd.f32 %v1001_v3, %v4750_v19 }
 0xe5f   :  { %v3994_v50 = vpop.eup %3993 }
 0xe60   :  { %v1148_v25 = vmul.f32 %v3994_v50, %v4820_v33 }
 0xec0   :  { %v1151_v55 = vpop.permute.xlu0 %1150 }
 0xec1   :  { %v1153_v57 = vmul.f32 %v3994_v50, %v1151_v55  ;;  %v4844_v55 = vadd.f32 %v995_v46, %v4781_v62 }
 0xec3   :  { %1155 = vrot.lane.b32.xlu1 %v1153_v57, %s4346_s5 }
 0xecd   :  { %v4827_v32 = vpop.permute.xlu0 %1114 }
 0xece   :  { %v1044_v31 = vpop.f32.mrf.mxu0 }
 0xecf   :  { %v1098_v58 = vadd.f32 %v1044_v31, %v4730_v34 }
 0xed0   :  { %v3730_v18 = vpop.f32.mrf.mxu0 }
 0xed1   :  { %3995 = vtanh.f32 %v1098_v58  ;;  %v3508_v5 = vmul.f32 -1.442695, %v1098_v58 }
 0xed2   :  { %v1047_v26 = vpop.f32.mrf.mxu0 }
 0xed3   :  { %3997 = vpow2.f32 %v3508_v5 }
 0xed4   :  { %v3731_v59 = vpop.f32.mrf.mxu0 }
 0xede   :  { %v3996_v61 = vpop.eup %3995 }
 0xedf   :  { %1126 = vrot.lane.b32.xlu0 %v3996_v61, %s4345_s2 }
 0xee0   :  { %v3998_v14 = vpop.eup %3997 }
 0xee1   :  { %v1120_v17 = vadd.f32 1.0, %v3998_v14 }
 0xf35   :  { %v1156_v34 = vpop.permute.xlu1 %1155 }
 0xf36   :  { %v4823_v12 = vadd.f32 %v1156_v34, %v1148_v25 }
 0xf38   :  { %3999 = vtanh.f32 %v4823_v12 }
 0xf39   :  { %4001 = vrcp.f32 %v1120_v17 }
 0xf45   :  { %v4000_v44 = vpop.eup %3999 }
 0xf46   :  { %1161 = vrot.lane.b32.xlu1 %v4000_v44, %s4347_s4  ;;  %v4002_v22 = vpop.eup %4001 }
 0xf47   :  { %v1124_v7 = vmul.f32 %v4002_v22, %v4844_v55 }
 0xf51   :  { %v1127_v35 = vpop.permute.xlu0 %1126 }
 0xf52   :  { %v1129_v36 = vmul.f32 %v4002_v22, %v1127_v35 }
 0xf54   :  { %1131 = vrot.lane.b32.xlu0 %v1129_v36, %s4346_s5 }
 0xfb8   :  { %v1162_v19 = vpop.permute.xlu1 %1161 }
 0xfb9   :  { %v4830_v52 = vmul.f32 %v3994_v50, %v1162_v19 }
 0xfbb   :  { %v1183_v37 = vsub.f32 %v4830_v52, %v4771_v53 }
 0xfbd   :  { %v1184_v29 = vmul.f32 %v1183_v37, %v4827_v32 }
 0xfbf   :  { %v4839_v6 = vadd.f32 %v1184_v29, %v4771_v53 }
 0xfc1   :  { %v1236_v42 = vpack.c.bf16 %v4839_v6, %v4839_v6 }
 0xfc3   :  { %1238 = vrot.lane.b32.xlu1 %v1236_v42, %s4346_s5 }
 0xfc6   :  { %v1132_v50 = vpop.permute.xlu0 %1131 }
 0xfc7   :  { %v4848_v57 = vadd.f32 %v1132_v50, %v1124_v7  ;;  %1108 = vperm.xlu1 %3914, %v4737_v20  }
 0xfc9   :  { %4003 = vtanh.f32 %v4848_v57 }
 0xfd6   :  { %v4004_v31 = vpop.eup %4003 }
 0xfd7   :  { %1137 = vrot.lane.b32.xlu0 %v4004_v31, %s4347_s4 }
0x1035   :  { %v1239_v53 = vpop.permute.xlu1 %1238 }
0x1036   :  { %3747 = vmatmul.mubr.msk.bf16.vlgmr.msra.gmra.mxu1 %vm152_vm0, %v1239_v53 }
0x1037   :  { %3757 = vmatpush3.bf16.msra.mxu1 %v4495_v16  ;;  %3758 = vmatprep.mubr.msk.bf16.mxu1 %vm4344_vm1, %v4343_v11 }
0x1038   :  { %3768 = vmatprep.subr.bf16.mxu1 %v4343_v11 }
0x1042   :  { %v4862_v18 = vpop.permute.xlu1 %1108 }
0x1049   :  { %v1138_v62 = vpop.permute.xlu0 %1137 }
0x104a   :  { %v4858_v58 = vmul.f32 %v4002_v22, %v1138_v62 }
0x104c   :  { %v1177_v20 = vsub.f32 %v4858_v58, %v4801_v15 }
0x104e   :  { %v1178_v26 = vmul.f32 %v1177_v20, %v4862_v18  ;;  %v1186_v20 = vsub.f32 %v4823_v12, %v4820_v33 }
0x1050   :  { %v4866_v59 = vadd.f32 %v1178_v26, %v4801_v15  ;;  %v1187_v26 = vmul.f32 %v1186_v20, %v4827_v32 }
0x1052   :  { %v1189_v61 = vpack.c.bf16 %v4866_v59, %v4866_v59 }
0x1054   :  { %1191 = vrot.lane.b32.xlu1 %v1189_v61, %s4348_s16  ;;  %v4889_v61 = vadd.f32 %v1187_v26, %v4820_v33 }
0x10c6   :  { %v1192_v49 = vpop.permute.xlu1 %1191 }
0x10c7   :  { %3741 = vmatmul.mubr.msk.bf16.vlgmr.msra.gmra.mxu0 %vm152_vm0, %v1192_v49 }
0x10c8   :  { %3751 = vmatpush3.bf16.msra.mxu0 %v4467_v8  ;;  %3752 = vmatprep.mubr.msk.bf16.mxu0 %vm4344_vm1, %v4343_v11 }
0x10c9   :  { %3762 = vmatprep.subr.bf16.mxu0 %v4343_v11 }
0x10f6   :  { %v1277_v5 = vpop.f32.mrf.mxu1 }
0x10f7   :  { %1287 = vrot.lane.b32.xlu0 %v1277_v5, %s4336_s26 }
0x10f8   :  { %v3748_v15 = vpop.f32.mrf.mxu1 }
0x10fa   :  { %v1280_v3 = vpop.f32.mrf.mxu1 }
0x10fc   :  { %v3749_v25 = vpop.f32.mrf.mxu1 }
0x1169   :  { %v1288_v34 = vpop.permute.xlu0 %1287 }
0x116a   :  { %v1290_v14 = vadd.f32 %v1288_v34, %v4674_v54 }
0x116c   :  { %4005 = vtanh.f32 %v1290_v14  ;;  %v3515_v51 = vmul.f32 -1.442695, %v1290_v14 }
0x1179   :  { %v4006_v17 = vpop.eup %4005 }
0x117a   :  { %1336 = vrot.lane.b32.xlu1 %v4006_v17, %s4345_s2 }
0x1187   :  { %v1230_v44 = vpop.f32.mrf.mxu0 }
0x1188   :  { %v1284_v8 = vadd.f32 %v1230_v44, %v4632_v10 }
0x1189   :  { %v3742_v22 = vpop.f32.mrf.mxu0 }
0x118a   :  { %4007 = vtanh.f32 %v1284_v8  ;;  %v3514_v54 = vmul.f32 -1.442695, %v1284_v8 }
0x118b   :  { %v1233_v35 = vpop.f32.mrf.mxu0  ;;  %4009 = vpow2.f32 %v3515_v51 }
0x118d   :  { %v3743_v36 = vpop.f32.mrf.mxu0 }
0x1197   :  { %v4008_v19 = vpop.eup %4007 }
0x1198   :  { %1312 = vrot.lane.b32.xlu1 %v4008_v19, %s4345_s2  ;;  %v4010_v37 = vpop.eup %4009 }
0x1199   :  { %v1330_v29 = vadd.f32 1.0, %v4010_v37 }
0x119b   :  { %4011 = vrcp.f32 %v1330_v29 }
0x119c   :  { %4013 = vpow2.f32 %v3514_v54 }
0x11a8   :  { %v4012_v46 = vpop.eup %4011 }
0x11a9   :  { %v4014_v10 = vpop.eup %4013 }
0x11aa   :  { %v1306_v50 = vadd.f32 1.0, %v4014_v10 }
0x11ac   :  { %4015 = vrcp.f32 %v1306_v50 }
0x11b9   :  { %v4016_v31 = vpop.eup %4015 }
0x11ec   :  { %v1337_v42 = vpop.permute.xlu1 %1336 }
0x11ed   :  { %v1339_v7 = vmul.f32 %v4012_v46, %v1337_v42  ;;  %v4181_v42 = vld [vmem:[#allocation8] sm:$0xff]  }
0x11ef   :  { %1341 = vrot.lane.b32.xlu0 %v1339_v7, %s4346_s5 }
0x11f3   :  { %1300 = vperm.xlu0 %3915, %v4681_v60   ;;  %v1334_v60 = vmul.f32 %v4012_v46, %v4889_v61 }
0x120a   :  { %v1313_v53 = vpop.permute.xlu1 %1312 }
0x120b   :  { %v1315_v62 = vmul.f32 %v4016_v31, %v1313_v53 }
0x120d   :  { %1317 = vrot.lane.b32.xlu0 %v1315_v62, %s4346_s5 }
0x1211   :  { %1294 = vperm.xlu0 %3915, %v4652_v28   ;;  %v1180_v28 = vsub.f32 %v4848_v57, %v4844_v55 }
0x1213   :  { %v1181_v12 = vmul.f32 %v1180_v28, %v4862_v18 }
0x1215   :  { %v4902_v33 = vadd.f32 %v1181_v12, %v4844_v55 }
0x1217   :  { %v1310_v34 = vmul.f32 %v4016_v31, %v4902_v33 }
0x1261   :  { %v1342_v49 = vpop.permute.xlu0 %1341 }
0x1262   :  { %v4892_v5 = vadd.f32 %v1342_v49, %v1334_v60 }
0x1264   :  { %4017 = vtanh.f32 %v4892_v5 }
0x126e   :  { %v4899_v3 = vpop.permute.xlu0 %1300 }
0x1271   :  { %v4018_v15 = vpop.eup %4017 }
0x1272   :  { %1347 = vrot.lane.b32.xlu1 %v4018_v15, %s4347_s4 }
0x127f   :  { %v1318_v25 = vpop.permute.xlu0 %1317 }
0x1280   :  { %v4905_v14 = vadd.f32 %v1318_v25, %v1310_v34 }
0x1282   :  { %4019 = vtanh.f32 %v4905_v14 }
0x128c   :  { %v4929_v37 = vpop.permute.xlu0 %1294 }
0x128f   :  { %v4020_v35 = vpop.eup %4019 }
0x12e4   :  { %v1348_v17 = vpop.permute.xlu1 %1347 }
0x12e5   :  { %v4908_v44 = vmul.f32 %v4012_v46, %v1348_v17 }
0x12e7   :  { %v1369_v57 = vsub.f32 %v4908_v44, %v4839_v6 }
0x12e9   :  { %v1370_v8 = vmul.f32 %v1369_v57, %v4899_v3 }
0x12eb   :  { %v4914_v22 = vadd.f32 %v1370_v8, %v4839_v6 }
0x12ed   :  { %v1422_v55 = vpack.c.bf16 %v4914_v22, %v4914_v22 }
0x12ef   :  { %1424 = vrot.lane.b32.xlu1 %v1422_v55, %s4346_s5 }
0x12f3   :  { %1323 = vrot.lane.b32.xlu1 %v4020_v35, %s4347_s4 }
0x1361   :  { %v1425_v36 = vpop.permute.xlu1 %1424 }
0x1362   :  { %3759 = vmatmul.mubr.msk.bf16.vlgmr.msra.gmra.mxu1 %vm152_vm0, %v1425_v36 }
0x1363   :  { %3769 = vmatpush3.bf16.msra.mxu1 %v4495_v16  ;;  %3770 = vmatprep.mubr.msk.bf16.mxu1 %vm4344_vm1, %v4343_v11 }
0x1364   :  { %3786 = vmatprep.subr.bf16.mxu1 %v4343_v11 }
0x1365   :  { %v1324_v6 = vpop.permute.xlu1 %1323 }
0x1366   :  { %v4925_v19 = vmul.f32 %v4016_v31, %v1324_v6 }
0x1368   :  { %v1363_v51 = vsub.f32 %v4925_v19, %v4866_v59 }
0x136a   :  { %v1364_v29 = vmul.f32 %v1363_v51, %v4929_v37 }
0x136c   :  { %v4933_v54 = vadd.f32 %v1364_v29, %v4866_v59 }
0x136e   :  { %v1375_v16 = vpack.c.bf16 %v4933_v54, %v4933_v54 }
0x1370   :  { %1377 = vrot.lane.b32.xlu0 %v1375_v16, %s4348_s16 }
0x13e2   :  { %v1378_v46 = vpop.permute.xlu0 %1377 }
0x13e3   :  { %3753 = vmatmul.mubr.msk.bf16.vlgmr.msra.gmra.mxu0 %vm152_vm0, %v1378_v46 }
0x13e4   :  { %3763 = vmatpush3.bf16.msra.mxu0 %v4181_v42  ;;  %3764 = vmatprep.mubr.msk.bf16.mxu0 %vm4344_vm1, %v4343_v11  ;;  %v1366_v42 = vsub.f32 %v4905_v14, %v4902_v33 }
0x1422   :  { %v1463_v7 = vpop.f32.mrf.mxu1 }
0x1423   :  { %1473 = vrot.lane.b32.xlu1 %v1463_v7, %s4336_s26  ;;  %v1367_v7 = vmul.f32 %v1366_v42, %v4929_v37 }
0x1424   :  { %v3760_v10 = vpop.f32.mrf.mxu1 }
0x1425   :  { %v4964_v10 = vadd.f32 %v1367_v7, %v4902_v33 }
0x1426   :  { %v1466_v50 = vpop.f32.mrf.mxu1 }
0x1428   :  { %v3761_v59 = vpop.f32.mrf.mxu1 }
0x1495   :  { %v1474_v31 = vpop.permute.xlu1 %1473 }
0x1496   :  { %v1476_v53 = vadd.f32 %v1474_v31, %v4605_v48 }
0x1498   :  { %4021 = vtanh.f32 %v1476_v53  ;;  %v3521_v12 = vmul.f32 -1.442695, %v1476_v53 }
0x14a3   :  { %v1416_v62 = vpop.f32.mrf.mxu0 }
0x14a4   :  { %v1470_v20 = vadd.f32 %v1416_v62, %v4556_v4 }
0x14a5   :  { %v4022_v26 = vpop.eup %4021  ;;  %v3754_v60 = vpop.f32.mrf.mxu0 }
0x14a6   :  { %4023 = vtanh.f32 %v1470_v20  ;;  %1522 = vrot.lane.b32.xlu0 %v4022_v26, %s4345_s2  ;;  %v3520_v48 = vmul.f32 -1.442695, %v1470_v20 }
0x14a7   :  { %v1419_v49 = vpop.f32.mrf.mxu0  ;;  %4025 = vpow2.f32 %v3521_v12 }
0x14a8   :  { %4027 = vpow2.f32 %v3520_v48 }
0x14a9   :  { %v3755_v15 = vpop.f32.mrf.mxu0 }
0x14b3   :  { %v4024_v28 = vpop.eup %4023 }
0x14b4   :  { %1498 = vrot.lane.b32.xlu0 %v4024_v28, %s4345_s2  ;;  %v4026_v25 = vpop.eup %4025 }
0x14b5   :  { %v1516_v4 = vadd.f32 1.0, %v4026_v25  ;;  %v4028_v34 = vpop.eup %4027 }
0x14b6   :  { %v1492_v17 = vadd.f32 1.0, %v4028_v34 }
0x14b7   :  { %4029 = vrcp.f32 %v1516_v4 }
0x14b8   :  { %1486 = vperm.xlu0 %3915, %v4618_v63   ;;  %4031 = vrcp.f32 %v1492_v17 }
0x14bc   :  { %1480 = vperm.xlu0 %3915, %v4568_v24   ;;  %v1372_v24 = vsub.f32 %v4892_v5, %v4889_v61 }
0x14be   :  { %v1373_v6 = vmul.f32 %v1372_v24, %v4899_v3 }
0x14c0   :  { %v4954_v51 = vadd.f32 %v1373_v6, %v4889_v61 }
0x14c4   :  { %v4030_v57 = vpop.eup %4029 }
0x14c5   :  { %v4032_v35 = vpop.eup %4031  ;;  %v1520_v29 = vmul.f32 %v4030_v57, %v4954_v51 }
0x14c6   :  { %v1496_v5 = vmul.f32 %v4032_v35, %v4964_v10 }
0x1518   :  { %v1523_v8 = vpop.permute.xlu0 %1522 }
0x1519   :  { %v1525_v55 = vmul.f32 %v4030_v57, %v1523_v8 }
0x151b   :  { %1527 = vrot.lane.b32.xlu1 %v1525_v55, %s4346_s5 }
0x1526   :  { %v1499_v36 = vpop.permute.xlu0 %1498 }
0x1527   :  { %v1501_v63 = vmul.f32 %v4032_v35, %v1499_v36 }
0x1529   :  { %1503 = vrot.lane.b32.xlu1 %v1501_v63, %s4346_s5 }
0x1533   :  { %v4976_v62 = vpop.permute.xlu0 %1486 }
0x1537   :  { %v4985_v12 = vpop.permute.xlu0 %1480 }
0x158d   :  { %v1528_v16 = vpop.permute.xlu1 %1527 }
0x158e   :  { %v4957_v46 = vadd.f32 %v1528_v16, %v1520_v29 }
0x1590   :  { %4033 = vtanh.f32 %v4957_v46 }
0x159b   :  { %v1504_v50 = vpop.permute.xlu1 %1503 }
0x159c   :  { %v4967_v61 = vadd.f32 %v1504_v50, %v1496_v5 }
0x159d   :  { %v4034_v59 = vpop.eup %4033 }
0x159e   :  { %4035 = vtanh.f32 %v4967_v61  ;;  %1533 = vrot.lane.b32.xlu1 %v4034_v59, %s4347_s4 }
0x15ab   :  { %v4036_v31 = vpop.eup %4035 }
0x15ac   :  { %1509 = vrot.lane.b32.xlu1 %v4036_v31, %s4347_s4 }
0x1610   :  { %v1534_v53 = vpop.permute.xlu1 %1533 }
0x1611   :  { %v4972_v14 = vmul.f32 %v4030_v57, %v1534_v53 }
0x1613   :  { %v1555_v33 = vsub.f32 %v4972_v14, %v4914_v22 }
0x1615   :  { %v1556_v20 = vmul.f32 %v1555_v33, %v4976_v62 }
0x1617   :  { %v1557_v26 = vadd.f32 %v1556_v20, %v4914_v22 }
0x1619   :  { %v1608_v60 = vpack.c.bf16 %v1557_v26, %v1557_v26 }
0x161b   :  { %1610 = vrot.lane.b32.xlu0 %v1608_v60, %s4346_s5 }
0x161e   :  { %v1510_v49 = vpop.permute.xlu1 %1509 }
0x161f   :  { %v4981_v15 = vmul.f32 %v4032_v35, %v1510_v49  ;;  %v5010_v49 = vld [vmem:[%s5687_s1] sm:$0xff] }
0x1621   :  { %v1549_v28 = vsub.f32 %v4981_v15, %v4933_v54 }
0x1623   :  { %v1550_v48 = vmul.f32 %v1549_v28, %v4985_v12  ;;  %v5016_v28 = vld [vmem:[%s5687_s1 + $0x38] sm:$0xff] }
0x1625   :  { %v1551_v25 = vadd.f32 %v1550_v48, %v4933_v54  ;;  %v785_v48 = vmul.f32 %v4715_v45, %v4719_v47  ;;  %v1537_v45 = vmul.f32 %v4981_v15, %v4985_v12  ;;  %v1558_v47 = vsub.f32 %v4957_v46, %v4954_v51 }
0x1627   :  { %v1561_v4 = vpack.c.bf16 %v1551_v25, %v1551_v25  ;;  %v1543_v25 = vmul.f32 %v4972_v14, %v4976_v62 }
0x1629   :  { %1563 = vrot.lane.b32.xlu1 %v1561_v4, %s4348_s16  ;;  %v1171_v4 = vmul.f32 %v4830_v52, %v4827_v32 }
0x168d   :  { %v1611_v34 = vpop.permute.xlu0 %1610 }
0x168e   :  { %3771 = vmatmul.mubr.msk.bf16.vlgmr.msra.gmra.mxu1 %vm152_vm0, %v1611_v34  ;;  %v792_v34 = vmul.f32 %v4684_v41, %v4688_v2  ;;  %v1552_v41 = vsub.f32 %v4967_v61, %v4964_v10  ;;  %v1559_v2 = vmul.f32 %v1558_v47, %v4976_v62 }
0x168f   :  { %3788 = vmatprep.mubr.msk.bf16.mxu1 %vm4344_vm1, %v4343_v11 }
0x1690   :  { %v1560_v32 = vadd.f32 %v1559_v2, %v4954_v51 }
0x169b   :  { %v1564_v22 = vpop.permute.xlu1 %1563 }
0x169c   :  { %3765 = vmatmul.mubr.msk.bf16.vlgmr.msra.gmra.mxu0 %vm152_vm0, %v1564_v22 }
0x174e   :  { %v1649_v17 = vpop.f32.mrf.mxu1 }
0x174f   :  { %1659 = vrot.lane.b32.xlu0 %v1649_v17, %s4336_s26 }
0x1750   :  { %v3772_v57 = vpop.f32.mrf.mxu1 }
0x1751   :  { %v593_v57 = vmul.f32 %v4635_v21, %v4640_v23  ;;  %v1357_v21 = vmul.f32 %v4908_v44, %v4899_v3  ;;  %v3921_v3 = vld [vmem:[%s5692_s6 + $0x8] sm:$0xff]   ;;  %v3922_v44 = vld [vmem:[%s5692_s6] sm:$0xff]  }
0x1752   :  { %v1652_v8 = vpop.f32.mrf.mxu1  ;;  %3774 = vmatprep.subr.bf16.mxu0 %v3921_v3 }
0x1753   :  { %3775 = vmatpush3.bf16.msra.mxu0 %v3921_v3 }
0x1754   :  { %v3773_v55 = vpop.f32.mrf.mxu1  ;;  %3776 = vmatprep.subr.bf16.mxu0 %v3922_v44 }
0x1755   :  { %v5064_v55 = vld [vmem:[#allocation13] sm:$0xff]  }
0x1757   :  { %3777 = vmatpush3.bf16.msra.mxu0 %v3922_v44 }
0x1758   :  { %3798 = vmatprep.subr.bf16.mxu0 %v4343_v11 }
0x175c   :  { %v1602_v35 = vpop.f32.mrf.mxu0 }
0x175d   :  { %v1656_v54 = vadd.f32 %v1602_v35, %v4520_v30  ;;  %v977_v35 = vmul.f32 %v4793_v9, %v4797_v13  ;;  %v984_v9 = vmul.f32 %v4763_v39, %v4767_v1 }
0x175e   :  { %v3766_v36 = vpop.f32.mrf.mxu0 }
0x175f   :  { %4037 = vtanh.f32 %v1656_v54  ;;  %v3525_v29 = vmul.f32 -1.442695, %v1656_v54 }
0x1760   :  { %v1605_v63 = vpop.f32.mrf.mxu0 }
0x1761   :  { %4039 = vpow2.f32 %v3525_v29  ;;  %v1351_v29 = vmul.f32 %v4925_v19, %v4929_v37 }
0x1762   :  { %v3767_v24 = vpop.f32.mrf.mxu0 }
0x1763   :  { %v600_v24 = vmul.f32 %v4589_v38, %v4593_v40 }
0x176c   :  { %v4038_v6 = vpop.eup %4037 }
0x176d   :  { %1684 = vrot.lane.b32.xlu0 %v4038_v6, %s4345_s2 }
0x176e   :  { %v4040_v7 = vpop.eup %4039 }
0x176f   :  { %v1678_v5 = vadd.f32 1.0, %v4040_v7 }
0x17c1   :  { %v1660_v16 = vpop.permute.xlu0 %1659 }
0x17c2   :  { %v1662_v42 = vadd.f32 %v1660_v16, %v4531_v43 }
0x17c4   :  { %4041 = vtanh.f32 %v1662_v42  ;;  %v3526_v53 = vmul.f32 -1.442695, %v1662_v42 }
0x17c5   :  { %4043 = vrcp.f32 %v1678_v5 }
0x17c6   :  { %4045 = vpow2.f32 %v3526_v53 }
0x17d1   :  { %v4042_v50 = vpop.eup %4041 }
0x17d2   :  { %1708 = vrot.lane.b32.xlu1 %v4042_v50, %s4345_s2  ;;  %v4999_v30 = vpop.eup %4043 }
0x17d3   :  { %v4046_v33 = vpop.eup %4045 }
0x17d4   :  { %v1702_v20 = vadd.f32 1.0, %v4046_v33 }
0x17d6   :  { %4047 = vrcp.f32 %v1702_v20 }
0x17df   :  { %v1685_v59 = vpop.permute.xlu0 %1684 }
0x17e0   :  { %v1687_v31 = vmul.f32 %v4999_v30, %v1685_v59 }
0x17e2   :  { %1689 = vrot.lane.b32.xlu0 %v1687_v31, %s4346_s5 }
0x17e3   :  { %v5003_v43 = vpop.eup %4047 }
0x1844   :  { %v1709_v26 = vpop.permute.xlu1 %1708 }
0x1845   :  { %v1711_v60 = vmul.f32 %v5003_v43, %v1709_v26 }
0x1847   :  { %1713 = vrot.lane.b32.xlu1 %v1711_v60, %s4346_s5 }
0x184b   :  { %1672 = vperm.xlu1 %3914, %v5010_v49  }
0x184f   :  { %1666 = vperm.xlu1 %3914, %v5016_v28  }
0x1853   :  { %409 = vrot.lane.b32.xlu1 %v4570_v27, %s4348_s16  ;;  %v1165_v27 = vmul.f32 %v4858_v58, %v4862_v18  ;;  %v1706_v58 = vmul.f32 %v5003_v43, %v1560_v32 }
0x1854   :  { %v1690_v18 = vpop.permute.xlu0 %1689 }
0x1857   :  { %787 = vrot.lane.b32.xlu1 %v785_v48, %s4348_s16 }
0x185b   :  { %1545 = vrot.lane.b32.xlu1 %v1543_v25, %s4347_s4 }
0x185f   :  { %1173 = vrot.lane.b32.xlu1 %v1171_v4, %s4347_s4 }
0x1863   :  { %794 = vrot.lane.b32.xlu1 %v792_v34, %s4347_s4 }
0x1867   :  { %415 = vrot.lane.b32.xlu1 %v4539_v56, %s4347_s4  ;;  %v1553_v56 = vmul.f32 %v1552_v41, %v4985_v12  ;;  %v5052_v12 = vld [vmem:[#allocation11] sm:$0xff]  }
0x1868   :  { %3787 = vmatpush3.bf16.msra.mxu1 %v5052_v12 }
0x1869   :  { %v1554_v52 = vadd.f32 %v1553_v56, %v4964_v10  ;;  %3792 = vmatprep.subr.bf16.mxu1 %v4343_v11 }
0x186b   :  { %1167 = vrot.lane.b32.xlu1 %v1165_v27, %s4348_s16  ;;  %v1682_v15 = vmul.f32 %v4999_v30, %v1554_v52  ;;  %3789 = vmatmul.mubr.bf16.vlgmr.msra.gmra.mxu1 %v4342_v0 }
0x186c   :  { %3794 = vmatprep.mubr.msk.bf16.mxu1 %vm4344_vm1, %v4343_v11  ;;  %3793 = vmatpush3.bf16.msra.mxu1 %v5064_v55 }
0x186d   :  { %v1692_v17 = vadd.f32 %v1690_v18, %v1682_v15  ;;  %3804 = vmatprep.subr.bf16.mxu1 %v4343_v11  ;;  %v5128_v18 = vld [vmem:[%s5695_s9] ss:$0 sm:$0xff] }
0x186f   :  { %1539 = vrot.lane.b32.xlu1 %v1537_v45, %s4348_s16 }
0x1873   :  { %3795 = vmatmul.mubr.bf16.vlgmr.msra.gmra.mxu1 %v4342_v0 }
0x1874   :  { %3805 = vmatpush3.bf16.msra.mxu1 %v5064_v55  ;;  %3806 = vmatprep.mubr.msk.bf16.mxu1 %vm4344_vm1, %v4343_v11 }
0x1875   :  { %3816 = vmatprep.subr.bf16.mxu1 %v4343_v11 }
0x18b9   :  { %v1714_v14 = vpop.permute.xlu1 %1713 }
0x18ba   :  { %v1716_v22 = vadd.f32 %v1714_v14, %v1706_v58 }
0x18bc   :  { %4049 = vtanh.f32 %v1716_v22 }
0x18bd   :  { %4051 = vtanh.f32 %v1692_v17 }
0x18c6   :  { %v1673_v46 = vpop.permute.xlu1 %1672 }
0x18c9   :  { %v4050_v61 = vpop.eup %4049 }
0x18ca   :  { %1719 = vrot.lane.b32.xlu0 %v4050_v61, %s4347_s4  ;;  %v1667_v62 = vpop.permute.xlu1 %1666  ;;  %v4052_v51 = vpop.eup %4051 }
0x18ce   :  { %1695 = vrot.lane.b32.xlu0 %v4052_v51, %s4347_s4  ;;  %v410_v10 = vpop.permute.xlu1 %409 }
0x18cf   :  { %412 = vst.msk [vmem:[#allocation2] sm:$0xff] %vm152_vm0, %v410_v10 }
0x18d2   :  { %595 = vrot.lane.b32.xlu0 %v593_v57, %s4348_s16  ;;  %v788_v8 = vpop.permute.xlu1 %787 }
0x18d3   :  { %791 = vst.msk [vmem:[#allocation2 + $0x10] sm:$0xff] %vm152_vm0, %v788_v8 }
0x18d6   :  { %v1546_v54 = vpop.permute.xlu1 %1545  ;;  %979 = vrot.lane.b32.xlu0 %v977_v35, %s4348_s16 }
0x18da   :  { %v1174_v23 = vpop.permute.xlu1 %1173  ;;  %1359 = vrot.lane.b32.xlu0 %v1357_v21, %s4347_s4 }
0x18de   :  { %v795_v13 = vpop.permute.xlu1 %794  ;;  %986 = vrot.lane.b32.xlu0 %v984_v9, %s4347_s4 }
0x18df   :  { %798 = vst.msk [vmem:[#allocation2 + $0x28] sm:$0xff] %vm419_vm2, %v795_v13 }
0x18e2   :  { %v416_v0 = vpop.permute.xlu1 %415 }
0x18e3   :  { %420 = vst.msk [vmem:[#allocation2 + $0x38] sm:$0xff] %vm419_vm2, %v416_v0 }
0x18e6   :  { %v1168_v5 = vpop.permute.xlu1 %1167 }
0x18ea   :  { %v1540_v26 = vpop.permute.xlu1 %1539 }
0x192b   :  { %v5109_v19 = vpop.f32.mrf.mxu1 }
0x192d   :  { %v3790_v37 = vpop.f32.mrf.mxu1 }
0x192f   :  { %v1903_v50 = vpop.f32.mrf.mxu1 }
0x193c   :  { %v1720_v39 = vpop.permute.xlu0 %1719 }
0x193d   :  { %v1722_v1 = vmul.f32 %v5003_v43, %v1720_v39 }
0x193f   :  { %v1729_v36 = vmul.f32 %v1722_v1, %v1673_v46 }
0x1940   :  { %v1696_v63 = vpop.permute.xlu0 %1695 }
0x1941   :  { %1731 = vrot.lane.b32.xlu0 %v1729_v36, %s4347_s4  ;;  %v1698_v16 = vmul.f32 %v4999_v30, %v1696_v63  ;;  %v3791_v30 = vpop.f32.mrf.mxu1 }
0x1943   :  { %v1723_v38 = vmul.f32 %v1698_v16, %v1667_v62  ;;  %v1946_v59 = vpop.f32.mrf.mxu1 }
0x1944   :  { %v596_v6 = vpop.permute.xlu0 %595  ;;  %1956 = vrot.lane.b32.xlu1 %v1946_v59, %s4336_s26 }
0x1945   :  { %599 = vst.msk [vmem:[#allocation2 + $0x8] sm:$0xff] %vm152_vm0, %v596_v6  ;;  %602 = vrot.lane.b32.xlu0 %v600_v24, %s4347_s4  ;;  %v3796_v31 = vpop.f32.mrf.mxu1 }
0x1946   :  { %1548 = vst.msk [vmem:[#allocation2 + $0x8] sm:$0xff] %vm419_vm2, %v1546_v54 }
0x1947   :  { %v1949_v53 = vpop.f32.mrf.mxu1 }
0x1948   :  { %v980_v42 = vpop.permute.xlu0 %979 }
0x1949   :  { %983 = vst.msk [vmem:[#allocation2 + $0x18] sm:$0xff] %vm152_vm0, %v980_v42  ;;  %1353 = vrot.lane.b32.xlu0 %v1351_v29, %s4348_s16  ;;  %v3797_v33 = vpop.f32.mrf.mxu1 }
0x194a   :  { %1176 = vst.msk [vmem:[#allocation2 + $0x18] sm:$0xff] %vm419_vm2, %v1174_v23 }
0x194c   :  { %v1360_v40 = vpop.permute.xlu0 %1359 }
0x194d   :  { %1362 = vst.msk [vmem:[#allocation2 + $0x10] sm:$0xff] %vm419_vm2, %v1360_v40  ;;  %1725 = vrot.lane.b32.xlu0 %v1723_v38, %s4348_s16  ;;  %v1736_v4 = vld [vmem:[#allocation2 + $0x8] sm:$0xff] }
0x1950   :  { %v987_v7 = vpop.permute.xlu0 %986 }
0x1951   :  { %990 = vst.msk [vmem:[#allocation2 + $0x20] sm:$0xff] %vm419_vm2, %v987_v7  ;;  %v1738_v27 = vld [vmem:[#allocation2 + $0x18] sm:$0xff] }
0x1952   :  { %1170 = vst.msk [vmem:[#allocation2 + $0x20] sm:$0xff] %vm152_vm0, %v1168_v5 }
0x1954   :  { %v1737_v60 = vld [vmem:[#allocation2 + $0x10] sm:$0xff] }
0x1955   :  { %v1744_v45 = vpack.c.bf16 %v1738_v27, %v1737_v60 }
0x1959   :  { %v1739_v41 = vld [vmem:[#allocation2 + $0x20] sm:$0xff] }
0x19b3   :  { %v1732_v20 = vpop.permute.xlu0 %1731 }
0x19b4   :  { %1734 = vst.msk [vmem:[#allocation2] sm:$0xff] %vm419_vm2, %v1732_v20 }
0x19b6   :  { %v1957_v21 = vpop.permute.xlu1 %1956 }
0x19b7   :  { %v603_v43 = vpop.permute.xlu0 %602 }
0x19b8   :  { %606 = vst.msk [vmem:[#allocation2 + $0x30] sm:$0xff] %vm419_vm2, %v603_v43 }
0x19b9   :  { %1542 = vst.msk [vmem:[#allocation2 + $0x30] sm:$0xff] %vm152_vm0, %v1540_v26 }
0x19bb   :  { %v1354_v48 = vpop.permute.xlu0 %1353  ;;  %v1735_v25 = vld [vmem:[#allocation2] sm:$0xff] }
0x19bc   :  { %1356 = vst.msk [vmem:[#allocation2 + $0x28] sm:$0xff] %vm152_vm0, %v1354_v48  ;;  %v1743_v34 = vpack.c.bf16 %v1736_v4, %v1735_v25 }
0x19be   :  { %3778 = vmatprep.mubr.msk.bf16.mxu0 %vm1770_vm3, %v1743_v34 }
0x19bf   :  { %3779 = vmatmul.mubr.msk.bf16.vlgmr.msra.gmra.mxu0 %vm1770_vm3, %v1744_v45  ;;  %v1726_v47 = vpop.permute.xlu0 %1725 }
0x19c0   :  { %1728 = vst.msk [vmem:[#allocation2 + $0x38] sm:$0xff] %vm152_vm0, %v1726_v47  ;;  %3799 = vmatpush3.bf16.msra.mxu0 %v5052_v12  ;;  %v1741_v32 = vld [vmem:[#allocation2 + $0x30] sm:$0xff] }
0x19c1   :  { %3810 = vmatprep.subr.bf16.mxu0 %v4343_v11 }
0x19c3   :  { %v1740_v2 = vld [vmem:[#allocation2 + $0x28] sm:$0xff] }
0x19c4   :  { %v1745_v56 = vpack.c.bf16 %v1740_v2, %v1739_v41 }
0x19c6   :  { %3782 = vmatprep.mubr.msk.bf16.mxu0 %vm1770_vm3, %v1745_v56 }
0x19c7   :  { %v1742_v52 = vld [vmem:[#allocation2 + $0x38] sm:$0xff] }
0x19c8   :  { %v1746_v58 = vpack.c.bf16 %v1742_v52, %v1741_v32 }
0x19ca   :  { %3783 = vmatmul.mubr.msk.bf16.gmra.mxu0 %vm1770_vm3, %v1746_v58  ;;  %v5182_v58 = vld [vmem:[%s5687_s1 + $0x30] sm:$0xff] }
0x19cb   :  { %3800 = vmatprep.mubr.msk.bf16.mxu0 %vm4344_vm1, %v4343_v11 }
0x1a7f   :  { %v3780_v14 = vpop.f32.mrf.mxu0 }
0x1a80   :  { %v5131_v15 = vadd.f32 %v3780_v14, %v5128_v18 }
0x1a81   :  { %v1817_v22 = vpop.f32.mrf.mxu0 }
0x1a82   :  { %v5134_v17 = vadd.f32 %v5128_v18, %v1817_v22 }
0x1a83   :  { %v3781_v46 = vpop.f32.mrf.mxu0 }
0x1a84   :  { %v5137_v61 = vadd.f32 %v3781_v46, %v5128_v18  ;;  %v1953_v29 = vadd.f32 %v5109_v19, %v5134_v17 }
0x1a85   :  { %v1820_v62 = vpop.f32.mrf.mxu0 }
0x1a86   :  { %v5140_v51 = vadd.f32 %v5128_v18, %v1820_v62  ;;  %v3537_v42 = vmul.f32 -1.442695, %v1953_v29 }
0x1a8a   :  { %v3784_v10 = vpop.f32.mrf.mxu0 }
0x1a8b   :  { %v5143_v57 = vadd.f32 %v3784_v10, %v5128_v18 }
0x1a8c   :  { %v1833_v8 = vpop.f32.mrf.mxu0 }
0x1a8d   :  { %v5146_v35 = vadd.f32 %v5128_v18, %v1833_v8 }
0x1a8e   :  { %v3785_v54 = vpop.f32.mrf.mxu0 }
0x1a8f   :  { %v5149_v23 = vadd.f32 %v3785_v54, %v5128_v18 }
0x1a91   :  { %v1959_v9 = vadd.f32 %v1957_v21, %v5149_v23 }
0x1a93   :  { %4053 = vtanh.f32 %v1959_v9  ;;  %v3538_v0 = vmul.f32 -1.442695, %v1959_v9 }
0x1a95   :  { %4055 = vpow2.f32 %v3538_v0 }
0x1aa0   :  { %v4054_v13 = vpop.eup %4053 }
0x1aa1   :  { %2005 = vrot.lane.b32.xlu0 %v4054_v13, %s4345_s2 }
0x1aa2   :  { %v4056_v3 = vpop.eup %4055 }
0x1aa3   :  { %v1999_v44 = vadd.f32 1.0, %v4056_v3 }
0x1aa5   :  { %1969 = vperm.xlu0 %3915, %v5016_v28   ;;  %4057 = vrcp.f32 %v1999_v44 }
0x1ab2   :  { %v4058_v39 = vpop.eup %4057 }
0x1ab3   :  { %v2003_v63 = vmul.f32 0.0, %v4058_v39 }
0x1b13   :  { %v2006_v1 = vpop.permute.xlu0 %2005 }
0x1b14   :  { %v2008_v36 = vmul.f32 %v4058_v39, %v2006_v1 }
0x1b16   :  { %2010 = vrot.lane.b32.xlu1 %v2008_v36, %s4346_s5 }
0x1b20   :  { %v1970_v37 = vpop.permute.xlu0 %1969 }
0x1b88   :  { %v2011_v24 = vpop.permute.xlu1 %2010 }
0x1b89   :  { %v2013_v6 = vadd.f32 %v2011_v24, %v2003_v63  ;;  %v1836_v24 = vpop.f32.mrf.mxu0 }
0x1b8b   :  { %4059 = vtanh.f32 %v2013_v6  ;;  %v5190_v10 = vmul.f32 %v2013_v6, %v1970_v37 }
0x1b8c   :  { %4061 = vtanh.f32 %v1953_v29 }
0x1b8d   :  { %4063 = vpow2.f32 %v3537_v42 }
0x1b98   :  { %v4060_v16 = vpop.eup %4059 }
0x1b99   :  { %2016 = vrot.lane.b32.xlu1 %v4060_v16, %s4347_s4  ;;  %v4062_v28 = vpop.eup %4061 }
0x1b9a   :  { %v4064_v38 = vpop.eup %4063 }
0x1b9b   :  { %v1975_v40 = vadd.f32 1.0, %v4064_v38 }
0x1b9d   :  { %1981 = vrot.lane.b32.xlu1 %v4062_v28, %s4345_s2  ;;  %4065 = vrcp.f32 %v1975_v40 }
0x1baa   :  { %v4066_v30 = vpop.eup %4065 }
0x1bab   :  { %v1979_v25 = vmul.f32 0.0, %v4066_v30 }
0x1c0b   :  { %v2017_v7 = vpop.permute.xlu1 %2016 }
0x1c0c   :  { %v2019_v5 = vmul.f32 %v4058_v39, %v2017_v7 }
0x1c0e   :  { %v5159_v50 = vmul.f32 %v2019_v5, %v1970_v37 }
0x1c0f   :  { %v1982_v19 = vpop.permute.xlu1 %1981 }
0x1c10   :  { %v1984_v59 = vmul.f32 %v4066_v30, %v1982_v19  ;;  %v2086_v31 = vpack.c.bf16 %v5159_v50, %v5159_v50 }
0x1c12   :  { %2088 = vrot.lane.b32.xlu0 %v2086_v31, %s4346_s5  ;;  %1986 = vrot.lane.b32.xlu1 %v1984_v59, %s4346_s5  ;;  %v5226_v31 = vld [vmem:[%s5687_s1 + $0x8] sm:$0xff] }
0x1c16   :  { %1963 = vperm.xlu1 %3914, %v5010_v49  }
0x1c84   :  { %v2089_v53 = vpop.permute.xlu0 %2088  ;;  %v1987_v60 = vpop.permute.xlu1 %1986 }
0x1c85   :  { %3807 = vmatmul.mubr.msk.bf16.vlgmr.msra.gmra.mxu1 %vm152_vm0, %v2089_v53  ;;  %v5173_v4 = vadd.f32 %v1987_v60, %v1979_v25 }
0x1c86   :  { %3817 = vmatpush3.bf16.msra.mxu1 %v5064_v55  ;;  %3818 = vmatprep.mubr.msk.bf16.mxu1 %vm4344_vm1, %v4343_v11 }
0x1c87   :  { %3828 = vmatprep.subr.bf16.mxu1 %v4343_v11 }
0x1c91   :  { %v1964_v22 = vpop.permute.xlu1 %1963 }
0x1c92   :  { %v5230_v53 = vmul.f32 %v5173_v4, %v1964_v22 }
0x1d45   :  { %v2127_v33 = vpop.f32.mrf.mxu1 }
0x1d46   :  { %2137 = vrot.lane.b32.xlu0 %v2127_v33, %s4336_s26 }
0x1d47   :  { %v3808_v20 = vpop.f32.mrf.mxu1 }
0x1d49   :  { %v2130_v43 = vpop.f32.mrf.mxu1 }
0x1d4b   :  { %v3809_v26 = vpop.f32.mrf.mxu1 }
0x1db8   :  { %v2138_v48 = vpop.permute.xlu0 %2137 }
0x1db9   :  { %v2140_v49 = vadd.f32 %v2138_v48, %v5143_v57 }
0x1dbb   :  { %4067 = vtanh.f32 %v2140_v49  ;;  %v3544_v45 = vmul.f32 -1.442695, %v2140_v49 }
0x1dbc   :  { %4069 = vtanh.f32 %v5173_v4 }
0x1dbd   :  { %4071 = vpow2.f32 %v3544_v45 }
0x1dc8   :  { %v4068_v34 = vpop.eup %4067 }
0x1dc9   :  { %2186 = vrot.lane.b32.xlu0 %v4068_v34, %s4345_s2  ;;  %v4070_v27 = vpop.eup %4069  ;;  %v5239_v34 = vadd.f32 %v5128_v18, %v1836_v24 }
0x1dca   :  { %v4072_v47 = vpop.eup %4071 }
0x1dcb   :  { %v2180_v41 = vadd.f32 1.0, %v4072_v47 }
0x1dcd   :  { %1992 = vrot.lane.b32.xlu0 %v4070_v27, %s4347_s4  ;;  %4073 = vrcp.f32 %v2180_v41 }
0x1dda   :  { %v4074_v2 = vpop.eup %4073 }
0x1ddb   :  { %v2184_v8 = vmul.f32 %v4074_v2, %v5190_v10 }
0x1e3b   :  { %v2187_v56 = vpop.permute.xlu0 %2186 }
0x1e3c   :  { %v2189_v32 = vmul.f32 %v4074_v2, %v2187_v56 }
0x1e3e   :  { %2191 = vrot.lane.b32.xlu1 %v2189_v32, %s4346_s5 }
0x1e3f   :  { %v1993_v52 = vpop.permute.xlu0 %1992 }
0x1e40   :  { %v1995_v14 = vmul.f32 %v4066_v30, %v1993_v52 }
0x1e42   :  { %v5184_v46 = vmul.f32 %v1995_v14, %v1964_v22  ;;  %2150 = vperm.xlu1 %3914, %v5182_v58   ;;  %v5259_v14 = vld [vmem:[%s5687_s1 + $0x28] sm:$0xff] }
0x1e44   :  { %v2039_v62 = vpack.c.bf16 %v5184_v46, %v5184_v46 }
0x1e46   :  { %2041 = vrot.lane.b32.xlu0 %v2039_v62, %s4348_s16 }
0x1eb0   :  { %v2192_v54 = vpop.permute.xlu1 %2191 }
0x1eb1   :  { %v5193_v21 = vadd.f32 %v2192_v54, %v2184_v8 }
0x1eb3   :  { %4075 = vtanh.f32 %v5193_v21 }
0x1eb8   :  { %v2042_v9 = vpop.permute.xlu0 %2041 }
0x1eb9   :  { %3801 = vmatmul.mubr.msk.bf16.vlgmr.msra.gmra.mxu0 %vm152_vm0, %v2042_v9 }
0x1eba   :  { %3811 = vmatpush3.bf16.msra.mxu0 %v5052_v12  ;;  %3812 = vmatprep.mubr.msk.bf16.mxu0 %vm4344_vm1, %v4343_v11 }
0x1ebb   :  { %3822 = vmatprep.subr.bf16.mxu0 %v4343_v11 }
0x1ebd   :  { %v5206_v39 = vpop.permute.xlu1 %2150 }
0x1ec0   :  { %v4076_v13 = vpop.eup %4075 }
0x1ec1   :  { %2197 = vrot.lane.b32.xlu0 %v4076_v13, %s4347_s4 }
0x1f33   :  { %v2198_v0 = vpop.permute.xlu0 %2197 }
0x1f34   :  { %v5202_v3 = vmul.f32 %v4074_v2, %v2198_v0 }
0x1f36   :  { %v2221_v44 = vsub.f32 %v5202_v3, %v5159_v50 }
0x1f38   :  { %v2222_v1 = vmul.f32 %v2221_v44, %v5206_v39  ;;  %v2224_v44 = vsub.f32 %v5193_v21, %v5190_v10 }
0x1f3a   :  { %v5210_v36 = vadd.f32 %v2222_v1, %v5159_v50  ;;  %v2225_v1 = vmul.f32 %v2224_v44, %v5206_v39 }
0x1f3c   :  { %v2274_v63 = vpack.c.bf16 %v5210_v36, %v5210_v36 }
0x1f3e   :  { %2276 = vrot.lane.b32.xlu1 %v2274_v63, %s4346_s5  ;;  %v5272_v63 = vadd.f32 %v2225_v1, %v5190_v10  ;;  %v5284_v10 = vld [vmem:[%s5687_s1 + $0x10] sm:$0xff] }
0x1f79   :  { %v2080_v6 = vpop.f32.mrf.mxu0 }
0x1f7a   :  { %v2134_v29 = vadd.f32 %v2080_v6, %v5140_v51 }
0x1f7b   :  { %v3802_v16 = vpop.f32.mrf.mxu0 }
0x1f7c   :  { %4077 = vtanh.f32 %v2134_v29  ;;  %v3543_v7 = vmul.f32 -1.442695, %v2134_v29 }
0x1f7d   :  { %v2083_v28 = vpop.f32.mrf.mxu0 }
0x1f7e   :  { %4079 = vpow2.f32 %v3543_v7 }
0x1f7f   :  { %v3803_v42 = vpop.f32.mrf.mxu0 }
0x1f89   :  { %v4078_v38 = vpop.eup %4077 }
0x1f8a   :  { %2162 = vrot.lane.b32.xlu0 %v4078_v38, %s4345_s2 }
0x1f8b   :  { %v4080_v5 = vpop.eup %4079 }
0x1f8c   :  { %v2156_v37 = vadd.f32 1.0, %v4080_v5 }
0x1f8e   :  { %4081 = vrcp.f32 %v2156_v37 }
0x1f9b   :  { %v4082_v30 = vpop.eup %4081 }
0x1f9c   :  { %v2160_v33 = vmul.f32 %v4082_v30, %v5230_v53 }
0x1fb0   :  { %v2277_v40 = vpop.permute.xlu1 %2276 }
0x1fb1   :  { %3819 = vmatmul.mubr.msk.bf16.vlgmr.msra.gmra.mxu1 %vm152_vm0, %v2277_v40 }
0x1fb2   :  { %3829 = vmatpush3.bf16.msra.mxu1 %v5064_v55  ;;  %3830 = vmatprep.mubr.msk.bf16.mxu1 %vm4344_vm1, %v4343_v11 }
0x1fb3   :  { %3840 = vmatprep.subr.bf16.mxu1 %v4343_v11 }
0x1ffc   :  { %v2163_v19 = vpop.permute.xlu0 %2162 }
0x1ffd   :  { %v2165_v59 = vmul.f32 %v4082_v30, %v2163_v19 }
0x1fff   :  { %2167 = vrot.lane.b32.xlu1 %v2165_v59, %s4346_s5 }
0x2003   :  { %2144 = vperm.xlu1 %3914, %v5226_v31  }
0x2071   :  { %v2315_v20 = vpop.f32.mrf.mxu1  ;;  %v2168_v43 = vpop.permute.xlu1 %2167 }
0x2072   :  { %v5233_v26 = vadd.f32 %v2168_v43, %v2160_v33  ;;  %2325 = vrot.lane.b32.xlu0 %v2315_v20, %s4336_s26 }
0x2073   :  { %v3820_v60 = vpop.f32.mrf.mxu1 }
0x2074   :  { %4083 = vtanh.f32 %v5233_v26 }
0x2075   :  { %v2318_v48 = vpop.f32.mrf.mxu1 }
0x2077   :  { %v3821_v25 = vpop.f32.mrf.mxu1 }
0x207e   :  { %v5247_v56 = vpop.permute.xlu1 %2144 }
0x2081   :  { %v4084_v49 = vpop.eup %4083 }
0x2082   :  { %2173 = vrot.lane.b32.xlu0 %v4084_v49, %s4347_s4 }
0x20e4   :  { %v2326_v4 = vpop.permute.xlu0 %2325 }
0x20e5   :  { %v2328_v27 = vadd.f32 %v2326_v4, %v5239_v34 }
0x20e7   :  { %4085 = vtanh.f32 %v2328_v27  ;;  %v3550_v22 = vmul.f32 -1.442695, %v2328_v27 }
0x20e9   :  { %4087 = vpow2.f32 %v3550_v22 }
0x20f4   :  { %v4086_v45 = vpop.eup %4085  ;;  %v2174_v47 = vpop.permute.xlu0 %2173 }
0x20f5   :  { %v5242_v41 = vmul.f32 %v4082_v30, %v2174_v47  ;;  %2374 = vrot.lane.b32.xlu1 %v4086_v45, %s4345_s2 }
0x20f6   :  { %v4088_v62 = vpop.eup %4087 }
0x20f7   :  { %v2215_v2 = vsub.f32 %v5242_v41, %v5184_v46  ;;  %v2368_v8 = vadd.f32 1.0, %v4088_v62 }
0x20f9   :  { %v2216_v32 = vmul.f32 %v2215_v2, %v5247_v56  ;;  %4089 = vrcp.f32 %v2368_v8 }
0x20fb   :  { %v5251_v18 = vadd.f32 %v2216_v32, %v5184_v46 }
0x20fd   :  { %v2227_v52 = vpack.c.bf16 %v5251_v18, %v5251_v18 }
0x20ff   :  { %2229 = vrot.lane.b32.xlu0 %v2227_v52, %s4348_s16 }
0x2103   :  { %2338 = vperm.xlu0 %3915, %v5259_v14  }
0x2106   :  { %v4090_v54 = vpop.eup %4089 }
0x2107   :  { %v2372_v24 = vmul.f32 %v4090_v54, %v5272_v63 }
0x2167   :  { %v2375_v9 = vpop.permute.xlu1 %2374 }
0x2168   :  { %v2377_v13 = vmul.f32 %v4090_v54, %v2375_v9 }
0x216a   :  { %2379 = vrot.lane.b32.xlu1 %v2377_v13, %s4346_s5 }
0x2171   :  { %v2230_v0 = vpop.permute.xlu0 %2229 }
0x2172   :  { %3813 = vmatmul.mubr.msk.bf16.vlgmr.msra.gmra.mxu0 %vm152_vm0, %v2230_v0 }
0x2173   :  { %3823 = vmatpush3.bf16.msra.mxu0 %v5052_v12  ;;  %3824 = vmatprep.mubr.msk.bf16.mxu0 %vm4344_vm1, %v4343_v11 }
0x2174   :  { %3834 = vmatprep.subr.bf16.mxu0 %v4343_v11 }
0x217e   :  { %v5291_v19 = vpop.permute.xlu0 %2338 }
0x21dc   :  { %v2380_v6 = vpop.permute.xlu1 %2379 }
0x21dd   :  { %v5275_v29 = vadd.f32 %v2380_v6, %v2372_v24 }
0x21df   :  { %4091 = vtanh.f32 %v5275_v29 }
0x21ec   :  { %v4092_v16 = vpop.eup %4091 }
0x21ed   :  { %2385 = vrot.lane.b32.xlu1 %v4092_v16, %s4347_s4 }
0x2232   :  { %v2268_v28 = vpop.f32.mrf.mxu0 }
0x2233   :  { %v2322_v42 = vadd.f32 %v2268_v28, %v5131_v15 }
0x2234   :  { %v3814_v38 = vpop.f32.mrf.mxu0 }
0x2235   :  { %4093 = vtanh.f32 %v2322_v42  ;;  %v3549_v43 = vmul.f32 -1.442695, %v2322_v42  ;;  %v5336_v42 = vld [vmem:[%s5687_s1 + $0x20] sm:$0xff] }
0x2236   :  { %v2271_v21 = vpop.f32.mrf.mxu0 }
0x2237   :  { %4095 = vpow2.f32 %v3549_v43 }
0x2238   :  { %v3815_v40 = vpop.f32.mrf.mxu0 }
0x2242   :  { %v4094_v7 = vpop.eup %4093 }
0x2243   :  { %2350 = vrot.lane.b32.xlu1 %v4094_v7, %s4345_s2 }
0x2244   :  { %v4096_v60 = vpop.eup %4095 }
0x2245   :  { %v2344_v48 = vadd.f32 1.0, %v4096_v60 }
0x2247   :  { %2332 = vperm.xlu1 %3914, %v5284_v10   ;;  %4097 = vrcp.f32 %v2344_v48  ;;  %v2412_v48 = vsub.f32 %v5275_v29, %v5272_v63 }
0x2254   :  { %v4098_v25 = vpop.eup %4097 }
0x225f   :  { %v2386_v5 = vpop.permute.xlu1 %2385 }
0x2260   :  { %v5287_v37 = vmul.f32 %v4090_v54, %v2386_v5 }
0x2262   :  { %v2409_v30 = vsub.f32 %v5287_v37, %v5210_v36 }
0x2264   :  { %v2410_v59 = vmul.f32 %v2409_v30, %v5291_v19 }
0x2266   :  { %v5295_v33 = vadd.f32 %v2410_v59, %v5210_v36  ;;  %v2218_v36 = vsub.f32 %v5233_v26, %v5230_v53 }
0x2268   :  { %v2462_v20 = vpack.c.bf16 %v5295_v33, %v5295_v33  ;;  %v2219_v45 = vmul.f32 %v2218_v36, %v5247_v56 }
0x226a   :  { %2464 = vrot.lane.b32.xlu0 %v2462_v20, %s4346_s5  ;;  %v5310_v47 = vadd.f32 %v2219_v45, %v5230_v53 }
0x226c   :  { %v2348_v2 = vmul.f32 %v4098_v25, %v5310_v47 }
0x22b5   :  { %v2351_v49 = vpop.permute.xlu1 %2350 }
0x22b6   :  { %v2353_v4 = vmul.f32 %v4098_v25, %v2351_v49 }
0x22b8   :  { %2355 = vrot.lane.b32.xlu0 %v2353_v4, %s4346_s5 }
0x22c2   :  { %v5322_v0 = vpop.permute.xlu1 %2332 }
0x22dc   :  { %v2465_v27 = vpop.permute.xlu0 %2464 }
0x22dd   :  { %3831 = vmatmul.mubr.msk.bf16.vlgmr.msra.gmra.mxu1 %vm152_vm0, %v2465_v27 }
0x22de   :  { %3841 = vmatpush3.bf16.msra.mxu1 %v5064_v55  ;;  %3842 = vmatprep.mubr.msk.bf16.mxu1 %vm4344_vm1, %v4343_v11 }
0x22df   :  { %3852 = vmatprep.subr.bf16.mxu1 %v4343_v11 }
0x232a   :  { %v2356_v32 = vpop.permute.xlu0 %2355 }
0x232b   :  { %v5313_v52 = vadd.f32 %v2356_v32, %v2348_v2 }
0x232d   :  { %4099 = vtanh.f32 %v5313_v52 }
0x233a   :  { %v4100_v22 = vpop.eup %4099 }
0x233b   :  { %2361 = vrot.lane.b32.xlu0 %v4100_v22, %s4347_s4 }
0x239d   :  { %v2503_v62 = vpop.f32.mrf.mxu1 }
0x239e   :  { %2513 = vrot.lane.b32.xlu1 %v2503_v62, %s4336_s26 }
0x239f   :  { %v3832_v8 = vpop.f32.mrf.mxu1 }
0x23a1   :  { %v2506_v26 = vpop.f32.mrf.mxu1 }
0x23a3   :  { %v3833_v54 = vpop.f32.mrf.mxu1 }
0x23ad   :  { %v2362_v9 = vpop.permute.xlu0 %2361 }
0x23ae   :  { %v5318_v13 = vmul.f32 %v4098_v25, %v2362_v9  ;;  %v2413_v25 = vmul.f32 %v2412_v48, %v5291_v19 }
0x23b0   :  { %v2403_v53 = vsub.f32 %v5318_v13, %v5251_v18  ;;  %v5349_v49 = vadd.f32 %v2413_v25, %v5272_v63  ;;  %v3553_v63 = vld [vmem:[%s5687_s1 + $0x18] sm:$0xff] }
0x23b2   :  { %v2404_v44 = vmul.f32 %v2403_v53, %v5322_v0 }
0x23b4   :  { %v5326_v1 = vadd.f32 %v2404_v44, %v5251_v18 }
0x23b6   :  { %v2415_v24 = vpack.c.bf16 %v5326_v1, %v5326_v1 }
0x23b8   :  { %2417 = vrot.lane.b32.xlu0 %v2415_v24, %s4348_s16 }
0x2410   :  { %v2514_v6 = vpop.permute.xlu1 %2513 }
0x2411   :  { %v2516_v16 = vadd.f32 %v2514_v6, %v5146_v35 }
0x2413   :  { %4101 = vtanh.f32 %v2516_v16  ;;  %v3556_v38 = vmul.f32 -1.442695, %v2516_v16 }
0x2415   :  { %4103 = vpow2.f32 %v3556_v38 }
0x2420   :  { %v4102_v28 = vpop.eup %4101 }
0x2421   :  { %2562 = vrot.lane.b32.xlu1 %v4102_v28, %s4345_s2 }
0x2422   :  { %v4104_v21 = vpop.eup %4103 }
0x2423   :  { %v2556_v40 = vadd.f32 1.0, %v4104_v21 }
0x2425   :  { %2526 = vperm.xlu1 %3914, %v5336_v42   ;;  %4105 = vrcp.f32 %v2556_v40 }
0x242a   :  { %v2418_v18 = vpop.permute.xlu0 %2417 }
0x242b   :  { %3825 = vmatmul.mubr.msk.bf16.vlgmr.msra.gmra.mxu0 %vm152_vm0, %v2418_v18  ;;  %v2406_v18 = vsub.f32 %v5313_v52, %v5310_v47 }
0x242c   :  { %3835 = vmatpush3.bf16.msra.mxu0 %v5052_v12  ;;  %3836 = vmatprep.mubr.msk.bf16.mxu0 %vm4344_vm1, %v4343_v11 }
0x242d   :  { %3846 = vmatprep.subr.bf16.mxu0 %v4343_v11  ;;  %v2407_v38 = vmul.f32 %v2406_v18, %v5322_v0 }
0x242f   :  { %v5379_v40 = vadd.f32 %v2407_v38, %v5310_v47 }
0x2432   :  { %v4106_v7 = vpop.eup %4105 }
0x2433   :  { %v2560_v4 = vmul.f32 %v4106_v7, %v5349_v49 }
0x2493   :  { %v2563_v5 = vpop.permute.xlu1 %2562 }
0x2494   :  { %v2565_v30 = vmul.f32 %v4106_v7, %v2563_v5 }
0x2496   :  { %2567 = vrot.lane.b32.xlu0 %v2565_v30, %s4346_s5 }
0x24a0   :  { %v5365_v9 = vpop.permute.xlu1 %2526 }
0x24eb   :  { %v2456_v59 = vpop.f32.mrf.mxu0 }
0x24ec   :  { %v2510_v45 = vadd.f32 %v2456_v59, %v5137_v61 }
0x24ed   :  { %v3826_v20 = vpop.f32.mrf.mxu0 }
0x24ee   :  { %v3555_v29 = vmul.f32 -1.442695, %v2510_v45 }
0x24ef   :  { %v2459_v43 = vpop.f32.mrf.mxu0 }
0x24f1   :  { %v3827_v60 = vpop.f32.mrf.mxu0 }
0x2508   :  { %v2568_v27 = vpop.permute.xlu0 %2567 }
0x2509   :  { %v5352_v36 = vadd.f32 %v2568_v27, %v2560_v4 }
0x250b   :  { %4107 = vtanh.f32 %v5352_v36 }
0x250c   :  { %4109 = vtanh.f32 %v2510_v45 }
0x250d   :  { %4111 = vpow2.f32 %v3555_v29 }
0x2518   :  { %v4108_v2 = vpop.eup %4107 }
0x2519   :  { %2573 = vrot.lane.b32.xlu0 %v4108_v2, %s4347_s4  ;;  %v4110_v32 = vpop.eup %4109 }
0x251a   :  { %v4112_v22 = vpop.eup %4111 }
0x251b   :  { %v2532_v62 = vadd.f32 1.0, %v4112_v22 }
0x251d   :  { %2538 = vrot.lane.b32.xlu0 %v4110_v32, %s4345_s2  ;;  %4113 = vrcp.f32 %v2532_v62 }
0x2521   :  { %2520 = vperm.xlu0 %3915, %v3553_v63  }
0x252a   :  { %v4114_v16 = vpop.eup %4113 }
0x258b   :  { %v2574_v8 = vpop.permute.xlu0 %2573 }
0x258c   :  { %v5361_v26 = vmul.f32 %v4106_v7, %v2574_v8 }
0x258e   :  { %v2597_v54 = vsub.f32 %v5361_v26, %v5295_v33 }
0x258f   :  { %v2539_v6 = vpop.permute.xlu0 %2538 }
0x2590   :  { %v2598_v53 = vmul.f32 %v2597_v54, %v5365_v9  ;;  %v2541_v28 = vmul.f32 %v4114_v16, %v2539_v6 }
0x2592   :  { %v5369_v44 = vadd.f32 %v2598_v53, %v5295_v33  ;;  %v2536_v33 = vmul.f32 %v4114_v16, %v5379_v40 }
0x2594   :  { %v2650_v24 = vpack.c.bf16 %v5369_v44, %v5369_v44 }
0x2596   :  { %2652 = vrot.lane.b32.xlu1 %v2650_v24, %s4346_s5 }
0x259a   :  { %2543 = vrot.lane.b32.xlu1 %v2541_v28, %s4346_s5 }
0x259c   :  { %v5395_v20 = vpop.permute.xlu0 %2520 }
0x2608   :  { %v2653_v21 = vpop.permute.xlu1 %2652 }
0x2609   :  { %3843 = vmatmul.mubr.msk.bf16.vlgmr.msra.gmra.mxu1 %vm152_vm0, %v2653_v21 }
0x260a   :  { %3853 = vmatpush3.bf16.msra.mxu1 %v5064_v55  ;;  %3854 = vmatprep.mubr.msk.bf16.mxu1 %vm4344_vm1, %v4343_v11 }
0x260b   :  { %3864 = vmatprep.subr.bf16.mxu1 %v4343_v11 }
0x260c   :  { %v2544_v7 = vpop.permute.xlu1 %2543 }
0x260d   :  { %v5387_v5 = vadd.f32 %v2544_v7, %v2536_v33 }
0x260f   :  { %4115 = vtanh.f32 %v5387_v5 }
0x261c   :  { %v4116_v52 = vpop.eup %4115 }
0x261d   :  { %2549 = vrot.lane.b32.xlu1 %v4116_v52, %s4347_s4 }
0x268f   :  { %v2550_v47 = vpop.permute.xlu1 %2549 }
0x2690   :  { %v5391_v30 = vmul.f32 %v4114_v16, %v2550_v47 }
0x2692   :  { %v2591_v59 = vsub.f32 %v5391_v30, %v5326_v1 }
0x2694   :  { %v2592_v43 = vmul.f32 %v2591_v59, %v5395_v20 }
0x2696   :  { %v5399_v60 = vadd.f32 %v2592_v43, %v5326_v1 }
0x2698   :  { %v2603_v48 = vpack.c.bf16 %v5399_v60, %v5399_v60 }
0x269a   :  { %2605 = vrot.lane.b32.xlu0 %v2603_v48, %s4348_s16 }
0x26c9   :  { %v2691_v25 = vpop.f32.mrf.mxu1 }
0x26ca   :  { %2701 = vrot.lane.b32.xlu1 %v2691_v25, %s4336_s26 }
0x26cb   :  { %v3844_v4 = vpop.f32.mrf.mxu1 }
0x26cd   :  { %v2694_v27 = vpop.f32.mrf.mxu1 }
0x26cf   :  { %v3845_v45 = vpop.f32.mrf.mxu1 }
0x270c   :  { %v2606_v2 = vpop.permute.xlu0 %2605 }
0x270d   :  { %3837 = vmatmul.mubr.msk.bf16.vlgmr.msra.gmra.mxu0 %vm152_vm0, %v2606_v2  ;;  %v2594_v2 = vsub.f32 %v5387_v5, %v5379_v40 }
0x270e   :  { %3847 = vmatpush3.bf16.msra.mxu0 %v5052_v12  ;;  %3848 = vmatprep.mubr.msk.bf16.mxu0 %vm4344_vm1, %v4343_v11 }
0x270f   :  { %3858 = vmatprep.subr.bf16.mxu0 %v4343_v11 }
0x273c   :  { %v2702_v1 = vpop.permute.xlu1 %2701 }
0x273d   :  { %v2704_v32 = vadd.f32 %v2702_v1, %v5137_v61 }
0x273f   :  { %4117 = vtanh.f32 %v2704_v32  ;;  %v3562_v22 = vmul.f32 -1.442695, %v2704_v32 }
0x2741   :  { %4119 = vpow2.f32 %v3562_v22 }
0x274c   :  { %v4118_v29 = vpop.eup %4117 }
0x274d   :  { %2750 = vrot.lane.b32.xlu0 %v4118_v29, %s4345_s2  ;;  %v2595_v29 = vmul.f32 %v2594_v2, %v5395_v20 }
0x274e   :  { %v4120_v62 = vpop.eup %4119 }
0x274f   :  { %v2744_v8 = vadd.f32 1.0, %v4120_v62 }
0x2751   :  { %2714 = vperm.xlu0 %3915, %v3553_v63   ;;  %4121 = vrcp.f32 %v2744_v8  ;;  %v2600_v63 = vsub.f32 %v5352_v36, %v5349_v49  ;;  %v5443_v8 = vadd.f32 %v2595_v29, %v5379_v40 }
0x2753   :  { %v2601_v33 = vmul.f32 %v2600_v63, %v5365_v9 }
0x2755   :  { %v5419_v7 = vadd.f32 %v2601_v33, %v5349_v49 }
0x275e   :  { %v4122_v54 = vpop.eup %4121 }
0x275f   :  { %v2748_v52 = vmul.f32 %v4122_v54, %v5419_v7 }
0x27bf   :  { %v2751_v53 = vpop.permute.xlu0 %2750 }
0x27c0   :  { %v2753_v24 = vmul.f32 %v4122_v54, %v2751_v53 }
0x27c2   :  { %2755 = vrot.lane.b32.xlu1 %v2753_v24, %s4346_s5 }
0x27cc   :  { %v5426_v36 = vpop.permute.xlu0 %2714 }
0x27cd   :  { %v2644_v6 = vpop.f32.mrf.mxu0 }
0x27ce   :  { %v2698_v16 = vadd.f32 %v2644_v6, %v5146_v35 }
0x27cf   :  { %v3838_v28 = vpop.f32.mrf.mxu0 }
0x27d0   :  { %4123 = vtanh.f32 %v2698_v16  ;;  %v3561_v21 = vmul.f32 -1.442695, %v2698_v16 }
0x27d1   :  { %v2647_v61 = vpop.f32.mrf.mxu0 }
0x27d2   :  { %4125 = vpow2.f32 %v3561_v21 }
0x27d3   :  { %v3839_v18 = vpop.f32.mrf.mxu0 }
0x27dd   :  { %v4124_v38 = vpop.eup %4123 }
0x27de   :  { %2726 = vrot.lane.b32.xlu0 %v4124_v38, %s4345_s2 }
0x27df   :  { %v4126_v59 = vpop.eup %4125 }
0x27e0   :  { %v2720_v43 = vadd.f32 1.0, %v4126_v59 }
0x2834   :  { %v2756_v35 = vpop.permute.xlu1 %2755 }
0x2835   :  { %v5422_v47 = vadd.f32 %v2756_v35, %v2748_v52 }
0x2837   :  { %4127 = vtanh.f32 %v5422_v47 }
0x2838   :  { %4129 = vrcp.f32 %v2720_v43 }
0x2844   :  { %v4128_v48 = vpop.eup %4127 }
0x2845   :  { %2761 = vrot.lane.b32.xlu1 %v4128_v48, %s4347_s4  ;;  %v4130_v25 = vpop.eup %4129 }
0x2846   :  { %v2724_v5 = vmul.f32 %v4130_v25, %v5443_v8 }
0x2850   :  { %v2727_v4 = vpop.permute.xlu0 %2726 }
0x2851   :  { %v2729_v27 = vmul.f32 %v4130_v25, %v2727_v4 }
0x2853   :  { %2731 = vrot.lane.b32.xlu0 %v2729_v27, %s4346_s5 }
0x28b7   :  { %v2762_v49 = vpop.permute.xlu1 %2761 }
0x28b8   :  { %v5429_v45 = vmul.f32 %v4122_v54, %v2762_v49 }
0x28ba   :  { %v2783_v1 = vsub.f32 %v5429_v45, %v5369_v44 }
0x28bc   :  { %v2784_v32 = vmul.f32 %v2783_v1, %v5426_v36 }
0x28be   :  { %v5438_v22 = vadd.f32 %v2784_v32, %v5369_v44 }
0x28c0   :  { %v2836_v62 = vpack.c.bf16 %v5438_v22, %v5438_v22 }
0x28c2   :  { %2838 = vrot.lane.b32.xlu1 %v2836_v62, %s4346_s5 }
0x28c5   :  { %v2732_v54 = vpop.permute.xlu0 %2731 }
0x28c6   :  { %v5447_v53 = vadd.f32 %v2732_v54, %v2724_v5  ;;  %2708 = vperm.xlu1 %3914, %v5336_v42  }
0x28c8   :  { %4131 = vtanh.f32 %v5447_v53 }
0x28d5   :  { %v4132_v24 = vpop.eup %4131 }
0x28d6   :  { %2737 = vrot.lane.b32.xlu0 %v4132_v24, %s4347_s4 }
0x2934   :  { %v2839_v44 = vpop.permute.xlu1 %2838 }
0x2935   :  { %3855 = vmatmul.mubr.msk.bf16.vlgmr.msra.gmra.mxu1 %vm152_vm0, %v2839_v44  ;;  %v2786_v44 = vsub.f32 %v5422_v47, %v5419_v7 }
0x2936   :  { %3865 = vmatpush3.bf16.msra.mxu1 %v5064_v55  ;;  %3866 = vmatprep.mubr.msk.bf16.mxu1 %vm4344_vm1, %v4343_v11 }
0x2937   :  { %3876 = vmatprep.subr.bf16.mxu1 %v4343_v11 }
0x2941   :  { %v5461_v16 = vpop.permute.xlu1 %2708 }
0x2948   :  { %v2738_v40 = vpop.permute.xlu0 %2737 }
0x2949   :  { %v5457_v6 = vmul.f32 %v4130_v25, %v2738_v40  ;;  %v2787_v40 = vmul.f32 %v2786_v44, %v5426_v36 }
0x294b   :  { %v2777_v42 = vsub.f32 %v5457_v6, %v5399_v60 }
0x294d   :  { %v2778_v28 = vmul.f32 %v2777_v42, %v5461_v16  ;;  %v5488_v42 = vadd.f32 %v2787_v40, %v5419_v7 }
0x294f   :  { %v5465_v61 = vadd.f32 %v2778_v28, %v5399_v60 }
0x2951   :  { %v2789_v55 = vpack.c.bf16 %v5465_v61, %v5465_v61 }
0x2953   :  { %2791 = vrot.lane.b32.xlu1 %v2789_v55, %s4348_s16 }
0x29c5   :  { %v2792_v18 = vpop.permute.xlu1 %2791 }
0x29c6   :  { %3849 = vmatmul.mubr.msk.bf16.vlgmr.msra.gmra.mxu0 %vm152_vm0, %v2792_v18 }
0x29c7   :  { %3859 = vmatpush3.bf16.msra.mxu0 %v5052_v12  ;;  %3860 = vmatprep.mubr.msk.bf16.mxu0 %vm4344_vm1, %v4343_v11 }
0x29c8   :  { %3870 = vmatprep.subr.bf16.mxu0 %v4343_v11 }
0x29f5   :  { %v2877_v38 = vpop.f32.mrf.mxu1 }
0x29f6   :  { %2887 = vrot.lane.b32.xlu0 %v2877_v38, %s4336_s26 }
0x29f7   :  { %v3856_v60 = vpop.f32.mrf.mxu1 }
0x29f9   :  { %v2880_v63 = vpop.f32.mrf.mxu1 }
0x29fb   :  { %v3857_v21 = vpop.f32.mrf.mxu1 }
0x2a68   :  { %v2888_v33 = vpop.permute.xlu0 %2887 }
0x2a69   :  { %v2890_v52 = vadd.f32 %v2888_v33, %v5131_v15 }
0x2a6b   :  { %4133 = vtanh.f32 %v2890_v52  ;;  %v3568_v27 = vmul.f32 -1.442695, %v2890_v52 }
0x2a78   :  { %v4134_v35 = vpop.eup %4133 }
0x2a79   :  { %2936 = vrot.lane.b32.xlu1 %v4134_v35, %s4345_s2 }
0x2a86   :  { %v2830_v59 = vpop.f32.mrf.mxu0 }
0x2a87   :  { %v2884_v12 = vadd.f32 %v2830_v59, %v5239_v34 }
0x2a88   :  { %v3850_v43 = vpop.f32.mrf.mxu0 }
0x2a89   :  { %4135 = vtanh.f32 %v2884_v12  ;;  %v3567_v15 = vmul.f32 -1.442695, %v2884_v12 }
0x2a8a   :  { %v2833_v48 = vpop.f32.mrf.mxu0  ;;  %4137 = vpow2.f32 %v3568_v27 }
0x2a8b   :  { %v4182_v48 = vld [vmem:[#allocation13] sm:$0xff]  }
0x2a8c   :  { %v3851_v25 = vpop.f32.mrf.mxu0 }
0x2a96   :  { %v4136_v4 = vpop.eup %4135 }
0x2a97   :  { %2912 = vrot.lane.b32.xlu1 %v4136_v4, %s4345_s2  ;;  %v4138_v49 = vpop.eup %4137 }
0x2a98   :  { %v2930_v2 = vadd.f32 1.0, %v4138_v49 }
0x2a9a   :  { %4139 = vrcp.f32 %v2930_v2 }
0x2a9b   :  { %4141 = vpow2.f32 %v3567_v15 }
0x2aa7   :  { %v4140_v1 = vpop.eup %4139 }
0x2aa8   :  { %v4142_v34 = vpop.eup %4141 }
0x2aa9   :  { %v2906_v62 = vadd.f32 1.0, %v4142_v34 }
0x2aab   :  { %4143 = vrcp.f32 %v2906_v62 }
0x2ab8   :  { %v4144_v5 = vpop.eup %4143 }
0x2aeb   :  { %v2937_v32 = vpop.permute.xlu1 %2936 }
0x2aec   :  { %v2939_v29 = vmul.f32 %v4140_v1, %v2937_v32  ;;  %v4183_v32 = vld [vmem:[#allocation11] sm:$0xff]  }
0x2aee   :  { %2941 = vrot.lane.b32.xlu0 %v2939_v29, %s4346_s5 }
0x2af2   :  { %2900 = vperm.xlu0 %3915, %v5284_v10   ;;  %v2934_v10 = vmul.f32 %v4140_v1, %v5488_v42 }
0x2b09   :  { %v2913_v54 = vpop.permute.xlu1 %2912 }
0x2b0a   :  { %v2915_v24 = vmul.f32 %v4144_v5, %v2913_v54 }
0x2b0c   :  { %2917 = vrot.lane.b32.xlu0 %v2915_v24, %s4346_s5 }
0x2b10   :  { %2894 = vperm.xlu0 %3915, %v5259_v14   ;;  %v2780_v14 = vsub.f32 %v5447_v53, %v5443_v8 }
0x2b12   :  { %v2781_v47 = vmul.f32 %v2780_v14, %v5461_v16 }
0x2b14   :  { %v5501_v7 = vadd.f32 %v2781_v47, %v5443_v8 }
0x2b16   :  { %v2910_v63 = vmul.f32 %v4144_v5, %v5501_v7 }
0x2b60   :  { %v2942_v28 = vpop.permute.xlu0 %2941 }
0x2b61   :  { %v5491_v55 = vadd.f32 %v2942_v28, %v2934_v10 }
0x2b63   :  { %4145 = vtanh.f32 %v5491_v55 }
0x2b6d   :  { %v5498_v38 = vpop.permute.xlu0 %2900 }
0x2b70   :  { %v4146_v18 = vpop.eup %4145 }
0x2b71   :  { %2947 = vrot.lane.b32.xlu1 %v4146_v18, %s4347_s4 }
0x2b7e   :  { %v2918_v60 = vpop.permute.xlu0 %2917 }
0x2b7f   :  { %v5504_v21 = vadd.f32 %v2918_v60, %v2910_v63 }
0x2b81   :  { %4147 = vtanh.f32 %v5504_v21 }
0x2b8b   :  { %v5526_v27 = vpop.permute.xlu0 %2894 }
0x2b8e   :  { %v4148_v12 = vpop.eup %4147 }
0x2be3   :  { %v2948_v33 = vpop.permute.xlu1 %2947 }
0x2be4   :  { %v5507_v52 = vmul.f32 %v4140_v1, %v2948_v33 }
0x2be6   :  { %v2969_v53 = vsub.f32 %v5507_v52, %v5438_v22 }
0x2be8   :  { %v2970_v35 = vmul.f32 %v2969_v53, %v5498_v38 }
0x2bea   :  { %v5513_v59 = vadd.f32 %v2970_v35, %v5438_v22 }
0x2bec   :  { %v3022_v8 = vpack.c.bf16 %v5513_v59, %v5513_v59 }
0x2bee   :  { %3024 = vrot.lane.b32.xlu1 %v3022_v8, %s4346_s5 }
0x2bf2   :  { %2923 = vrot.lane.b32.xlu1 %v4148_v12, %s4347_s4 }
0x2c60   :  { %v3025_v43 = vpop.permute.xlu1 %3024 }
0x2c61   :  { %3867 = vmatmul.mubr.msk.bf16.vlgmr.msra.gmra.mxu1 %vm152_vm0, %v3025_v43 }
0x2c62   :  { %3877 = vmatpush3.bf16.msra.mxu1 %v4182_v48  ;;  %3878 = vmatprep.mubr.msk.bf16.mxu1 %vm4344_vm1, %v4343_v11 }
0x2c64   :  { %v2924_v25 = vpop.permute.xlu1 %2923 }
0x2c65   :  { %v5522_v4 = vmul.f32 %v4144_v5, %v2924_v25 }
0x2c67   :  { %v2963_v22 = vsub.f32 %v5522_v4, %v5465_v61 }
0x2c69   :  { %v2964_v49 = vmul.f32 %v2963_v22, %v5526_v27 }
0x2c6b   :  { %v5530_v2 = vadd.f32 %v2964_v49, %v5465_v61 }
0x2c6d   :  { %v2975_v15 = vpack.c.bf16 %v5530_v2, %v5530_v2 }
0x2c6f   :  { %2977 = vrot.lane.b32.xlu0 %v2975_v15, %s4348_s16  ;;  %v2966_v15 = vsub.f32 %v5504_v21, %v5501_v7 }
0x2ce1   :  { %v2978_v1 = vpop.permute.xlu0 %2977 }
0x2ce2   :  { %3861 = vmatmul.mubr.msk.bf16.vlgmr.msra.gmra.mxu0 %vm152_vm0, %v2978_v1  ;;  %v2967_v1 = vmul.f32 %v2966_v15, %v5526_v27 }
0x2ce3   :  { %3871 = vmatpush3.bf16.msra.mxu0 %v4183_v32  ;;  %3872 = vmatprep.mubr.msk.bf16.mxu0 %vm4344_vm1, %v4343_v11 }
0x2ce4   :  { %v5561_v32 = vadd.f32 %v2967_v1, %v5501_v7 }
0x2d21   :  { %v3063_v29 = vpop.f32.mrf.mxu1 }
0x2d22   :  { %3073 = vrot.lane.b32.xlu1 %v3063_v29, %s4336_s26 }
0x2d23   :  { %v3868_v34 = vpop.f32.mrf.mxu1 }
0x2d25   :  { %v3066_v62 = vpop.f32.mrf.mxu1 }
0x2d27   :  { %v3869_v61 = vpop.f32.mrf.mxu1 }
0x2d94   :  { %v3074_v5 = vpop.permute.xlu1 %3073 }
0x2d95   :  { %v3076_v54 = vadd.f32 %v3074_v5, %v5140_v51 }
0x2d97   :  { %4149 = vtanh.f32 %v3076_v54  ;;  %v3574_v14 = vmul.f32 -1.442695, %v3076_v54 }
0x2da2   :  { %v3016_v24 = vpop.f32.mrf.mxu0 }
0x2da3   :  { %v3070_v44 = vadd.f32 %v3016_v24, %v5143_v57 }
0x2da4   :  { %v4150_v40 = vpop.eup %4149  ;;  %v3862_v10 = vpop.f32.mrf.mxu0 }
0x2da5   :  { %4151 = vtanh.f32 %v3070_v44  ;;  %3122 = vrot.lane.b32.xlu0 %v4150_v40, %s4345_s2  ;;  %v3573_v51 = vmul.f32 -1.442695, %v3070_v44 }
0x2da6   :  { %v3019_v28 = vpop.f32.mrf.mxu0  ;;  %4153 = vpow2.f32 %v3574_v14 }
0x2da7   :  { %4155 = vpow2.f32 %v3573_v51 }
0x2da8   :  { %v3863_v11 = vpop.f32.mrf.mxu0 }
0x2db2   :  { %v4152_v18 = vpop.eup %4151 }
0x2db3   :  { %3098 = vrot.lane.b32.xlu0 %v4152_v18, %s4345_s2  ;;  %v4154_v47 = vpop.eup %4153 }
0x2db4   :  { %v3116_v57 = vadd.f32 1.0, %v4154_v47  ;;  %v4156_v60 = vpop.eup %4155 }
0x2db5   :  { %v3092_v63 = vadd.f32 1.0, %v4156_v60 }
0x2db6   :  { %4157 = vrcp.f32 %v3116_v57 }
0x2db7   :  { %3086 = vperm.xlu0 %3915, %v5226_v31   ;;  %4159 = vrcp.f32 %v3092_v63 }
0x2dbb   :  { %3080 = vperm.xlu0 %3915, %v5182_v58   ;;  %v2972_v58 = vsub.f32 %v5491_v55, %v5488_v42 }
0x2dbd   :  { %v2973_v43 = vmul.f32 %v2972_v58, %v5498_v38 }
0x2dbf   :  { %v5551_v48 = vadd.f32 %v2973_v43, %v5488_v42 }
0x2dc3   :  { %v4158_v33 = vpop.eup %4157 }
0x2dc4   :  { %v4160_v8 = vpop.eup %4159  ;;  %v3120_v25 = vmul.f32 %v4158_v33, %v5551_v48 }
0x2dc5   :  { %v3096_v55 = vmul.f32 %v4160_v8, %v5561_v32 }
0x2e17   :  { %v3123_v53 = vpop.permute.xlu0 %3122 }
0x2e18   :  { %v3125_v35 = vmul.f32 %v4158_v33, %v3123_v53 }
0x2e1a   :  { %3127 = vrot.lane.b32.xlu1 %v3125_v35, %s4346_s5 }
0x2e25   :  { %v3099_v12 = vpop.permute.xlu0 %3098 }
0x2e26   :  { %v3101_v31 = vmul.f32 %v4160_v8, %v3099_v12 }
0x2e28   :  { %3103 = vrot.lane.b32.xlu1 %v3101_v31, %s4346_s5 }
0x2e32   :  { %v5570_v54 = vpop.permute.xlu0 %3086 }
0x2e36   :  { %v5579_v11 = vpop.permute.xlu0 %3080 }
0x2e8c   :  { %v3128_v22 = vpop.permute.xlu1 %3127 }
0x2e8d   :  { %v5554_v49 = vadd.f32 %v3128_v22, %v3120_v25 }
0x2e8f   :  { %4161 = vtanh.f32 %v5554_v49 }
0x2e9a   :  { %v3104_v29 = vpop.permute.xlu1 %3103 }
0x2e9b   :  { %v5564_v42 = vadd.f32 %v3104_v29, %v3096_v55 }
0x2e9c   :  { %v4162_v34 = vpop.eup %4161 }
0x2e9d   :  { %4163 = vtanh.f32 %v5564_v42  ;;  %3133 = vrot.lane.b32.xlu1 %v4162_v34, %s4347_s4 }
0x2eaa   :  { %v4164_v62 = vpop.eup %4163 }
0x2eab   :  { %3109 = vrot.lane.b32.xlu1 %v4164_v62, %s4347_s4 }
0x2f0f   :  { %v3134_v61 = vpop.permute.xlu1 %3133 }
0x2f10   :  { %v3136_v21 = vmul.f32 %v4158_v33, %v3134_v61 }
0x2f12   :  { %v3155_v5 = vsub.f32 %v3136_v21, %v5513_v59 }
0x2f14   :  { %v3156_v7 = vmul.f32 %v3155_v5, %v5570_v54 }
0x2f16   :  { %v3157_v24 = vadd.f32 %v3156_v7, %v5513_v59 }
0x2f18   :  { %v3208_v44 = vpack.c.bf16 %v3157_v24, %v3157_v24  ;;  %v3269_v24 = vld [vmem:[%s5687_s1] sm:$0xff] }
0x2f1a   :  { %3210 = vrot.lane.b32.xlu0 %v3208_v44, %s4346_s5  ;;  %v3577_v44 = vld [vmem:[%s5687_s1 + $0x38] sm:$0xff] }
0x2f1d   :  { %v3110_v40 = vpop.permute.xlu1 %3109 }
0x2f1e   :  { %v5575_v10 = vmul.f32 %v4160_v8, %v3110_v40  ;;  %v2389_v40 = vmul.f32 %v5318_v13, %v5322_v0  ;;  %v3158_v0 = vsub.f32 %v5554_v49, %v5551_v48 }
0x2f20   :  { %v3149_v28 = vsub.f32 %v5575_v10, %v5530_v2  ;;  %v3137_v13 = vmul.f32 %v5575_v10, %v5579_v11 }
0x2f22   :  { %v3150_v18 = vmul.f32 %v3149_v28, %v5579_v11  ;;  %v3143_v28 = vmul.f32 %v3136_v21, %v5570_v54 }
0x2f24   :  { %v3151_v14 = vadd.f32 %v3150_v18, %v5530_v2  ;;  %v2771_v18 = vmul.f32 %v5429_v45, %v5426_v36 }
0x2f26   :  { %v3161_v51 = vpack.c.bf16 %v3151_v14, %v3151_v14  ;;  %v2396_v14 = vmul.f32 %v5287_v37, %v5291_v19  ;;  %v3152_v37 = vsub.f32 %v5564_v42, %v5561_v32  ;;  %v3159_v19 = vmul.f32 %v3158_v0, %v5570_v54 }
0x2f28   :  { %3163 = vrot.lane.b32.xlu1 %v3161_v51, %s4348_s16  ;;  %v3160_v36 = vadd.f32 %v3159_v19, %v5551_v48 }
0x2f8c   :  { %v3211_v47 = vpop.permute.xlu0 %3210 }
0x2f8d   :  { %3879 = vmatmul.mubr.msk.bf16.vlgmr.msra.gmra.mxu1 %vm152_vm0, %v3211_v47 }
0x2f9a   :  { %v3164_v59 = vpop.permute.xlu1 %3163 }
0x2f9b   :  { %3873 = vmatmul.mubr.msk.bf16.vlgmr.msra.gmra.mxu0 %vm152_vm0, %v3164_v59 }
0x304d   :  { %v3249_v57 = vpop.f32.mrf.mxu1 }
0x304e   :  { %3259 = vrot.lane.b32.xlu0 %v3249_v57, %s4336_s26  ;;  %v2577_v57 = vmul.f32 %v5391_v30, %v5395_v20  ;;  %v3923_v30 = vld [vmem:[#allocation14 + $0x8] sm:$0xff]   ;;  %v3924_v20 = vld [vmem:[#allocation14] sm:$0xff]  }
0x304f   :  { %v3880_v60 = vpop.f32.mrf.mxu1  ;;  %3882 = vmatprep.subr.bf16.mxu0 %v3923_v30 }
0x3050   :  { %3883 = vmatpush3.bf16.msra.mxu0 %v3923_v30 }
0x3051   :  { %v3252_v63 = vpop.f32.mrf.mxu1  ;;  %3884 = vmatprep.subr.bf16.mxu0 %v3924_v20 }
0x3052   :  { %v2957_v63 = vmul.f32 %v5507_v52, %v5498_v38 }
0x3053   :  { %v3881_v33 = vpop.f32.mrf.mxu1 }
0x3054   :  { %3885 = vmatpush3.bf16.msra.mxu0 %v3924_v20 }
0x305b   :  { %v3202_v53 = vpop.f32.mrf.mxu0 }
0x305c   :  { %v3256_v35 = vadd.f32 %v3202_v53, %v5149_v23 }
0x305d   :  { %v3874_v8 = vpop.f32.mrf.mxu0 }
0x305e   :  { %4165 = vtanh.f32 %v3256_v35  ;;  %v3578_v58 = vmul.f32 -1.442695, %v3256_v35 }
0x305f   :  { %v3205_v2 = vpop.f32.mrf.mxu0 }
0x3060   :  { %4167 = vpow2.f32 %v3578_v58  ;;  %v2951_v2 = vmul.f32 %v5522_v4, %v5526_v27 }
0x3061   :  { %v3875_v12 = vpop.f32.mrf.mxu0 }
0x306b   :  { %v4166_v31 = vpop.eup %4165 }
0x306c   :  { %3284 = vrot.lane.b32.xlu0 %v4166_v31, %s4345_s2 }
0x306d   :  { %v4168_v22 = vpop.eup %4167 }
0x306e   :  { %v3278_v15 = vadd.f32 1.0, %v4168_v22 }
0x30c0   :  { %v3260_v43 = vpop.permute.xlu0 %3259 }
0x30c1   :  { %v3262_v25 = vadd.f32 %v3260_v43, %v5134_v17 }
0x30c3   :  { %4169 = vtanh.f32 %v3262_v25  ;;  %v3579_v34 = vmul.f32 -1.442695, %v3262_v25 }
0x30c4   :  { %4171 = vrcp.f32 %v3278_v15 }
0x30c5   :  { %4173 = vpow2.f32 %v3579_v34 }
0x30d0   :  { %v4170_v1 = vpop.eup %4169 }
0x30d1   :  { %3308 = vrot.lane.b32.xlu1 %v4170_v1, %s4345_s2  ;;  %v5591_v23 = vpop.eup %4171 }
0x30d2   :  { %v4174_v62 = vpop.eup %4173 }
0x30d3   :  { %v3302_v61 = vadd.f32 1.0, %v4174_v62 }
0x30d5   :  { %4175 = vrcp.f32 %v3302_v61 }
0x30de   :  { %v3285_v55 = vpop.permute.xlu0 %3284 }
0x30df   :  { %v3287_v29 = vmul.f32 %v5591_v23, %v3285_v55 }
0x30e1   :  { %3289 = vrot.lane.b32.xlu0 %v3287_v29, %s4346_s5 }
0x30e2   :  { %v5595_v17 = vpop.eup %4175 }
0x3143   :  { %v3309_v5 = vpop.permute.xlu1 %3308 }
0x3144   :  { %v3311_v7 = vmul.f32 %v5595_v17, %v3309_v5 }
0x3146   :  { %3313 = vrot.lane.b32.xlu1 %v3311_v7, %s4346_s5 }
0x314a   :  { %3272 = vperm.xlu1 %3914, %v3269_v24  }
0x314e   :  { %3266 = vperm.xlu1 %3914, %v3577_v44  }
0x3152   :  { %2022 = vrot.lane.b32.xlu1 %v5184_v46, %s4348_s16  ;;  %v2765_v46 = vmul.f32 %v5457_v6, %v5461_v16  ;;  %v3306_v6 = vmul.f32 %v5595_v17, %v3160_v36 }
0x3153   :  { %v3290_v16 = vpop.permute.xlu0 %3289 }
0x3156   :  { %2391 = vrot.lane.b32.xlu1 %v2389_v40, %s4348_s16  ;;  %v3580_v40 = vld [vmem:[%s5697_s11] ss:$0 sm:$0xff] }
0x315a   :  { %3145 = vrot.lane.b32.xlu1 %v3143_v28, %s4347_s4 }
0x315e   :  { %2773 = vrot.lane.b32.xlu1 %v2771_v18, %s4347_s4 }
0x3162   :  { %2398 = vrot.lane.b32.xlu1 %v2396_v14, %s4347_s4 }
0x3166   :  { %2028 = vrot.lane.b32.xlu1 %v5159_v50, %s4347_s4  ;;  %v3153_v50 = vmul.f32 %v3152_v37, %v5579_v11 }
0x3168   :  { %v3154_v45 = vadd.f32 %v3153_v50, %v5561_v32  ;;  %v2201_v32 = vmul.f32 %v5242_v41, %v5247_v56  ;;  %v2584_v41 = vmul.f32 %v5361_v26, %v5365_v9  ;;  %v2208_v26 = vmul.f32 %v5202_v3, %v5206_v39 }
0x316a   :  { %2767 = vrot.lane.b32.xlu1 %v2765_v46, %s4348_s16  ;;  %v3282_v10 = vmul.f32 %v5591_v23, %v3154_v45 }
0x316c   :  { %v3292_v47 = vadd.f32 %v3290_v16, %v3282_v10 }
0x316e   :  { %3139 = vrot.lane.b32.xlu1 %v3137_v13, %s4348_s16 }
0x31b8   :  { %v3314_v21 = vpop.permute.xlu1 %3313 }
0x31b9   :  { %v3316_v51 = vadd.f32 %v3314_v21, %v3306_v6 }
0x31bb   :  { %4177 = vtanh.f32 %v3316_v51 }
0x31bc   :  { %4179 = vtanh.f32 %v3292_v47 }
0x31c5   :  { %v3273_v49 = vpop.permute.xlu1 %3272 }
0x31c8   :  { %v4178_v42 = vpop.eup %4177 }
0x31c9   :  { %3319 = vrot.lane.b32.xlu0 %v4178_v42, %s4347_s4  ;;  %v3267_v54 = vpop.permute.xlu1 %3266  ;;  %v4180_v11 = vpop.eup %4179 }
0x31cd   :  { %3295 = vrot.lane.b32.xlu0 %v4180_v11, %s4347_s4  ;;  %v2023_v48 = vpop.permute.xlu1 %2022 }
0x31ce   :  { %2025 = vst.msk [vmem:[#allocation3] sm:$0xff] %vm152_vm0, %v2023_v48 }
0x31d1   :  { %2203 = vrot.lane.b32.xlu0 %v2201_v32, %s4348_s16  ;;  %v2392_v59 = vpop.permute.xlu1 %2391 }
0x31d2   :  { %2395 = vst.msk [vmem:[#allocation3 + $0x10] sm:$0xff] %vm152_vm0, %v2392_v59 }
0x31d5   :  { %v3146_v60 = vpop.permute.xlu1 %3145  ;;  %2579 = vrot.lane.b32.xlu0 %v2577_v57, %s4348_s16 }
0x31d9   :  { %v2774_v33 = vpop.permute.xlu1 %2773  ;;  %2959 = vrot.lane.b32.xlu0 %v2957_v63, %s4347_s4 }
0x31dd   :  { %v2399_v56 = vpop.permute.xlu1 %2398  ;;  %2586 = vrot.lane.b32.xlu0 %v2584_v41, %s4347_s4 }
0x31de   :  { %2402 = vst.msk [vmem:[#allocation3 + $0x28] sm:$0xff] %vm419_vm2, %v2399_v56 }
0x31e1   :  { %v2029_v53 = vpop.permute.xlu1 %2028 }
0x31e2   :  { %2032 = vst.msk [vmem:[#allocation3 + $0x38] sm:$0xff] %vm419_vm2, %v2029_v53 }
0x31e5   :  { %v2768_v43 = vpop.permute.xlu1 %2767 }
0x31e9   :  { %v3140_v25 = vpop.permute.xlu1 %3139 }
0x323b   :  { %v3320_v38 = vpop.permute.xlu0 %3319 }
0x323c   :  { %v3322_v52 = vmul.f32 %v5595_v17, %v3320_v38 }
0x323e   :  { %v3329_v35 = vmul.f32 %v3322_v52, %v3273_v49 }
0x323f   :  { %v3296_v8 = vpop.permute.xlu0 %3295 }
0x3240   :  { %3331 = vrot.lane.b32.xlu0 %v3329_v35, %s4347_s4  ;;  %v3298_v12 = vmul.f32 %v5591_v23, %v3296_v8 }
0x3242   :  { %v3323_v3 = vmul.f32 %v3298_v12, %v3267_v54 }
0x3243   :  { %v2204_v9 = vpop.permute.xlu0 %2203 }
0x3244   :  { %2207 = vst.msk [vmem:[#allocation3 + $0x8] sm:$0xff] %vm152_vm0, %v2204_v9  ;;  %2210 = vrot.lane.b32.xlu0 %v2208_v26, %s4347_s4  ;;  %s4349_s4 = smov [#allocation16]  }
0x3245   :  { %3148 = vst.msk [vmem:[#allocation3 + $0x8] sm:$0xff] %vm419_vm2, %v3146_v60 }
0x3247   :  { %v2580_v31 = vpop.permute.xlu0 %2579 }
0x3248   :  { %2583 = vst.msk [vmem:[#allocation3 + $0x18] sm:$0xff] %vm152_vm0, %v2580_v31  ;;  %2953 = vrot.lane.b32.xlu0 %v2951_v2, %s4348_s16 }
0x3249   :  { %2776 = vst.msk [vmem:[#allocation3 + $0x18] sm:$0xff] %vm419_vm2, %v2774_v33 }
0x324b   :  { %v2960_v39 = vpop.permute.xlu0 %2959 }
0x324c   :  { %2962 = vst.msk [vmem:[#allocation3 + $0x10] sm:$0xff] %vm419_vm2, %v2960_v39  ;;  %3325 = vrot.lane.b32.xlu0 %v3323_v3, %s4348_s16  ;;  %v3336_v23 = vld [vmem:[#allocation3 + $0x8] sm:$0xff]  ;;  %s3460_s16 = sshll.u32 %s4349_s4, 4  ;;  %s3461_s16 = int_to_ptr.vmem [resolvable:$true] %s3460_s16 }
0x324d   :  { %s4304_s11 = scalar_lea.vmem %s3461_s16, 1024  ;;  %p4309_p3 = scmp.lt.s32.totalorder %s3461_s16, %s3461_s16 }
0x324e   :  { %p4305_p2 = scmp.ne.s32.totalorder %s3461_s16, %s4304_s11  ;;  %p4310_p4 = scmp.lt.s32.totalorder %s4304_s11, %s4304_s11 }
0x324f   :  { %v2587_v58 = vpop.permute.xlu0 %2586 }
0x3250   :  { %2590 = vst.msk [vmem:[#allocation3 + $0x20] sm:$0xff] %vm419_vm2, %v2587_v58  ;;  %v3338_v29 = vld [vmem:[#allocation3 + $0x18] sm:$0xff]  ;;  %p4311_p5 = por %p4310_p4, %p4309_p3 }
0x3251   :  { %2770 = vst.msk [vmem:[#allocation3 + $0x20] sm:$0xff] %vm152_vm0, %v2768_v43 }
0x3252   :  { %p4312_p6 = pnand %p4311_p5, %p4305_p2 }
0x3253   :  { %v3337_v22 = vld [vmem:[#allocation3 + $0x10] sm:$0xff] }
0x3254   :  { %v3344_v34 = vpack.c.bf16 %v3338_v29, %v3337_v22 }
0x3258   :  { %v3339_v61 = vld [vmem:[#allocation3 + $0x20] sm:$0xff] }
0x32b2   :  { %v3332_v4 = vpop.permute.xlu0 %3331 }
0x32b3   :  { %3334 = vst.msk [vmem:[#allocation3] sm:$0xff] %vm419_vm2, %v3332_v4 }
0x32b6   :  { %v2211_v27 = vpop.permute.xlu0 %2210 }
0x32b7   :  { %2214 = vst.msk [vmem:[#allocation3 + $0x30] sm:$0xff] %vm419_vm2, %v2211_v27 }
0x32b8   :  { %3142 = vst.msk [vmem:[#allocation3 + $0x30] sm:$0xff] %vm152_vm0, %v3140_v25 }
0x32ba   :  { %v2954_v15 = vpop.permute.xlu0 %2953  ;;  %v3335_v1 = vld [vmem:[#allocation3] sm:$0xff] }
0x32bb   :  { %2956 = vst.msk [vmem:[#allocation3 + $0x28] sm:$0xff] %vm152_vm0, %v2954_v15  ;;  %v3343_v55 = vpack.c.bf16 %v3336_v23, %v3335_v1 }
0x32bd   :  { %3886 = vmatprep.mubr.msk.bf16.mxu0 %vm1770_vm3, %v3343_v55 }
0x32be   :  { %3887 = vmatmul.mubr.msk.bf16.vlgmr.msra.gmra.mxu0 %vm1770_vm3, %v3344_v34  ;;  %v3326_v62 = vpop.permute.xlu0 %3325 }
0x32bf   :  { %3328 = vst.msk [vmem:[#allocation3 + $0x38] sm:$0xff] %vm152_vm0, %v3326_v62  ;;  %v3341_v7 = vld [vmem:[#allocation3 + $0x30] sm:$0xff] }
0x32c2   :  { %v3340_v17 = vld [vmem:[#allocation3 + $0x28] sm:$0xff] }
0x32c3   :  { %v3345_v5 = vpack.c.bf16 %v3340_v17, %v3339_v61 }
0x32c5   :  { %3890 = vmatprep.mubr.msk.bf16.mxu0 %vm1770_vm3, %v3345_v5 }
0x32c6   :  { %v3342_v24 = vld [vmem:[#allocation3 + $0x38] sm:$0xff] }
0x32c7   :  { %v3346_v44 = vpack.c.bf16 %v3342_v24, %v3341_v7 }
0x32c9   :  { %3891 = vmatmul.mubr.msk.bf16.gmra.mxu0 %vm1770_vm3, %v3346_v44 }
0x337e   :  { %v3888_v28 = vpop.f32.mrf.mxu0 }
0x337f   :  { %v3425_v18 = vadd.f32 %v3888_v28, %v3580_v40 }
0x3380   :  { %v3416_v14 = vpop.f32.mrf.mxu0 }
0x3381   :  { %3449 = vst [vmem:[#allocation16 + $0x10] sm:$0xff] %v3425_v18  ;;  %v3417_v46 = vadd.f32 %v3580_v40, %v3416_v14 }
0x3382   :  { %v3889_v13 = vpop.f32.mrf.mxu0 }
0x3383   :  { %3447 = vst [vmem:[#allocation16] sm:$0xff] %v3417_v46  ;;  %v3428_v0 = vadd.f32 %v3889_v13, %v3580_v40 }
0x3384   :  { %v3419_v37 = vpop.f32.mrf.mxu0 }
0x3385   :  { %3450 = vst [vmem:[#allocation16 + $0x18] sm:$0xff] %v3428_v0  ;;  %v3420_v19 = vadd.f32 %v3580_v40, %v3419_v37 }
0x3387   :  { %3448 = vst [vmem:[#allocation16 + $0x8] sm:$0xff] %v3420_v19 }
0x3389   :  { %v3892_v50 = vpop.f32.mrf.mxu0 }
0x338a   :  { %v3441_v36 = vadd.f32 %v3892_v50, %v3580_v40 }
0x338b   :  { %v3432_v45 = vpop.f32.mrf.mxu0 }
0x338c   :  { %3453 = vst [vmem:[#allocation16 + $0x30] sm:$0xff] %v3441_v36  ;;  %v3433_v6 = vadd.f32 %v3580_v40, %v3432_v45 }
0x338d   :  { %v3893_v16 = vpop.f32.mrf.mxu0 }
0x338e   :  { %3451 = vst [vmem:[#allocation16 + $0x20] sm:$0xff] %v3433_v6  ;;  %v3444_v21 = vadd.f32 %v3893_v16, %v3580_v40 }
0x338f   :  { %v3435_v10 = vpop.f32.mrf.mxu0 }
0x3390   :  { %3454 = vst [vmem:[#allocation16 + $0x38] sm:$0xff] %v3444_v21  ;;  %v3436_v51 = vadd.f32 %v3580_v40, %v3435_v10 }
0x3392   :  { %3452 = vst [vmem:[#allocation16 + $0x28] sm:$0xff] %v3436_v51 }
0x3393   :  { %4315 = shalt.err (!%p4312_p6)
}
0x3394   :  { %s4350_s24 = smov 128   ;;  %s4351_s25 = smov 8  }
0x3395   :  { %3466 = dma.vmem_to_hbm [thread:$0]  %s3461_s16, 1024, %s5698_s12, [#allocation7], %s4350_s24, %s4350_s24, %s4351_s25  }
0x3396   :  { %4332 = dma.done.wait [#allocation7], 1024  }
0x3397   :  { %4333 = vsyncadd [#allocation7], 4294966272 }
0x3398   :  { %3470 = vsyncpa [#allocation6], 1 }
0x3399   :  { %3471 = vsyncpa [#allocation9], 1 }
0x339a   :  { %3472 = vsyncpa [#allocation12], 1 }
0x339b   :  { %3473 = vsyncpa [#allocation15], 1 }
0x339c   :  { %3474 = vsyncpa [#allocation7], 1 }

</bundles_post_ra>
